<compile_context>
chip_gen: v6e
topology: v6e:2x2x1
jax: 0.10.0
libtpu: 0.0.40
codegen_flags: <defaults>
</compile_context>

<pallas_src>
import functools

import numpy as np
import jax
import jax.numpy as jnp
from jax.experimental import pallas as pl
from jax.experimental.pallas import tpu as pltpu


def _round_up(v, m):
    return -(-v // m) * m


def _pad_gate_rows(w, H, Hp):
    """(4H, C) -> (4Hp, C): zero-pad each of the 4 stacked gate blocks [i,f,g,o]."""
    C = w.shape[1]
    return jnp.pad(w.reshape(4, H, C), ((0, 0), (0, Hp - H), (0, 0))).reshape(4 * Hp, C)


def _pad_gate_vec(b, H, Hp):
    return jnp.pad(b.reshape(4, H), ((0, 0), (0, Hp - H))).reshape(4 * Hp)


def _lstm_fused_kernel(x_ref, lens_ref, wih0_ref, whh_ref, bias_ref,
                       h0_ref, c0_ref, *rest,
                       num_layers, hidden_pad, chunk, mxu_dtype):
    """All LSTM layers fused; grid = (batch_block [parallel], time_chunk [serial]).

    Layer-major over a chunk: per layer, one chunk-wide input-projection matmul
    into gbuf, then `chunk` serial steps with only the recurrent dot.
    Recurrent h/c state lives in the hT/cT output refs (constant chunk index).
    """
    if num_layers > 1:
        wih_rest_ref, out_ref, h_ref, c_ref, gbuf, xbuf = rest
    else:
        out_ref, h_ref, c_ref, gbuf = rest
        wih_rest_ref = None
        xbuf = None

    Hp = hidden_pad
    Tc = chunk
    Bb = x_ref.shape[1]
    E = x_ref.shape[2]
    ci = pl.program_id(1)

    @pl.when(ci == 0)
    def _():
        h_ref[...] = h0_ref[...].astype(h_ref.dtype)
        c_ref[...] = c0_ref[...].astype(c_ref.dtype)

    t0 = ci * Tc
    lens = lens_ref[...]                                   # (Bb, 1) int32, resident

    for l in range(num_layers):
        # ---- chunk-wide input projection: one fat MXU matmul per layer -------
        if l == 0:
            inp = x_ref[...].reshape(Tc * Bb, E)           # f32, tile-aligned merge
            w_in = wih0_ref[...]
        else:
            inp = xbuf[...]                                # (Tc*Bb, Hp) f32
            w_in = wih_rest_ref[l - 1]
        gx = jnp.dot(inp.astype(mxu_dtype), w_in,
                     preferred_element_type=jnp.float32)   # (Tc*Bb, 4Hp) f32
        gbuf[...] = gx + bias_ref[l]                       # bias broadcast (1, 4Hp)

        # ---- serial recurrence over the chunk (only the skinny dot left) -----
        h = h_ref[l]                                       # (Bb, Hp) f32
        c = c_ref[l]
        last = l == num_layers - 1
        for tc in range(Tc):
            gates = (gbuf[pl.ds(tc * Bb, Bb), :]
                     + jnp.dot(h.astype(mxu_dtype), whh_ref[l],
                               preferred_element_type=jnp.float32))
            # PyTorch gate order [i, f, g, o]; slices are lane-aligned (Hp%128==0).
            i_g = jax.nn.sigmoid(gates[:, 0 * Hp:1 * Hp])
            f_g = jax.nn.sigmoid(gates[:, 1 * Hp:2 * Hp])
            g_g = jnp.tanh(gates[:, 2 * Hp:3 * Hp])
            o_g = jax.nn.sigmoid(gates[:, 3 * Hp:4 * Hp])
            c_new = f_g * c + i_g * g_g
            h_new = o_g * jnp.tanh(c_new)

            # packed-sequence semantics: state frozen past each length.
            valid = lens > (t0 + tc)                       # (Bb, 1) bool
            c = jnp.where(valid, c_new, c)
            h = jnp.where(valid, h_new, h)
            if last:
                # pad_packed_sequence zero-pads outputs past each length.
                out_ref[tc] = jnp.where(valid, h, 0.0).astype(out_ref.dtype)
            else:
                xbuf[pl.ds(tc * Bb, Bb), :] = h
        h_ref[l] = h
        c_ref[l] = c


def _vmem_limit_bytes():
    # Per-generation VMEM budget (v7x has only 64 MiB/TC); leave headroom for
    # Mosaic internal scratch.
    try:
        cap = int(pltpu.get_tpu_info().vmem_capacity_bytes)
    except Exception:
        cap = 64 * 1024 * 1024
    return int(max(32 * 1024 * 1024, min(cap - 8 * 1024 * 1024, 112 * 1024 * 1024)))


def lstm_layer_forward(x, x_lens, init_state, params, *,
                       time_chunk=16, mxu_dtype=jnp.bfloat16, batch_block=None):
    """Equivalent of LSTMLayer.forward.

    x: (T, B, E); x_lens: (B,) int; init_state: (h0, c0) each (L, B, H);
    params: list of (w_ih, w_hh, b_ih, b_hh) per layer (PyTorch layout).
    Returns (rnn_output (max(x_lens), B, H), (ht, ct) each (L, B, H)).
    batch_block: split the batch into blocks of this size on a "parallel" grid
    axis (v7x megacore); must be a multiple of 8 dividing the padded batch.
    """
    T, B, E = x.shape
    h0_all, c0_all = init_state
    L, _, H = h0_all.shape
    assert len(params) == L

    Hp = _round_up(H, 128)                 # lane-dense gate slices & output stores
    B_pad = _round_up(B, 8)                # sublane alignment
    Bb = B_pad if batch_block is None else int(batch_block)
    assert B_pad % Bb == 0 and Bb % 8 == 0

    Tc = int(min(int(time_chunk), T))
    n_chunks = -(-T // Tc)
    T_pad = n_chunks * Tc

    # ---- padded inputs (padded batch rows get len=0 -> frozen state, zero out) --
    x_p = jnp.pad(x, ((0, T_pad - T), (0, B_pad - B), (0, 0)))
    lens = jnp.pad(x_lens.astype(jnp.int32), (0, B_pad - B)).reshape(B_pad, 1)
    h0_p = jnp.pad(h0_all, ((0, 0), (0, B_pad - B), (0, Hp - H))).astype(jnp.float32)
    c0_p = jnp.pad(c0_all, ((0, 0), (0, B_pad - B), (0, Hp - H))).astype(jnp.float32)

    # ---- weights: gate-block padded so padded hidden units stay exactly zero ----
    wih0_t = jnp.transpose(_pad_gate_rows(params[0][0], H, Hp)).astype(mxu_dtype)

    whh_list, bias_list, wrest_list = [], [], []
    for l in range(L):
        w_ih, w_hh, b_ih, b_hh = params[l]
        w_hh_p = jnp.pad(_pad_gate_rows(w_hh, H, Hp), ((0, 0), (0, Hp - H)))
        whh_list.append(jnp.transpose(w_hh_p))                       # (Hp, 4Hp)
        bias_list.append(_pad_gate_vec(b_ih + b_hh, H, Hp).reshape(1, 4 * Hp))
        if l > 0:
            w_ih_p = jnp.pad(_pad_gate_rows(w_ih, H, Hp), ((0, 0), (0, Hp - H)))
            wrest_list.append(jnp.transpose(w_ih_p))                 # (Hp, 4Hp)
    whh_t = jnp.stack(whh_list).astype(mxu_dtype)                    # (L, Hp, 4Hp)
    bias = jnp.stack(bias_list).astype(jnp.float32)                  # (L, 1, 4Hp)

    inputs = [x_p, lens, wih0_t, whh_t, bias, h0_p, c0_p]
    in_specs = [
        pl.BlockSpec((Tc, Bb, E), lambda bi, ci: (ci, bi, 0)),       # x chunk
        pl.BlockSpec((Bb, 1), lambda bi, ci: (bi, 0)),               # lengths (resident)
        pl.BlockSpec((E, 4 * Hp), lambda bi, ci: (0, 0)),            # W_ih0^T
        pl.BlockSpec((L, Hp, 4 * Hp), lambda bi, ci: (0, 0, 0)),     # W_hh^T (all layers)
        pl.BlockSpec((L, 1, 4 * Hp), lambda bi, ci: (0, 0, 0)),      # b_ih + b_hh
        pl.BlockSpec((L, Bb, Hp), lambda bi, ci: (0, bi, 0)),        # h0
        pl.BlockSpec((L, Bb, Hp), lambda bi, ci: (0, bi, 0)),        # c0
    ]
    scratch = [pltpu.VMEM((Tc * Bb, 4 * Hp), jnp.float32)]           # chunk gate pre-acts
    if L > 1:
        wih_rest_t = jnp.stack(wrest_list).astype(mxu_dtype)         # (L-1, Hp, 4Hp)
        inputs.append(wih_rest_t)
        in_specs.append(pl.BlockSpec((L - 1, Hp, 4 * Hp), lambda bi, ci: (0, 0, 0)))
        scratch.append(pltpu.VMEM((Tc * Bb, Hp), jnp.float32))       # inter-layer buffer

    kernel = functools.partial(_lstm_fused_kernel, num_layers=L, hidden_pad=Hp,
                               chunk=Tc, mxu_dtype=mxu_dtype)

    out, hT, cT = pl.pallas_call(
        kernel,
        out_shape=(jax.ShapeDtypeStruct((T_pad, B_pad, Hp), x.dtype),
                   jax.ShapeDtypeStruct((L, B_pad, Hp), jnp.float32),
                   jax.ShapeDtypeStruct((L, B_pad, Hp), jnp.float32)),
        grid_spec=pltpu.PrefetchScalarGridSpec(
            num_scalar_prefetch=0,
            grid=(B_pad // Bb, n_chunks),
            in_specs=in_specs,
            out_specs=[
                pl.BlockSpec((Tc, Bb, Hp), lambda bi, ci: (ci, bi, 0)),   # output sequence
                pl.BlockSpec((L, Bb, Hp), lambda bi, ci: (0, bi, 0)),     # hT (state accum)
                pl.BlockSpec((L, Bb, Hp), lambda bi, ci: (0, bi, 0)),     # cT (state accum)
            ],
            scratch_shapes=scratch),
        compiler_params=pltpu.CompilerParams(
            dimension_semantics=("parallel", "arbitrary"),   # batch || , time serial
            vmem_limit_bytes=_vmem_limit_bytes()),
    )(*inputs)

    # pad_packed_sequence pads outputs to the max length in the batch, not T.
    t_out = int(np.max(np.asarray(x_lens)))
    return out[:t_out, :B, :H], (hT[:, :B, :H].astype(x.dtype),
                                 cT[:, :B, :H].astype(x.dtype))


# ---------------------------------------------------------------------------
# pure-JAX reference (lax.scan) for correctness checking
# ---------------------------------------------------------------------------
def _ref_single_layer(x, lens, h0, c0, w_ih, w_hh, b_ih, b_hh):
    T, B, E = x.shape
    H = h0.shape[-1]

    def step(carry, inp):
        h, c = carry
        x_t, t = inp
        gates = x_t @ w_ih.T + b_ih + h @ w_hh.T + b_hh
        i = jax.nn.sigmoid(gates[:, :H])
        f = jax.nn.sigmoid(gates[:, H:2 * H])
        g = jnp.tanh(gates[:, 2 * H:3 * H])
        o = jax.nn.sigmoid(gates[:, 3 * H:])
        c_new = f * c + i * g
        h_new = o * jnp.tanh(c_new)
        valid = (lens > t)[:, None]
        c2 = jnp.where(valid, c_new, c)
        h2 = jnp.where(valid, h_new, h)
        out = jnp.where(valid, h2, 0.0)
        return (h2, c2), out

    (hT, cT), outs = jax.lax.scan(step, (h0, c0), (x, jnp.arange(T)))
    return outs, hT, cT


def _ref_forward(x, x_lens, init_state, params):
    h0_all, c0_all = init_state
    layer_in = x
    hs, cs = [], []
    for l in range(h0_all.shape[0]):
        w_ih, w_hh, b_ih, b_hh = params[l]
        out, hT, cT = _ref_single_layer(
            layer_in, x_lens, h0_all[l], c0_all[l], w_ih, w_hh, b_ih, b_hh)
        layer_in = out
        hs.append(hT)
        cs.append(cT)
    t_out = int(np.max(np.asarray(x_lens)))
    return layer_in[:t_out], (jnp.stack(hs), jnp.stack(cs))


if __name__ == "__main__":
    T, B, E, H, L = 8, 8, 32, 32, 2   # seq, batch, emb_dim, hidden_dim, num_layers

    key = jax.random.PRNGKey(0)
    k_x, k_h, k_c, *k_w = jax.random.split(key, 3 + 4 * L)

    x = jax.random.normal(k_x, (T, B, E), dtype=jnp.float32)
    x_lens = jnp.array([8, 5, 3, 8, 1, 7, 2, 6], dtype=jnp.int32)
    h0 = jax.random.normal(k_h, (L, B, H), dtype=jnp.float32) * 0.1
    c0 = jax.random.normal(k_c, (L, B, H), dtype=jnp.float32) * 0.1

    # PyTorch nn.LSTM init: uniform(-1/sqrt(H), 1/sqrt(H)) for all params.
    bound = 1.0 / np.sqrt(H)
    params = []
    for l in range(L):
        in_dim = E if l == 0 else H
        kw = k_w[4 * l:4 * l + 4]
        w_ih = jax.random.uniform(kw[0], (4 * H, in_dim), jnp.float32, -bound, bound)
        w_hh = jax.random.uniform(kw[1], (4 * H, H), jnp.float32, -bound, bound)
        b_ih = jax.random.uniform(kw[2], (4 * H,), jnp.float32, -bound, bound)
        b_hh = jax.random.uniform(kw[3], (4 * H,), jnp.float32, -bound, bound)
        params.append((w_ih, w_hh, b_ih, b_hh))

    ref_out, (ref_ht, ref_ct) = _ref_forward(x, x_lens, (h0, c0), params)

    # (1) f32 MXU operands, two time chunks, tight tolerance.
    out, (ht, ct) = lstm_layer_forward(x, x_lens, (h0, c0), params,
                                       time_chunk=4, mxu_dtype=jnp.float32)
    jax.block_until_ready((out, ht, ct))
    np.testing.assert_allclose(np.asarray(out), np.asarray(ref_out), rtol=1e-4, atol=1e-4)
    np.testing.assert_allclose(np.asarray(ht), np.asarray(ref_ht), rtol=1e-4, atol=1e-4)
    np.testing.assert_allclose(np.asarray(ct), np.asarray(ref_ct), rtol=1e-4, atol=1e-4)

    # (2) chunk that does not divide T exercises the time-padding path.
    out2, (ht2, ct2) = lstm_layer_forward(x, x_lens, (h0, c0), params,
                                          time_chunk=3, mxu_dtype=jnp.float32)
    jax.block_until_ready((out2, ht2, ct2))
    np.testing.assert_allclose(np.asarray(out2), np.asarray(ref_out), rtol=1e-4, atol=1e-4)
    np.testing.assert_allclose(np.asarray(ht2), np.asarray(ref_ht), rtol=1e-4, atol=1e-4)
    np.testing.assert_allclose(np.asarray(ct2), np.asarray(ref_ct), rtol=1e-4, atol=1e-4)

    # (3) default bf16 MXU operands (all generations), f32 accumulation/elementwise.
    out3, (ht3, ct3) = lstm_layer_forward(x, x_lens, (h0, c0), params, time_chunk=8)
    jax.block_until_ready((out3, ht3, ct3))
    np.testing.assert_allclose(np.asarray(out3), np.asarray(ref_out), rtol=5e-2, atol=5e-2)
    np.testing.assert_allclose(np.asarray(ht3), np.asarray(ref_ht), rtol=5e-2, atol=5e-2)
    np.testing.assert_allclose(np.asarray(ct3), np.asarray(ref_ct), rtol=5e-2, atol=5e-2)

    # (4) single-layer path (no inter-layer weight input / scratch).
    ref_out1, (ref_ht1, ref_ct1) = _ref_forward(x, x_lens, (h0[:1], c0[:1]), params[:1])
    out4, (ht4, ct4) = lstm_layer_forward(x, x_lens, (h0[:1], c0[:1]), params[:1],
                                          time_chunk=4, mxu_dtype=jnp.float32)
    jax.block_until_ready((out4, ht4, ct4))
    np.testing.assert_allclose(np.asarray(out4), np.asarray(ref_out1), rtol=1e-4, atol=1e-4)
    np.testing.assert_allclose(np.asarray(ht4), np.asarray(ref_ht1), rtol=1e-4, atol=1e-4)
    np.testing.assert_allclose(np.asarray(ct4), np.asarray(ref_ct1), rtol=1e-4, atol=1e-4)

    # (5) batch split into two blocks -> "parallel" batch grid axis (v7x megacore path).
    k2 = jax.random.PRNGKey(1)
    k2x, k2h, k2c = jax.random.split(k2, 3)
    B2 = 16
    x_b = jax.random.normal(k2x, (T, B2, E), dtype=jnp.float32)
    lens_b = jnp.array([8, 5, 3, 8, 1, 7, 2, 6, 4, 8, 2, 5, 6, 1, 3, 7], dtype=jnp.int32)
    h0_b = jax.random.normal(k2h, (L, B2, H), dtype=jnp.float32) * 0.1
    c0_b = jax.random.normal(k2c, (L, B2, H), dtype=jnp.float32) * 0.1
    ref_out5, (ref_ht5, ref_ct5) = _ref_forward(x_b, lens_b, (h0_b, c0_b), params)
    out5, (ht5, ct5) = lstm_layer_forward(x_b, lens_b, (h0_b, c0_b), params,
                                          time_chunk=4, mxu_dtype=jnp.float32,
                                          batch_block=8)
    jax.block_until_ready((out5, ht5, ct5))
    np.testing.assert_allclose(np.asarray(out5), np.asarray(ref_out5), rtol=1e-4, atol=1e-4)
    np.testing.assert_allclose(np.asarray(ht5), np.asarray(ref_ht5), rtol=1e-4, atol=1e-4)
    np.testing.assert_allclose(np.asarray(ct5), np.asarray(ref_ct5), rtol=1e-4, atol=1e-4)

    print("KERNEL_OK")
</pallas_src>

<mosaic_0001>
module attributes {stable_mosaic.version = 11 : i64} {
  func.func @_lstm_fused_kernel(%arg0: i32, %arg1: i32, %arg2: memref<4x8x32xf32, #tpu.memory_space<vmem>>, %arg3: memref<8x1xi32, #tpu.memory_space<vmem>>, %arg4: memref<32x512xf32, #tpu.memory_space<vmem>>, %arg5: memref<2x128x512xf32, #tpu.memory_space<vmem>>, %arg6: memref<2x1x512xf32, #tpu.memory_space<vmem>>, %arg7: memref<2x8x128xf32, #tpu.memory_space<vmem>>, %arg8: memref<2x8x128xf32, #tpu.memory_space<vmem>>, %arg9: memref<1x128x512xf32, #tpu.memory_space<vmem>>, %arg10: memref<4x8x128xf32, #tpu.memory_space<vmem>>, %arg11: memref<2x8x128xf32, #tpu.memory_space<vmem>>, %arg12: memref<2x8x128xf32, #tpu.memory_space<vmem>>, %arg13: memref<32x512xf32, #tpu.memory_space<vmem>>, %arg14: memref<32x128xf32, #tpu.memory_space<vmem>>) attributes {dimension_semantics = [#tpu.dimension_semantics<parallel>, #tpu.dimension_semantics<arbitrary>], iteration_bounds = array<i64: 1, 2>, scalar_prefetch = 0 : i64, scratch_operands = 2 : i64, tpu.core_type = #tpu.core_type<tc>, window_params = [{transform_indices = @transform_0, window_bounds = array<i64: 4, 8, 32>}, {transform_indices = @transform_1, window_bounds = array<i64: 8, 1>}, {pipeline_mode = #tpu.pipeline_mode<synchronous>, transform_indices = @transform_2, window_bounds = array<i64: 32, 512>}, {pipeline_mode = #tpu.pipeline_mode<synchronous>, transform_indices = @transform_3, window_bounds = array<i64: 2, 128, 512>}, {pipeline_mode = #tpu.pipeline_mode<synchronous>, transform_indices = @transform_4, window_bounds = array<i64: 2, 1, 512>}, {transform_indices = @transform_5, window_bounds = array<i64: 2, 8, 128>}, {transform_indices = @transform_6, window_bounds = array<i64: 2, 8, 128>}, {pipeline_mode = #tpu.pipeline_mode<synchronous>, transform_indices = @transform_7, window_bounds = array<i64: 1, 128, 512>}, {transform_indices = @transform_8, window_bounds = array<i64: 4, 8, 128>}, {transform_indices = @transform_9, window_bounds = array<i64: 2, 8, 128>}, {transform_indices = @transform_10, window_bounds = array<i64: 2, 8, 128>}]} {
    %c0_i32 = arith.constant 0 : i32
    %0 = arith.cmpi eq, %arg1, %c0_i32 : i32
    %1 = arith.extui %0 : i1 to i32
    %c0_i32_0 = arith.constant 0 : i32
    %2 = arith.cmpi ne, %1, %c0_i32_0 : i32
    scf.if %2 {
      %c0_142 = arith.constant 0 : index
      %c0_143 = arith.constant 0 : index
      %c0_144 = arith.constant 0 : index
      %387 = vector.load %arg7[%c0_142, %c0_143, %c0_144] : memref<2x8x128xf32, #tpu.memory_space<vmem>>, vector<2x8x128xf32>
      %c0_145 = arith.constant 0 : index
      %c0_146 = arith.constant 0 : index
      %c0_147 = arith.constant 0 : index
      %388 = vector.load %arg11[%c0_145, %c0_146, %c0_147] : memref<2x8x128xf32, #tpu.memory_space<vmem>>, vector<2x8x128xf32>
      tpu.vector_store %arg11[%c0_145, %c0_146, %c0_147], %387 {strides = array<i32>} : memref<2x8x128xf32, #tpu.memory_space<vmem>>, vector<2x8x128xf32>,
      %c0_148 = arith.constant 0 : index
      %c0_149 = arith.constant 0 : index
      %c0_150 = arith.constant 0 : index
      %389 = vector.load %arg8[%c0_148, %c0_149, %c0_150] : memref<2x8x128xf32, #tpu.memory_space<vmem>>, vector<2x8x128xf32>
      %c0_151 = arith.constant 0 : index
      %c0_152 = arith.constant 0 : index
      %c0_153 = arith.constant 0 : index
      %390 = vector.load %arg12[%c0_151, %c0_152, %c0_153] : memref<2x8x128xf32, #tpu.memory_space<vmem>>, vector<2x8x128xf32>
      tpu.vector_store %arg12[%c0_151, %c0_152, %c0_153], %389 {strides = array<i32>} : memref<2x8x128xf32, #tpu.memory_space<vmem>>, vector<2x8x128xf32>,
    } else {
    }
    %c4_i32 = arith.constant 4 : i32
    %3 = arith.muli %arg1, %c4_i32 : i32
    %c0 = arith.constant 0 : index
    %c0_1 = arith.constant 0 : index
    %4 = vector.load %arg3[%c0, %c0_1] : memref<8x1xi32, #tpu.memory_space<vmem>>, vector<8x1xi32>
    %c0_2 = arith.constant 0 : index
    %c0_3 = arith.constant 0 : index
    %c0_4 = arith.constant 0 : index
    %5 = vector.load %arg2[%c0_2, %c0_3, %c0_4] : memref<4x8x32xf32, #tpu.memory_space<vmem>>, vector<4x8x32xf32>
    %6 = vector.shape_cast %5 : vector<4x8x32xf32> to vector<32x32xf32>
    %c0_5 = arith.constant 0 : index
    %c0_6 = arith.constant 0 : index
    %7 = vector.load %arg4[%c0_5, %c0_6] : memref<32x512xf32, #tpu.memory_space<vmem>>, vector<32x512xf32>
    %cst = arith.constant dense<0.000000e+00> : vector<32x512xf32>
    %8 = tpu.matmul %6, %7, %cst {dimension_numbers = #tpu.dot_dimension_numbers<[1], [0], [0], [1], [0, 0, 1, 1], [], []>} : vector<32x32xf32>, vector<32x512xf32>, vector<32x512xf32> -> vector<32x512xf32>
    %c0_7 = arith.constant 0 : index
    %c0_8 = arith.constant 0 : index
    %c0_9 = arith.constant 0 : index
    %9 = vector.load %arg6[%c0_7, %c0_8, %c0_9] : memref<2x1x512xf32, #tpu.memory_space<vmem>>, vector<1x1x512xf32>
    %10 = vector.shape_cast %9 : vector<1x1x512xf32> to vector<1x512xf32>
    %11 = vector.broadcast %10 : vector<1x512xf32> to vector<32x512xf32>
    %12 = arith.addf %8, %11 : vector<32x512xf32>
    %c0_10 = arith.constant 0 : index
    %c0_11 = arith.constant 0 : index
    %13 = vector.load %arg13[%c0_10, %c0_11] : memref<32x512xf32, #tpu.memory_space<vmem>>, vector<32x512xf32>
    tpu.vector_store %arg13[%c0_10, %c0_11], %12 {strides = array<i32>} : memref<32x512xf32, #tpu.memory_space<vmem>>, vector<32x512xf32>,
    %c0_12 = arith.constant 0 : index
    %c0_13 = arith.constant 0 : index
    %c0_14 = arith.constant 0 : index
    %14 = vector.load %arg11[%c0_12, %c0_13, %c0_14] : memref<2x8x128xf32, #tpu.memory_space<vmem>>, vector<1x8x128xf32>
    %15 = vector.shape_cast %14 : vector<1x8x128xf32> to vector<8x128xf32>
    %c0_15 = arith.constant 0 : index
    %c0_16 = arith.constant 0 : index
    %c0_17 = arith.constant 0 : index
    %16 = vector.load %arg12[%c0_15, %c0_16, %c0_17] : memref<2x8x128xf32, #tpu.memory_space<vmem>>, vector<1x8x128xf32>
    %17 = vector.shape_cast %16 : vector<1x8x128xf32> to vector<8x128xf32>
    %c0_18 = arith.constant 0 : index
    %c0_19 = arith.constant 0 : index
    %18 = vector.load %arg13[%c0_18, %c0_19] : memref<32x512xf32, #tpu.memory_space<vmem>>, vector<8x512xf32>
    %c0_20 = arith.constant 0 : index
    %c0_21 = arith.constant 0 : index
    %c0_22 = arith.constant 0 : index
    %19 = vector.load %arg5[%c0_20, %c0_21, %c0_22] : memref<2x128x512xf32, #tpu.memory_space<vmem>>, vector<1x128x512xf32>
    %20 = vector.shape_cast %19 : vector<1x128x512xf32> to vector<128x512xf32>
    %cst_23 = arith.constant dense<0.000000e+00> : vector<8x512xf32>
    %21 = tpu.matmul %15, %20, %cst_23 {dimension_numbers = #tpu.dot_dimension_numbers<[1], [0], [0], [1], [0, 0, 1, 1], [], []>} : vector<8x128xf32>, vector<128x512xf32>, vector<8x512xf32> -> vector<8x512xf32>
    %22 = arith.addf %18, %21 : vector<8x512xf32>
    %23 = vector.extract_strided_slice %22 {offsets = [0, 0], sizes = [8, 128], strides = [1, 1]} : vector<8x512xf32> to vector<8x128xf32>
    %24 = arith.negf %23 : vector<8x128xf32>
    %25 = math.exp %24 : vector<8x128xf32>
    %cst_24 = arith.constant 1.000000e+00 : f32
    %26 = vector.broadcast %cst_24 : f32 to vector<8x128xf32>
    %27 = arith.addf %26, %25 : vector<8x128xf32>
    %28 = arith.divf %26, %27 : vector<8x128xf32>
    %29 = vector.extract_strided_slice %22 {offsets = [0, 128], sizes = [8, 128], strides = [1, 1]} : vector<8x512xf32> to vector<8x128xf32>
    %30 = arith.negf %29 : vector<8x128xf32>
    %31 = math.exp %30 : vector<8x128xf32>
    %cst_25 = arith.constant 1.000000e+00 : f32
    %32 = vector.broadcast %cst_25 : f32 to vector<8x128xf32>
    %33 = arith.addf %32, %31 : vector<8x128xf32>
    %34 = arith.divf %32, %33 : vector<8x128xf32>
    %35 = vector.extract_strided_slice %22 {offsets = [0, 256], sizes = [8, 128], strides = [1, 1]} : vector<8x512xf32> to vector<8x128xf32>
    %36 = math.tanh %35 : vector<8x128xf32>
    %37 = vector.extract_strided_slice %22 {offsets = [0, 384], sizes = [8, 128], strides = [1, 1]} : vector<8x512xf32> to vector<8x128xf32>
    %38 = arith.negf %37 : vector<8x128xf32>
    %39 = math.exp %38 : vector<8x128xf32>
    %cst_26 = arith.constant 1.000000e+00 : f32
    %40 = vector.broadcast %cst_26 : f32 to vector<8x128xf32>
    %41 = arith.addf %40, %39 : vector<8x128xf32>
    %42 = arith.divf %40, %41 : vector<8x128xf32>
    %43 = arith.mulf %34, %17 : vector<8x128xf32>
    %44 = arith.mulf %28, %36 : vector<8x128xf32>
    %45 = arith.addf %43, %44 : vector<8x128xf32>
    %46 = math.tanh %45 : vector<8x128xf32>
    %47 = arith.mulf %42, %46 : vector<8x128xf32>
    %c0_i32_27 = arith.constant 0 : i32
    %48 = arith.addi %3, %c0_i32_27 : i32
    %49 = vector.broadcast %48 : i32 to vector<8x1xi32>
    %50 = arith.cmpi sgt, %4, %49 : vector<8x1xi32>
    %51 = vector.shape_cast %50 : vector<8x1xi1> to vector<8x1xi1>
    %52 = vector.broadcast %51 : vector<8x1xi1> to vector<8x128xi1>
    %53 = arith.select %52, %45, %17 : vector<8x128xi1>, vector<8x128xf32>
    %54 = vector.shape_cast %50 : vector<8x1xi1> to vector<8x1xi1>
    %55 = vector.broadcast %54 : vector<8x1xi1> to vector<8x128xi1>
    %56 = arith.select %55, %47, %15 : vector<8x128xi1>, vector<8x128xf32>
    %c0_28 = arith.constant 0 : index
    %c0_29 = arith.constant 0 : index
    %57 = vector.load %arg14[%c0_28, %c0_29] : memref<32x128xf32, #tpu.memory_space<vmem>>, vector<8x128xf32>
    tpu.vector_store %arg14[%c0_28, %c0_29], %56 {strides = array<i32>} : memref<32x128xf32, #tpu.memory_space<vmem>>, vector<8x128xf32>,
    %c8 = arith.constant 8 : index
    %c0_30 = arith.constant 0 : index
    %58 = vector.load %arg13[%c8, %c0_30] : memref<32x512xf32, #tpu.memory_space<vmem>>, vector<8x512xf32>
    %c0_31 = arith.constant 0 : index
    %c0_32 = arith.constant 0 : index
    %c0_33 = arith.constant 0 : index
    %59 = vector.load %arg5[%c0_31, %c0_32, %c0_33] : memref<2x128x512xf32, #tpu.memory_space<vmem>>, vector<1x128x512xf32>
    %60 = vector.shape_cast %59 : vector<1x128x512xf32> to vector<128x512xf32>
    %cst_34 = arith.constant dense<0.000000e+00> : vector<8x512xf32>
    %61 = tpu.matmul %56, %60, %cst_34 {dimension_numbers = #tpu.dot_dimension_numbers<[1], [0], [0], [1], [0, 0, 1, 1], [], []>} : vector<8x128xf32>, vector<128x512xf32>, vector<8x512xf32> -> vector<8x512xf32>
    %62 = arith.addf %58, %61 : vector<8x512xf32>
    %63 = vector.extract_strided_slice %62 {offsets = [0, 0], sizes = [8, 128], strides = [1, 1]} : vector<8x512xf32> to vector<8x128xf32>
    %64 = arith.negf %63 : vector<8x128xf32>
    %65 = math.exp %64 : vector<8x128xf32>
    %cst_35 = arith.constant 1.000000e+00 : f32
    %66 = vector.broadcast %cst_35 : f32 to vector<8x128xf32>
    %67 = arith.addf %66, %65 : vector<8x128xf32>
    %68 = arith.divf %66, %67 : vector<8x128xf32>
    %69 = vector.extract_strided_slice %62 {offsets = [0, 128], sizes = [8, 128], strides = [1, 1]} : vector<8x512xf32> to vector<8x128xf32>
    %70 = arith.negf %69 : vector<8x128xf32>
    %71 = math.exp %70 : vector<8x128xf32>
    %cst_36 = arith.constant 1.000000e+00 : f32
    %72 = vector.broadcast %cst_36 : f32 to vector<8x128xf32>
    %73 = arith.addf %72, %71 : vector<8x128xf32>
    %74 = arith.divf %72, %73 : vector<8x128xf32>
    %75 = vector.extract_strided_slice %62 {offsets = [0, 256], sizes = [8, 128], strides = [1, 1]} : vector<8x512xf32> to vector<8x128xf32>
    %76 = math.tanh %75 : vector<8x128xf32>
    %77 = vector.extract_strided_slice %62 {offsets = [0, 384], sizes = [8, 128], strides = [1, 1]} : vector<8x512xf32> to vector<8x128xf32>
    %78 = arith.negf %77 : vector<8x128xf32>
    %79 = math.exp %78 : vector<8x128xf32>
    %cst_37 = arith.constant 1.000000e+00 : f32
    %80 = vector.broadcast %cst_37 : f32 to vector<8x128xf32>
    %81 = arith.addf %80, %79 : vector<8x128xf32>
    %82 = arith.divf %80, %81 : vector<8x128xf32>
    %83 = arith.mulf %74, %53 : vector<8x128xf32>
    %84 = arith.mulf %68, %76 : vector<8x128xf32>
    %85 = arith.addf %83, %84 : vector<8x128xf32>
    %86 = math.tanh %85 : vector<8x128xf32>
    %87 = arith.mulf %82, %86 : vector<8x128xf32>
    %c1_i32 = arith.constant 1 : i32
    %88 = arith.addi %3, %c1_i32 : i32
    %89 = vector.broadcast %88 : i32 to vector<8x1xi32>
    %90 = arith.cmpi sgt, %4, %89 : vector<8x1xi32>
    %91 = vector.shape_cast %90 : vector<8x1xi1> to vector<8x1xi1>
    %92 = vector.broadcast %91 : vector<8x1xi1> to vector<8x128xi1>
    %93 = arith.select %92, %85, %53 : vector<8x128xi1>, vector<8x128xf32>
    %94 = vector.shape_cast %90 : vector<8x1xi1> to vector<8x1xi1>
    %95 = vector.broadcast %94 : vector<8x1xi1> to vector<8x128xi1>
    %96 = arith.select %95, %87, %56 : vector<8x128xi1>, vector<8x128xf32>
    %c8_38 = arith.constant 8 : index
    %c0_39 = arith.constant 0 : index
    %97 = vector.load %arg14[%c8_38, %c0_39] : memref<32x128xf32, #tpu.memory_space<vmem>>, vector<8x128xf32>
    tpu.vector_store %arg14[%c8_38, %c0_39], %96 {strides = array<i32>} : memref<32x128xf32, #tpu.memory_space<vmem>>, vector<8x128xf32>,
    %c16 = arith.constant 16 : index
    %c0_40 = arith.constant 0 : index
    %98 = vector.load %arg13[%c16, %c0_40] : memref<32x512xf32, #tpu.memory_space<vmem>>, vector<8x512xf32>
    %c0_41 = arith.constant 0 : index
    %c0_42 = arith.constant 0 : index
    %c0_43 = arith.constant 0 : index
    %99 = vector.load %arg5[%c0_41, %c0_42, %c0_43] : memref<2x128x512xf32, #tpu.memory_space<vmem>>, vector<1x128x512xf32>
    %100 = vector.shape_cast %99 : vector<1x128x512xf32> to vector<128x512xf32>
    %cst_44 = arith.constant dense<0.000000e+00> : vector<8x512xf32>
    %101 = tpu.matmul %96, %100, %cst_44 {dimension_numbers = #tpu.dot_dimension_numbers<[1], [0], [0], [1], [0, 0, 1, 1], [], []>} : vector<8x128xf32>, vector<128x512xf32>, vector<8x512xf32> -> vector<8x512xf32>
    %102 = arith.addf %98, %101 : vector<8x512xf32>
    %103 = vector.extract_strided_slice %102 {offsets = [0, 0], sizes = [8, 128], strides = [1, 1]} : vector<8x512xf32> to vector<8x128xf32>
    %104 = arith.negf %103 : vector<8x128xf32>
    %105 = math.exp %104 : vector<8x128xf32>
    %cst_45 = arith.constant 1.000000e+00 : f32
    %106 = vector.broadcast %cst_45 : f32 to vector<8x128xf32>
    %107 = arith.addf %106, %105 : vector<8x128xf32>
    %108 = arith.divf %106, %107 : vector<8x128xf32>
    %109 = vector.extract_strided_slice %102 {offsets = [0, 128], sizes = [8, 128], strides = [1, 1]} : vector<8x512xf32> to vector<8x128xf32>
    %110 = arith.negf %109 : vector<8x128xf32>
    %111 = math.exp %110 : vector<8x128xf32>
    %cst_46 = arith.constant 1.000000e+00 : f32
    %112 = vector.broadcast %cst_46 : f32 to vector<8x128xf32>
    %113 = arith.addf %112, %111 : vector<8x128xf32>
    %114 = arith.divf %112, %113 : vector<8x128xf32>
    %115 = vector.extract_strided_slice %102 {offsets = [0, 256], sizes = [8, 128], strides = [1, 1]} : vector<8x512xf32> to vector<8x128xf32>
    %116 = math.tanh %115 : vector<8x128xf32>
    %117 = vector.extract_strided_slice %102 {offsets = [0, 384], sizes = [8, 128], strides = [1, 1]} : vector<8x512xf32> to vector<8x128xf32>
    %118 = arith.negf %117 : vector<8x128xf32>
    %119 = math.exp %118 : vector<8x128xf32>
    %cst_47 = arith.constant 1.000000e+00 : f32
    %120 = vector.broadcast %cst_47 : f32 to vector<8x128xf32>
    %121 = arith.addf %120, %119 : vector<8x128xf32>
    %122 = arith.divf %120, %121 : vector<8x128xf32>
    %123 = arith.mulf %114, %93 : vector<8x128xf32>
    %124 = arith.mulf %108, %116 : vector<8x128xf32>
    %125 = arith.addf %123, %124 : vector<8x128xf32>
    %126 = math.tanh %125 : vector<8x128xf32>
    %127 = arith.mulf %122, %126 : vector<8x128xf32>
    %c2_i32 = arith.constant 2 : i32
    %128 = arith.addi %3, %c2_i32 : i32
    %129 = vector.broadcast %128 : i32 to vector<8x1xi32>
    %130 = arith.cmpi sgt, %4, %129 : vector<8x1xi32>
    %131 = vector.shape_cast %130 : vector<8x1xi1> to vector<8x1xi1>
    %132 = vector.broadcast %131 : vector<8x1xi1> to vector<8x128xi1>
    %133 = arith.select %132, %125, %93 : vector<8x128xi1>, vector<8x128xf32>
    %134 = vector.shape_cast %130 : vector<8x1xi1> to vector<8x1xi1>
    %135 = vector.broadcast %134 : vector<8x1xi1> to vector<8x128xi1>
    %136 = arith.select %135, %127, %96 : vector<8x128xi1>, vector<8x128xf32>
    %c16_48 = arith.constant 16 : index
    %c0_49 = arith.constant 0 : index
    %137 = vector.load %arg14[%c16_48, %c0_49] : memref<32x128xf32, #tpu.memory_space<vmem>>, vector<8x128xf32>
    tpu.vector_store %arg14[%c16_48, %c0_49], %136 {strides = array<i32>} : memref<32x128xf32, #tpu.memory_space<vmem>>, vector<8x128xf32>,
    %c24 = arith.constant 24 : index
    %c0_50 = arith.constant 0 : index
    %138 = vector.load %arg13[%c24, %c0_50] : memref<32x512xf32, #tpu.memory_space<vmem>>, vector<8x512xf32>
    %c0_51 = arith.constant 0 : index
    %c0_52 = arith.constant 0 : index
    %c0_53 = arith.constant 0 : index
    %139 = vector.load %arg5[%c0_51, %c0_52, %c0_53] : memref<2x128x512xf32, #tpu.memory_space<vmem>>, vector<1x128x512xf32>
    %140 = vector.shape_cast %139 : vector<1x128x512xf32> to vector<128x512xf32>
    %cst_54 = arith.constant dense<0.000000e+00> : vector<8x512xf32>
    %141 = tpu.matmul %136, %140, %cst_54 {dimension_numbers = #tpu.dot_dimension_numbers<[1], [0], [0], [1], [0, 0, 1, 1], [], []>} : vector<8x128xf32>, vector<128x512xf32>, vector<8x512xf32> -> vector<8x512xf32>
    %142 = arith.addf %138, %141 : vector<8x512xf32>
    %143 = vector.extract_strided_slice %142 {offsets = [0, 0], sizes = [8, 128], strides = [1, 1]} : vector<8x512xf32> to vector<8x128xf32>
    %144 = arith.negf %143 : vector<8x128xf32>
    %145 = math.exp %144 : vector<8x128xf32>
    %cst_55 = arith.constant 1.000000e+00 : f32
    %146 = vector.broadcast %cst_55 : f32 to vector<8x128xf32>
    %147 = arith.addf %146, %145 : vector<8x128xf32>
    %148 = arith.divf %146, %147 : vector<8x128xf32>
    %149 = vector.extract_strided_slice %142 {offsets = [0, 128], sizes = [8, 128], strides = [1, 1]} : vector<8x512xf32> to vector<8x128xf32>
    %150 = arith.negf %149 : vector<8x128xf32>
    %151 = math.exp %150 : vector<8x128xf32>
    %cst_56 = arith.constant 1.000000e+00 : f32
    %152 = vector.broadcast %cst_56 : f32 to vector<8x128xf32>
    %153 = arith.addf %152, %151 : vector<8x128xf32>
    %154 = arith.divf %152, %153 : vector<8x128xf32>
    %155 = vector.extract_strided_slice %142 {offsets = [0, 256], sizes = [8, 128], strides = [1, 1]} : vector<8x512xf32> to vector<8x128xf32>
    %156 = math.tanh %155 : vector<8x128xf32>
    %157 = vector.extract_strided_slice %142 {offsets = [0, 384], sizes = [8, 128], strides = [1, 1]} : vector<8x512xf32> to vector<8x128xf32>
    %158 = arith.negf %157 : vector<8x128xf32>
    %159 = math.exp %158 : vector<8x128xf32>
    %cst_57 = arith.constant 1.000000e+00 : f32
    %160 = vector.broadcast %cst_57 : f32 to vector<8x128xf32>
    %161 = arith.addf %160, %159 : vector<8x128xf32>
    %162 = arith.divf %160, %161 : vector<8x128xf32>
    %163 = arith.mulf %154, %133 : vector<8x128xf32>
    %164 = arith.mulf %148, %156 : vector<8x128xf32>
    %165 = arith.addf %163, %164 : vector<8x128xf32>
    %166 = math.tanh %165 : vector<8x128xf32>
    %167 = arith.mulf %162, %166 : vector<8x128xf32>
    %c3_i32 = arith.constant 3 : i32
    %168 = arith.addi %3, %c3_i32 : i32
    %169 = vector.broadcast %168 : i32 to vector<8x1xi32>
    %170 = arith.cmpi sgt, %4, %169 : vector<8x1xi32>
    %171 = vector.shape_cast %170 : vector<8x1xi1> to vector<8x1xi1>
    %172 = vector.broadcast %171 : vector<8x1xi1> to vector<8x128xi1>
    %173 = arith.select %172, %165, %133 : vector<8x128xi1>, vector<8x128xf32>
    %174 = vector.shape_cast %170 : vector<8x1xi1> to vector<8x1xi1>
    %175 = vector.broadcast %174 : vector<8x1xi1> to vector<8x128xi1>
    %176 = arith.select %175, %167, %136 : vector<8x128xi1>, vector<8x128xf32>
    %c24_58 = arith.constant 24 : index
    %c0_59 = arith.constant 0 : index
    %177 = vector.load %arg14[%c24_58, %c0_59] : memref<32x128xf32, #tpu.memory_space<vmem>>, vector<8x128xf32>
    tpu.vector_store %arg14[%c24_58, %c0_59], %176 {strides = array<i32>} : memref<32x128xf32, #tpu.memory_space<vmem>>, vector<8x128xf32>,
    %c0_60 = arith.constant 0 : index
    %c0_61 = arith.constant 0 : index
    %c0_62 = arith.constant 0 : index
    %178 = vector.load %arg11[%c0_60, %c0_61, %c0_62] : memref<2x8x128xf32, #tpu.memory_space<vmem>>, vector<1x8x128xf32>
    %179 = vector.shape_cast %178 : vector<1x8x128xf32> to vector<8x128xf32>
    %180 = vector.shape_cast %176 : vector<8x128xf32> to vector<1x8x128xf32>
    tpu.vector_store %arg11[%c0_60, %c0_61, %c0_62], %180 {strides = array<i32>} : memref<2x8x128xf32, #tpu.memory_space<vmem>>, vector<1x8x128xf32>,
    %c0_63 = arith.constant 0 : index
    %c0_64 = arith.constant 0 : index
    %c0_65 = arith.constant 0 : index
    %181 = vector.load %arg12[%c0_63, %c0_64, %c0_65] : memref<2x8x128xf32, #tpu.memory_space<vmem>>, vector<1x8x128xf32>
    %182 = vector.shape_cast %181 : vector<1x8x128xf32> to vector<8x128xf32>
    %183 = vector.shape_cast %173 : vector<8x128xf32> to vector<1x8x128xf32>
    tpu.vector_store %arg12[%c0_63, %c0_64, %c0_65], %183 {strides = array<i32>} : memref<2x8x128xf32, #tpu.memory_space<vmem>>, vector<1x8x128xf32>,
    %c0_66 = arith.constant 0 : index
    %c0_67 = arith.constant 0 : index
    %184 = vector.load %arg14[%c0_66, %c0_67] : memref<32x128xf32, #tpu.memory_space<vmem>>, vector<32x128xf32>
    %c0_68 = arith.constant 0 : index
    %c0_69 = arith.constant 0 : index
    %c0_70 = arith.constant 0 : index
    %185 = vector.load %arg9[%c0_68, %c0_69, %c0_70] : memref<1x128x512xf32, #tpu.memory_space<vmem>>, vector<1x128x512xf32>
    %186 = vector.shape_cast %185 : vector<1x128x512xf32> to vector<128x512xf32>
    %cst_71 = arith.constant dense<0.000000e+00> : vector<32x512xf32>
    %187 = tpu.matmul %184, %186, %cst_71 {dimension_numbers = #tpu.dot_dimension_numbers<[1], [0], [0], [1], [0, 0, 1, 1], [], []>} : vector<32x128xf32>, vector<128x512xf32>, vector<32x512xf32> -> vector<32x512xf32>
    %c1 = arith.constant 1 : index
    %c0_72 = arith.constant 0 : index
    %c0_73 = arith.constant 0 : index
    %188 = vector.load %arg6[%c1, %c0_72, %c0_73] : memref<2x1x512xf32, #tpu.memory_space<vmem>>, vector<1x1x512xf32>
    %189 = vector.shape_cast %188 : vector<1x1x512xf32> to vector<1x512xf32>
    %190 = vector.broadcast %189 : vector<1x512xf32> to vector<32x512xf32>
    %191 = arith.addf %187, %190 : vector<32x512xf32>
    %c0_74 = arith.constant 0 : index
    %c0_75 = arith.constant 0 : index
    %192 = vector.load %arg13[%c0_74, %c0_75] : memref<32x512xf32, #tpu.memory_space<vmem>>, vector<32x512xf32>
    tpu.vector_store %arg13[%c0_74, %c0_75], %191 {strides = array<i32>} : memref<32x512xf32, #tpu.memory_space<vmem>>, vector<32x512xf32>,
    %c1_76 = arith.constant 1 : index
    %c0_77 = arith.constant 0 : index
    %c0_78 = arith.constant 0 : index
    %193 = vector.load %arg11[%c1_76, %c0_77, %c0_78] : memref<2x8x128xf32, #tpu.memory_space<vmem>>, vector<1x8x128xf32>
    %194 = vector.shape_cast %193 : vector<1x8x128xf32> to vector<8x128xf32>
    %c1_79 = arith.constant 1 : index
    %c0_80 = arith.constant 0 : index
    %c0_81 = arith.constant 0 : index
    %195 = vector.load %arg12[%c1_79, %c0_80, %c0_81] : memref<2x8x128xf32, #tpu.memory_space<vmem>>, vector<1x8x128xf32>
    %196 = vector.shape_cast %195 : vector<1x8x128xf32> to vector<8x128xf32>
    %c0_82 = arith.constant 0 : index
    %c0_83 = arith.constant 0 : index
    %197 = vector.load %arg13[%c0_82, %c0_83] : memref<32x512xf32, #tpu.memory_space<vmem>>, vector<8x512xf32>
    %c1_84 = arith.constant 1 : index
    %c0_85 = arith.constant 0 : index
    %c0_86 = arith.constant 0 : index
    %198 = vector.load %arg5[%c1_84, %c0_85, %c0_86] : memref<2x128x512xf32, #tpu.memory_space<vmem>>, vector<1x128x512xf32>
    %199 = vector.shape_cast %198 : vector<1x128x512xf32> to vector<128x512xf32>
    %cst_87 = arith.constant dense<0.000000e+00> : vector<8x512xf32>
    %200 = tpu.matmul %194, %199, %cst_87 {dimension_numbers = #tpu.dot_dimension_numbers<[1], [0], [0], [1], [0, 0, 1, 1], [], []>} : vector<8x128xf32>, vector<128x512xf32>, vector<8x512xf32> -> vector<8x512xf32>
    %201 = arith.addf %197, %200 : vector<8x512xf32>
    %202 = vector.extract_strided_slice %201 {offsets = [0, 0], sizes = [8, 128], strides = [1, 1]} : vector<8x512xf32> to vector<8x128xf32>
    %203 = arith.negf %202 : vector<8x128xf32>
    %204 = math.exp %203 : vector<8x128xf32>
    %cst_88 = arith.constant 1.000000e+00 : f32
    %205 = vector.broadcast %cst_88 : f32 to vector<8x128xf32>
    %206 = arith.addf %205, %204 : vector<8x128xf32>
    %207 = arith.divf %205, %206 : vector<8x128xf32>
    %208 = vector.extract_strided_slice %201 {offsets = [0, 128], sizes = [8, 128], strides = [1, 1]} : vector<8x512xf32> to vector<8x128xf32>
    %209 = arith.negf %208 : vector<8x128xf32>
    %210 = math.exp %209 : vector<8x128xf32>
    %cst_89 = arith.constant 1.000000e+00 : f32
    %211 = vector.broadcast %cst_89 : f32 to vector<8x128xf32>
    %212 = arith.addf %211, %210 : vector<8x128xf32>
    %213 = arith.divf %211, %212 : vector<8x128xf32>
    %214 = vector.extract_strided_slice %201 {offsets = [0, 256], sizes = [8, 128], strides = [1, 1]} : vector<8x512xf32> to vector<8x128xf32>
    %215 = math.tanh %214 : vector<8x128xf32>
    %216 = vector.extract_strided_slice %201 {offsets = [0, 384], sizes = [8, 128], strides = [1, 1]} : vector<8x512xf32> to vector<8x128xf32>
    %217 = arith.negf %216 : vector<8x128xf32>
    %218 = math.exp %217 : vector<8x128xf32>
    %cst_90 = arith.constant 1.000000e+00 : f32
    %219 = vector.broadcast %cst_90 : f32 to vector<8x128xf32>
    %220 = arith.addf %219, %218 : vector<8x128xf32>
    %221 = arith.divf %219, %220 : vector<8x128xf32>
    %222 = arith.mulf %213, %196 : vector<8x128xf32>
    %223 = arith.mulf %207, %215 : vector<8x128xf32>
    %224 = arith.addf %222, %223 : vector<8x128xf32>
    %225 = math.tanh %224 : vector<8x128xf32>
    %226 = arith.mulf %221, %225 : vector<8x128xf32>
    %c0_i32_91 = arith.constant 0 : i32
    %227 = arith.addi %3, %c0_i32_91 : i32
    %228 = vector.broadcast %227 : i32 to vector<8x1xi32>
    %229 = arith.cmpi sgt, %4, %228 : vector<8x1xi32>
    %230 = vector.shape_cast %229 : vector<8x1xi1> to vector<8x1xi1>
    %231 = vector.broadcast %230 : vector<8x1xi1> to vector<8x128xi1>
    %232 = arith.select %231, %224, %196 : vector<8x128xi1>, vector<8x128xf32>
    %233 = vector.shape_cast %229 : vector<8x1xi1> to vector<8x1xi1>
    %234 = vector.broadcast %233 : vector<8x1xi1> to vector<8x128xi1>
    %235 = arith.select %234, %226, %194 : vector<8x128xi1>, vector<8x128xf32>
    %cst_92 = arith.constant 0.000000e+00 : f32
    %236 = vector.shape_cast %229 : vector<8x1xi1> to vector<8x1xi1>
    %237 = vector.broadcast %236 : vector<8x1xi1> to vector<8x128xi1>
    %238 = vector.broadcast %cst_92 : f32 to vector<8x128xf32>
    %239 = arith.select %237, %235, %238 : vector<8x128xi1>, vector<8x128xf32>
    %c0_93 = arith.constant 0 : index
    %c0_94 = arith.constant 0 : index
    %c0_95 = arith.constant 0 : index
    %240 = vector.load %arg10[%c0_93, %c0_94, %c0_95] : memref<4x8x128xf32, #tpu.memory_space<vmem>>, vector<1x8x128xf32>
    %241 = vector.shape_cast %240 : vector<1x8x128xf32> to vector<8x128xf32>
    %242 = vector.shape_cast %239 : vector<8x128xf32> to vector<1x8x128xf32>
    tpu.vector_store %arg10[%c0_93, %c0_94, %c0_95], %242 {strides = array<i32>} : memref<4x8x128xf32, #tpu.memory_space<vmem>>, vector<1x8x128xf32>,
    %c8_96 = arith.constant 8 : index
    %c0_97 = arith.constant 0 : index
    %243 = vector.load %arg13[%c8_96, %c0_97] : memref<32x512xf32, #tpu.memory_space<vmem>>, vector<8x512xf32>
    %c1_98 = arith.constant 1 : index
    %c0_99 = arith.constant 0 : index
    %c0_100 = arith.constant 0 : index
    %244 = vector.load %arg5[%c1_98, %c0_99, %c0_100] : memref<2x128x512xf32, #tpu.memory_space<vmem>>, vector<1x128x512xf32>
    %245 = vector.shape_cast %244 : vector<1x128x512xf32> to vector<128x512xf32>
    %cst_101 = arith.constant dense<0.000000e+00> : vector<8x512xf32>
    %246 = tpu.matmul %235, %245, %cst_101 {dimension_numbers = #tpu.dot_dimension_numbers<[1], [0], [0], [1], [0, 0, 1, 1], [], []>} : vector<8x128xf32>, vector<128x512xf32>, vector<8x512xf32> -> vector<8x512xf32>
    %247 = arith.addf %243, %246 : vector<8x512xf32>
    %248 = vector.extract_strided_slice %247 {offsets = [0, 0], sizes = [8, 128], strides = [1, 1]} : vector<8x512xf32> to vector<8x128xf32>
    %249 = arith.negf %248 : vector<8x128xf32>
    %250 = math.exp %249 : vector<8x128xf32>
    %cst_102 = arith.constant 1.000000e+00 : f32
    %251 = vector.broadcast %cst_102 : f32 to vector<8x128xf32>
    %252 = arith.addf %251, %250 : vector<8x128xf32>
    %253 = arith.divf %251, %252 : vector<8x128xf32>
    %254 = vector.extract_strided_slice %247 {offsets = [0, 128], sizes = [8, 128], strides = [1, 1]} : vector<8x512xf32> to vector<8x128xf32>
    %255 = arith.negf %254 : vector<8x128xf32>
    %256 = math.exp %255 : vector<8x128xf32>
    %cst_103 = arith.constant 1.000000e+00 : f32
    %257 = vector.broadcast %cst_103 : f32 to vector<8x128xf32>
    %258 = arith.addf %257, %256 : vector<8x128xf32>
    %259 = arith.divf %257, %258 : vector<8x128xf32>
    %260 = vector.extract_strided_slice %247 {offsets = [0, 256], sizes = [8, 128], strides = [1, 1]} : vector<8x512xf32> to vector<8x128xf32>
    %261 = math.tanh %260 : vector<8x128xf32>
    %262 = vector.extract_strided_slice %247 {offsets = [0, 384], sizes = [8, 128], strides = [1, 1]} : vector<8x512xf32> to vector<8x128xf32>
    %263 = arith.negf %262 : vector<8x128xf32>
    %264 = math.exp %263 : vector<8x128xf32>
    %cst_104 = arith.constant 1.000000e+00 : f32
    %265 = vector.broadcast %cst_104 : f32 to vector<8x128xf32>
    %266 = arith.addf %265, %264 : vector<8x128xf32>
    %267 = arith.divf %265, %266 : vector<8x128xf32>
    %268 = arith.mulf %259, %232 : vector<8x128xf32>
    %269 = arith.mulf %253, %261 : vector<8x128xf32>
    %270 = arith.addf %268, %269 : vector<8x128xf32>
    %271 = math.tanh %270 : vector<8x128xf32>
    %272 = arith.mulf %267, %271 : vector<8x128xf32>
    %c1_i32_105 = arith.constant 1 : i32
    %273 = arith.addi %3, %c1_i32_105 : i32
    %274 = vector.broadcast %273 : i32 to vector<8x1xi32>
    %275 = arith.cmpi sgt, %4, %274 : vector<8x1xi32>
    %276 = vector.shape_cast %275 : vector<8x1xi1> to vector<8x1xi1>
    %277 = vector.broadcast %276 : vector<8x1xi1> to vector<8x128xi1>
    %278 = arith.select %277, %270, %232 : vector<8x128xi1>, vector<8x128xf32>
    %279 = vector.shape_cast %275 : vector<8x1xi1> to vector<8x1xi1>
    %280 = vector.broadcast %279 : vector<8x1xi1> to vector<8x128xi1>
    %281 = arith.select %280, %272, %235 : vector<8x128xi1>, vector<8x128xf32>
    %cst_106 = arith.constant 0.000000e+00 : f32
    %282 = vector.shape_cast %275 : vector<8x1xi1> to vector<8x1xi1>
    %283 = vector.broadcast %282 : vector<8x1xi1> to vector<8x128xi1>
    %284 = vector.broadcast %cst_106 : f32 to vector<8x128xf32>
    %285 = arith.select %283, %281, %284 : vector<8x128xi1>, vector<8x128xf32>
    %c1_107 = arith.constant 1 : index
    %c0_108 = arith.constant 0 : index
    %c0_109 = arith.constant 0 : index
    %286 = vector.load %arg10[%c1_107, %c0_108, %c0_109] : memref<4x8x128xf32, #tpu.memory_space<vmem>>, vector<1x8x128xf32>
    %287 = vector.shape_cast %286 : vector<1x8x128xf32> to vector<8x128xf32>
    %288 = vector.shape_cast %285 : vector<8x128xf32> to vector<1x8x128xf32>
    tpu.vector_store %arg10[%c1_107, %c0_108, %c0_109], %288 {strides = array<i32>} : memref<4x8x128xf32, #tpu.memory_space<vmem>>, vector<1x8x128xf32>,
    %c16_110 = arith.constant 16 : index
    %c0_111 = arith.constant 0 : index
    %289 = vector.load %arg13[%c16_110, %c0_111] : memref<32x512xf32, #tpu.memory_space<vmem>>, vector<8x512xf32>
    %c1_112 = arith.constant 1 : index
    %c0_113 = arith.constant 0 : index
    %c0_114 = arith.constant 0 : index
    %290 = vector.load %arg5[%c1_112, %c0_113, %c0_114] : memref<2x128x512xf32, #tpu.memory_space<vmem>>, vector<1x128x512xf32>
    %291 = vector.shape_cast %290 : vector<1x128x512xf32> to vector<128x512xf32>
    %cst_115 = arith.constant dense<0.000000e+00> : vector<8x512xf32>
    %292 = tpu.matmul %281, %291, %cst_115 {dimension_numbers = #tpu.dot_dimension_numbers<[1], [0], [0], [1], [0, 0, 1, 1], [], []>} : vector<8x128xf32>, vector<128x512xf32>, vector<8x512xf32> -> vector<8x512xf32>
    %293 = arith.addf %289, %292 : vector<8x512xf32>
    %294 = vector.extract_strided_slice %293 {offsets = [0, 0], sizes = [8, 128], strides = [1, 1]} : vector<8x512xf32> to vector<8x128xf32>
    %295 = arith.negf %294 : vector<8x128xf32>
    %296 = math.exp %295 : vector<8x128xf32>
    %cst_116 = arith.constant 1.000000e+00 : f32
    %297 = vector.broadcast %cst_116 : f32 to vector<8x128xf32>
    %298 = arith.addf %297, %296 : vector<8x128xf32>
    %299 = arith.divf %297, %298 : vector<8x128xf32>
    %300 = vector.extract_strided_slice %293 {offsets = [0, 128], sizes = [8, 128], strides = [1, 1]} : vector<8x512xf32> to vector<8x128xf32>
    %301 = arith.negf %300 : vector<8x128xf32>
    %302 = math.exp %301 : vector<8x128xf32>
    %cst_117 = arith.constant 1.000000e+00 : f32
    %303 = vector.broadcast %cst_117 : f32 to vector<8x128xf32>
    %304 = arith.addf %303, %302 : vector<8x128xf32>
    %305 = arith.divf %303, %304 : vector<8x128xf32>
    %306 = vector.extract_strided_slice %293 {offsets = [0, 256], sizes = [8, 128], strides = [1, 1]} : vector<8x512xf32> to vector<8x128xf32>
    %307 = math.tanh %306 : vector<8x128xf32>
    %308 = vector.extract_strided_slice %293 {offsets = [0, 384], sizes = [8, 128], strides = [1, 1]} : vector<8x512xf32> to vector<8x128xf32>
    %309 = arith.negf %308 : vector<8x128xf32>
    %310 = math.exp %309 : vector<8x128xf32>
    %cst_118 = arith.constant 1.000000e+00 : f32
    %311 = vector.broadcast %cst_118 : f32 to vector<8x128xf32>
    %312 = arith.addf %311, %310 : vector<8x128xf32>
    %313 = arith.divf %311, %312 : vector<8x128xf32>
    %314 = arith.mulf %305, %278 : vector<8x128xf32>
    %315 = arith.mulf %299, %307 : vector<8x128xf32>
    %316 = arith.addf %314, %315 : vector<8x128xf32>
    %317 = math.tanh %316 : vector<8x128xf32>
    %318 = arith.mulf %313, %317 : vector<8x128xf32>
    %c2_i32_119 = arith.constant 2 : i32
    %319 = arith.addi %3, %c2_i32_119 : i32
    %320 = vector.broadcast %319 : i32 to vector<8x1xi32>
    %321 = arith.cmpi sgt, %4, %320 : vector<8x1xi32>
    %322 = vector.shape_cast %321 : vector<8x1xi1> to vector<8x1xi1>
    %323 = vector.broadcast %322 : vector<8x1xi1> to vector<8x128xi1>
    %324 = arith.select %323, %316, %278 : vector<8x128xi1>, vector<8x128xf32>
    %325 = vector.shape_cast %321 : vector<8x1xi1> to vector<8x1xi1>
    %326 = vector.broadcast %325 : vector<8x1xi1> to vector<8x128xi1>
    %327 = arith.select %326, %318, %281 : vector<8x128xi1>, vector<8x128xf32>
    %cst_120 = arith.constant 0.000000e+00 : f32
    %328 = vector.shape_cast %321 : vector<8x1xi1> to vector<8x1xi1>
    %329 = vector.broadcast %328 : vector<8x1xi1> to vector<8x128xi1>
    %330 = vector.broadcast %cst_120 : f32 to vector<8x128xf32>
    %331 = arith.select %329, %327, %330 : vector<8x128xi1>, vector<8x128xf32>
    %c2 = arith.constant 2 : index
    %c0_121 = arith.constant 0 : index
    %c0_122 = arith.constant 0 : index
    %332 = vector.load %arg10[%c2, %c0_121, %c0_122] : memref<4x8x128xf32, #tpu.memory_space<vmem>>, vector<1x8x128xf32>
    %333 = vector.shape_cast %332 : vector<1x8x128xf32> to vector<8x128xf32>
    %334 = vector.shape_cast %331 : vector<8x128xf32> to vector<1x8x128xf32>
    tpu.vector_store %arg10[%c2, %c0_121, %c0_122], %334 {strides = array<i32>} : memref<4x8x128xf32, #tpu.memory_space<vmem>>, vector<1x8x128xf32>,
    %c24_123 = arith.constant 24 : index
    %c0_124 = arith.constant 0 : index
    %335 = vector.load %arg13[%c24_123, %c0_124] : memref<32x512xf32, #tpu.memory_space<vmem>>, vector<8x512xf32>
    %c1_125 = arith.constant 1 : index
    %c0_126 = arith.constant 0 : index
    %c0_127 = arith.constant 0 : index
    %336 = vector.load %arg5[%c1_125, %c0_126, %c0_127] : memref<2x128x512xf32, #tpu.memory_space<vmem>>, vector<1x128x512xf32>
    %337 = vector.shape_cast %336 : vector<1x128x512xf32> to vector<128x512xf32>
    %cst_128 = arith.constant dense<0.000000e+00> : vector<8x512xf32>
    %338 = tpu.matmul %327, %337, %cst_128 {dimension_numbers = #tpu.dot_dimension_numbers<[1], [0], [0], [1], [0, 0, 1, 1], [], []>} : vector<8x128xf32>, vector<128x512xf32>, vector<8x512xf32> -> vector<8x512xf32>
    %339 = arith.addf %335, %338 : vector<8x512xf32>
    %340 = vector.extract_strided_slice %339 {offsets = [0, 0], sizes = [8, 128], strides = [1, 1]} : vector<8x512xf32> to vector<8x128xf32>
    %341 = arith.negf %340 : vector<8x128xf32>
    %342 = math.exp %341 : vector<8x128xf32>
    %cst_129 = arith.constant 1.000000e+00 : f32
    %343 = vector.broadcast %cst_129 : f32 to vector<8x128xf32>
    %344 = arith.addf %343, %342 : vector<8x128xf32>
    %345 = arith.divf %343, %344 : vector<8x128xf32>
    %346 = vector.extract_strided_slice %339 {offsets = [0, 128], sizes = [8, 128], strides = [1, 1]} : vector<8x512xf32> to vector<8x128xf32>
    %347 = arith.negf %346 : vector<8x128xf32>
    %348 = math.exp %347 : vector<8x128xf32>
    %cst_130 = arith.constant 1.000000e+00 : f32
    %349 = vector.broadcast %cst_130 : f32 to vector<8x128xf32>
    %350 = arith.addf %349, %348 : vector<8x128xf32>
    %351 = arith.divf %349, %350 : vector<8x128xf32>
    %352 = vector.extract_strided_slice %339 {offsets = [0, 256], sizes = [8, 128], strides = [1, 1]} : vector<8x512xf32> to vector<8x128xf32>
    %353 = math.tanh %352 : vector<8x128xf32>
    %354 = vector.extract_strided_slice %339 {offsets = [0, 384], sizes = [8, 128], strides = [1, 1]} : vector<8x512xf32> to vector<8x128xf32>
    %355 = arith.negf %354 : vector<8x128xf32>
    %356 = math.exp %355 : vector<8x128xf32>
    %cst_131 = arith.constant 1.000000e+00 : f32
    %357 = vector.broadcast %cst_131 : f32 to vector<8x128xf32>
    %358 = arith.addf %357, %356 : vector<8x128xf32>
    %359 = arith.divf %357, %358 : vector<8x128xf32>
    %360 = arith.mulf %351, %324 : vector<8x128xf32>
    %361 = arith.mulf %345, %353 : vector<8x128xf32>
    %362 = arith.addf %360, %361 : vector<8x128xf32>
    %363 = math.tanh %362 : vector<8x128xf32>
    %364 = arith.mulf %359, %363 : vector<8x128xf32>
    %c3_i32_132 = arith.constant 3 : i32
    %365 = arith.addi %3, %c3_i32_132 : i32
    %366 = vector.broadcast %365 : i32 to vector<8x1xi32>
    %367 = arith.cmpi sgt, %4, %366 : vector<8x1xi32>
    %368 = vector.shape_cast %367 : vector<8x1xi1> to vector<8x1xi1>
    %369 = vector.broadcast %368 : vector<8x1xi1> to vector<8x128xi1>
    %370 = arith.select %369, %362, %324 : vector<8x128xi1>, vector<8x128xf32>
    %371 = vector.shape_cast %367 : vector<8x1xi1> to vector<8x1xi1>
    %372 = vector.broadcast %371 : vector<8x1xi1> to vector<8x128xi1>
    %373 = arith.select %372, %364, %327 : vector<8x128xi1>, vector<8x128xf32>
    %cst_133 = arith.constant 0.000000e+00 : f32
    %374 = vector.shape_cast %367 : vector<8x1xi1> to vector<8x1xi1>
    %375 = vector.broadcast %374 : vector<8x1xi1> to vector<8x128xi1>
    %376 = vector.broadcast %cst_133 : f32 to vector<8x128xf32>
    %377 = arith.select %375, %373, %376 : vector<8x128xi1>, vector<8x128xf32>
    %c3 = arith.constant 3 : index
    %c0_134 = arith.constant 0 : index
    %c0_135 = arith.constant 0 : index
    %378 = vector.load %arg10[%c3, %c0_134, %c0_135] : memref<4x8x128xf32, #tpu.memory_space<vmem>>, vector<1x8x128xf32>
    %379 = vector.shape_cast %378 : vector<1x8x128xf32> to vector<8x128xf32>
    %380 = vector.shape_cast %377 : vector<8x128xf32> to vector<1x8x128xf32>
    tpu.vector_store %arg10[%c3, %c0_134, %c0_135], %380 {strides = array<i32>} : memref<4x8x128xf32, #tpu.memory_space<vmem>>, vector<1x8x128xf32>,
    %c1_136 = arith.constant 1 : index
    %c0_137 = arith.constant 0 : index
    %c0_138 = arith.constant 0 : index
    %381 = vector.load %arg11[%c1_136, %c0_137, %c0_138] : memref<2x8x128xf32, #tpu.memory_space<vmem>>, vector<1x8x128xf32>
    %382 = vector.shape_cast %381 : vector<1x8x128xf32> to vector<8x128xf32>
    %383 = vector.shape_cast %373 : vector<8x128xf32> to vector<1x8x128xf32>
    tpu.vector_store %arg11[%c1_136, %c0_137, %c0_138], %383 {strides = array<i32>} : memref<2x8x128xf32, #tpu.memory_space<vmem>>, vector<1x8x128xf32>,
    %c1_139 = arith.constant 1 : index
    %c0_140 = arith.constant 0 : index
    %c0_141 = arith.constant 0 : index
    %384 = vector.load %arg12[%c1_139, %c0_140, %c0_141] : memref<2x8x128xf32, #tpu.memory_space<vmem>>, vector<1x8x128xf32>
    %385 = vector.shape_cast %384 : vector<1x8x128xf32> to vector<8x128xf32>
    %386 = vector.shape_cast %370 : vector<8x128xf32> to vector<1x8x128xf32>
    tpu.vector_store %arg12[%c1_139, %c0_140, %c0_141], %386 {strides = array<i32>} : memref<2x8x128xf32, #tpu.memory_space<vmem>>, vector<1x8x128xf32>,
    return
  }
  func.func @transform_0(%arg0: i32, %arg1: i32) -> (i32, i32, i32) {
    %c0_i32 = arith.constant 0 : i32
    %c0_i32_0 = arith.constant 0 : i32
    return %arg1, %arg0, %c0_i32 : i32, i32, i32
  }
  func.func @transform_1(%arg0: i32, %arg1: i32) -> (i32, i32) {
    %c0_i32 = arith.constant 0 : i32
    %c0_i32_0 = arith.constant 0 : i32
    return %arg0, %c0_i32 : i32, i32
  }
  func.func @transform_2(%arg0: i32, %arg1: i32) -> (i32, i32) {
    %c0_i32 = arith.constant 0 : i32
    %c0_i32_0 = arith.constant 0 : i32
    %c0_i32_1 = arith.constant 0 : i32
    return %c0_i32, %c0_i32_0 : i32, i32
  }
  func.func @transform_3(%arg0: i32, %arg1: i32) -> (i32, i32, i32) {
    %c0_i32 = arith.constant 0 : i32
    %c0_i32_0 = arith.constant 0 : i32
    %c0_i32_1 = arith.constant 0 : i32
    %c0_i32_2 = arith.constant 0 : i32
    return %c0_i32, %c0_i32_0, %c0_i32_1 : i32, i32, i32
  }
  func.func @transform_4(%arg0: i32, %arg1: i32) -> (i32, i32, i32) {
    %c0_i32 = arith.constant 0 : i32
    %c0_i32_0 = arith.constant 0 : i32
    %c0_i32_1 = arith.constant 0 : i32
    %c0_i32_2 = arith.constant 0 : i32
    return %c0_i32, %c0_i32_0, %c0_i32_1 : i32, i32, i32
  }
  func.func @transform_5(%arg0: i32, %arg1: i32) -> (i32, i32, i32) {
    %c0_i32 = arith.constant 0 : i32
    %c0_i32_0 = arith.constant 0 : i32
    %c0_i32_1 = arith.constant 0 : i32
    return %c0_i32, %arg0, %c0_i32_0 : i32, i32, i32
  }
  func.func @transform_6(%arg0: i32, %arg1: i32) -> (i32, i32, i32) {
    %c0_i32 = arith.constant 0 : i32
    %c0_i32_0 = arith.constant 0 : i32
    %c0_i32_1 = arith.constant 0 : i32
    return %c0_i32, %arg0, %c0_i32_0 : i32, i32, i32
  }
  func.func @transform_7(%arg0: i32, %arg1: i32) -> (i32, i32, i32) {
    %c0_i32 = arith.constant 0 : i32
    %c0_i32_0 = arith.constant 0 : i32
    %c0_i32_1 = arith.constant 0 : i32
    %c0_i32_2 = arith.constant 0 : i32
    return %c0_i32, %c0_i32_0, %c0_i32_1 : i32, i32, i32
  }
  func.func @transform_8(%arg0: i32, %arg1: i32) -> (i32, i32, i32) {
    %c0_i32 = arith.constant 0 : i32
    %c0_i32_0 = arith.constant 0 : i32
    return %arg1, %arg0, %c0_i32 : i32, i32, i32
  }
  func.func @transform_9(%arg0: i32, %arg1: i32) -> (i32, i32, i32) {
    %c0_i32 = arith.constant 0 : i32
    %c0_i32_0 = arith.constant 0 : i32
    %c0_i32_1 = arith.constant 0 : i32
    return %c0_i32, %arg0, %c0_i32_0 : i32, i32, i32
  }
  func.func @transform_10(%arg0: i32, %arg1: i32) -> (i32, i32, i32) {
    %c0_i32 = arith.constant 0 : i32
    %c0_i32_0 = arith.constant 0 : i32
    %c0_i32_1 = arith.constant 0 : i32
    return %c0_i32, %arg0, %c0_i32_0 : i32, i32, i32
  }
}

</mosaic_0001>

<bundles_post_ra>
// kernel: tpu_custom_call.1
= control target key start
LH: loop header
LB: loop body
LE: loop exit
PB: predicated region body
PF: predicated region fallthrough
CT: control target
= control target key end

     0   :  { %s5281_s0 = inlined_call_operand.hbm [shape: f32[8,8,32], index: 0, kind: input, shape index: {}]   ;;  %s5282_s1 = inlined_call_operand.vmem [shape: s32[8,1], index: 1, kind: input, shape index: {}]   ;;  %s5283_s2 = inlined_call_operand.hbm [shape: f32[32,512], index: 2, kind: input, shape index: {}]   ;;  %s5284_s3 = inlined_call_operand.hbm [shape: f32[2,128,512], index: 3, kind: input, shape index: {}]   ;;  %s5285_s4 = inlined_call_operand.hbm [shape: f32[2,1,512], index: 4, kind: input, shape index: {}]   ;;  %s5286_s5 = inlined_call_operand.vmem [shape: f32[2,8,128], index: 5, kind: input, shape index: {}]   ;;  %s5287_s6 = inlined_call_operand.hbm [shape: f32[2,8,128], index: 6, kind: input, shape index: {}]   ;;  %s5288_s7 = inlined_call_operand.hbm [shape: f32[1,128,512], index: 7, kind: input, shape index: {}]   ;;  %s5289_s8 = inlined_call_operand.hbm [shape: f32[8,8,128], index: 8, kind: output, shape index: {0}]   ;;  %s5290_s9 = inlined_call_operand.hbm [shape: f32[2,8,128], index: 9, kind: output, shape index: {1}]   ;;  %s5291_s10 = inlined_call_operand.hbm [shape: f32[2,8,128], index: 10, kind: output, shape index: {2}]  }
   0x1   :  { %5404 = sst [smem:[#allocation67_spill]] %s5283_s2 }
   0x2   :  { %5405 = sst [smem:[#allocation68_spill]] %s5284_s3 }
   0x3   :  { %5406 = sst [smem:[#allocation69_spill]] %s5285_s4 }
   0x4   :  { %5407 = sst [smem:[#allocation70_spill]] %s5287_s6 }
   0x5   :  { %5408 = sst [smem:[#allocation71_spill]] %s5288_s7 }
   0x6   :  { %5409 = sst [smem:[#allocation72_spill]] %s5291_s10 }
   0x7   :  { %16 = vsyncpa [#allocation5], 0 }
   0x8   :  { %18 = vsyncpa [#allocation5 + $0x1], 0 }
   0x9   :  { %19 = vsyncpa [#allocation8], 0 }
   0xa   :  { %20 = vsyncpa [#allocation11], 0 }
   0xb   :  { %21 = vsyncpa [#allocation14], 0 }
   0xc   :  { %22 = vsyncpa [#allocation6], 0 }
   0xd   :  { %24 = vsyncpa [#allocation6 + $0x1], 0 }
   0xe   :  { %25 = vsyncpa [#allocation17], 0  ;;  %s3992_s13 = smov 0   ;;  %s3994_s14 = smov 0  }
   0xf   :  { %s3996_s15 = smov 0   ;;  %s3998_s16 = smov 0  }
  0x10   :  { %s4000_s17 = smov 0   ;;  %s4002_s18 = smov 0  }
  0x11 LB: > { %5410 = sst [smem:[#allocation25_spill]] %s3912_s17  ;;  %s5292_s19 = sadd.s32 4294967295, %s3916_s18   ;;  %s3916_s18 = sphi %s4002_s18, %s31_s18   ;;  %s3912_s17 = sphi %s4000_s17, %s5648_s17   ;;  %s3908_s16 = sphi %s3998_s16, %s5647_s16   ;;  %s3904_s15 = sphi %s3996_s15, %s5651_s15   ;;  %s3900_s14 = sphi %s3994_s14, %s5650_s14   ;;  %s3896_s13 = sphi %s3992_s13, %s5649_s13  }
  0x12   : > { %p3279_p0 = scmp.ge.s32.totalorder %s3916_s18, 1  ;;  %p4026_p1 = scmp.eq.s32.totalorder %s5292_s19, 0 }
  0x13   : > { %p318_p2 = scmp.lt.s32.totalorder %s3916_s18, 3  ;;  %s3918_s22 = smov [#allocation7]  }
  0x14   : > { %s337_s23 = sshll.u32 %s3918_s22, 4  ;;  %s3919_s25 = smov [#allocation10]   ;;  %s338_s23 = int_to_ptr.vmem [resolvable:$true] %s337_s23 }
  0x15   : > { %p4031_p3 = pnand %p3279_p0, %p318_p2  ;;  %s363_s26 = sshll.u32 %s3919_s25, 4  ;;  %s364_s26 = int_to_ptr.vmem [resolvable:$true] %s363_s26 }
  0x16   : > { %s3625_s28 = scalar_lea.vmem %s338_s23, 2048  ;;  %p3633_p11 = scmp.lt.s32.totalorder %s338_s23, %s338_s23 }
  0x17   : > { %p3379_p4 = pneg %p4031_p3  ;;  %p3626_p8 = scmp.ne.s32.totalorder %s338_s23, %s3625_s28 }
  0x18   : > { %p3634_p12 = scmp.lt.s32.totalorder %s3625_s28, %s3625_s28 }
  0x19   : > { %p4040_p6 = pnand %p3379_p4, %p4026_p1 }
  0x1a   : > { %p3635_p13 = por %p3634_p12, %p3633_p11 }
  0x1b   : > { %p4046_p7 = pneg %p4040_p6 }
  0x1d   : > { %p3628_p9 = pnand %p3626_p8, %p4046_p7 }
  0x1f   : > { %p3629_p10 = pneg %p3628_p9 }
  0x21   : > { %p3636_p0 = pnand %p3635_p13, %p3629_p10 }
  0x23   : > { %3639 = shalt.err (!%p3636_p0)
}
  0x24   : > { %s5293_s29 = smov 512   ;;  %s5295_s30 = smov 32  }
  0x25   : > { %s5415_s2 = sld [smem:[#allocation67_spill]]  ;;  %s3651_s22 = scalar_lea.vmem %s364_s26, 128 }
  0x26   : > { %p3652_p2 = scmp.ne.s32.totalorder %s364_s26, %s3651_s22  ;;  %p3659_p9 = scmp.lt.s32.totalorder %s364_s26, %s364_s26 }
  0x27   : > { %p3660_p10 = scmp.lt.s32.totalorder %s3651_s22, %s3651_s22 }
  0x28   : > { %p3654_p4 = pnand %p3652_p2, %p4046_p7 }
  0x29   : > { %p3661_p11 = por %p3660_p10, %p3659_p9 }
  0x2a   : > { %p3655_p8 = pneg %p3654_p4 }
  0x2b   : > { %3382 = dma.hbm_to_vmem [thread:$0]  (!%p4040_p6), %s5415_s2, 2048, %s338_s23, [#allocation8], %s5293_s29, %s5293_s29, %s5295_s30  }
  0x2c   : > { %p3662_p12 = pnand %p3661_p11, %p3655_p8 }
  0x2e   : > { %3665 = shalt.err (!%p3662_p12)
}
  0x2f   : > { %s3922_s25 = smov 64   ;;  %s3923_s28 = smov 4  }
  0x30   : > { %s5416_s4 = sld [smem:[#allocation69_spill]]  ;;  %s3924_s23 = smov [#allocation9]  }
  0x31   : > { %s350_s11 = sshll.u32 %s3924_s23, 4  ;;  %s3925_s12 = smov [#allocation12]   ;;  %s351_s11 = int_to_ptr.vmem [resolvable:$true] %s350_s11 }
  0x32   : > { %s385_s29 = sshll.u32 %s3925_s12, 4  ;;  %s3677_s30 = scalar_lea.vmem %s351_s11, 16384  ;;  %s386_s29 = int_to_ptr.vmem [resolvable:$true] %s385_s29 }
  0x33   : > { %p3678_p13 = scmp.ne.s32.totalorder %s351_s11, %s3677_s30  ;;  %p3685_p4 = scmp.lt.s32.totalorder %s351_s11, %s351_s11 }
  0x34   : > { %p3686_p8 = scmp.lt.s32.totalorder %s3677_s30, %s3677_s30 }
  0x35   : > { %p3680_p0 = pnand %p3678_p13, %p4046_p7 }
  0x36   : > { %3388 = dma.hbm_to_vmem [thread:$0]  (!%p4040_p6), %s5416_s4, 128, %s364_s26, [#allocation11], %s3922_s25, %s3922_s25, %s3923_s28  }
  0x37   : > { %p3681_p2 = pneg %p3680_p0  ;;  %p3687_p9 = por %p3686_p8, %p3685_p4 }
  0x39   : > { %p3688_p10 = pnand %p3687_p9, %p3681_p2 }
  0x3b   : > { %3691 = shalt.err (!%p3688_p10)
}
  0x3c   : > { %s5417_s10 = smov 32   ;;  %s5418_s19 = smov 512  }
  0x3d   : > { %s5419_s3 = sld [smem:[#allocation68_spill]]  ;;  %s3703_s25 = scalar_lea.vmem %s386_s29, 256 }
  0x3e   : > { %p3704_p11 = scmp.ne.s32.totalorder %s386_s29, %s3703_s25  ;;  %p3711_p0 = scmp.lt.s32.totalorder %s386_s29, %s386_s29 }
  0x3f   : > { %p3712_p5 = scmp.lt.s32.totalorder %s3703_s25, %s3703_s25 }
  0x40   : > { %p3706_p12 = pnand %p3704_p11, %p4046_p7 }
  0x41   : > { %p3713_p4 = por %p3712_p5, %p3711_p0 }
  0x42   : > { %p3707_p13 = pneg %p3706_p12 }
  0x43   : > { %3385 = dma.hbm_to_vmem [thread:$0]  (!%p4040_p6), %s5419_s3, 16384, %s351_s11, [#allocation8], %s5418_s19, %s5418_s19, %s5417_s10  }
  0x44   : > { %p3714_p2 = pnand %p3713_p4, %p3707_p13 }
  0x46   : > { %3717 = shalt.err (!%p3714_p2)
}
  0x47   : > { %s5297_s30 = smov 128   ;;  %s5298_s28 = smov 8  }
  0x48   : > { %s5420_s6 = sld [smem:[#allocation70_spill]]  ;;  %s3928_s12 = smov [#allocation13]  }
  0x49   : > { %s398_s26 = sshll.u32 %s3928_s12, 4  ;;  %s399_s26 = int_to_ptr.vmem [resolvable:$true] %s398_s26 }
  0x4a   : > { %s3729_s22 = scalar_lea.vmem %s399_s26, 8192  ;;  %p3737_p10 = scmp.lt.s32.totalorder %s399_s26, %s399_s26 }
  0x4b   : > { %p3730_p8 = scmp.ne.s32.totalorder %s399_s26, %s3729_s22  ;;  %p3738_p11 = scmp.lt.s32.totalorder %s3729_s22, %s3729_s22 }
  0x4d   : > { %p3732_p5 = pnand %p3730_p8, %p4046_p7  ;;  %p3739_p12 = por %p3738_p11, %p3737_p10 }
  0x4e   : > { %3391 = dma.hbm_to_vmem [thread:$0]  (!%p4040_p6), %s5420_s6, 256, %s386_s29, [#allocation11], %s5297_s30, %s5297_s30, %s5298_s28  }
  0x4f   : > { %p3733_p9 = pneg %p3732_p5 }
  0x51   : > { %p3740_p13 = pnand %p3739_p12, %p3733_p9 }
  0x53   : > { %3743 = shalt.err (!%p3740_p13)
}
  0x54   : > { %s5421_s7 = sld [smem:[#allocation71_spill]]  ;;  %s3278_s24 = sadd.s32 4294967294, %s3916_s18  }
  0x55   : > { %s40_s27 = sadd.s32 1, %s3912_s17  ;;  %s52_s23 = sadd.s32 1, %s3904_s15 }
  0x56   : > { %p41_p7 = scmp.ge.s32.totalorder %s40_s27, 2  ;;  %p59_p0 = scmp.ne.s32.totalorder %s3904_s15, %s3900_s14 }
  0x57   : > { %p60_p4 = scmp.eq.s32.totalorder %s3916_s18, 0  ;;  %p65_p2 = scmp.ne.s32.totalorder %s3900_s14, %s3896_s13 }
  0x58   : > { %s5653_s27 = smov (%p41_p7, %s40_s27), 0  ;;  %s5425_s12 = sadd.s32 4294967295, %s3916_s18  }
  0x59   : > { %5422 = sst [smem:[#allocation26_spill]] %s5653_s27  ;;  %p4107_p8 = por %p60_p4, %p59_p0 }
  0x5a   : > { %3394 = dma.hbm_to_vmem [thread:$0]  (!%p4040_p6), %s5421_s7, 8192, %s399_s26, [#allocation14], %s5418_s19, %s5418_s19, %s5417_s10  }
  0x5b   : > { %p4113_p6 = por %p4026_p1, %p65_p2  ;;  %s47_s19 = ssub.s32 %s3912_s17, %s5653_s27 }
  0x5c   : > { %p4121_p5 = scmp.eq.s32.totalorder %s5425_s12, 1  ;;  %p50_p9 = scmp.eq.s32.totalorder %s47_s19, 0 }
  0x5d   : > { %p259_p10 = scmp.eq.s32.totalorder %s3278_s24, 1  ;;  %p3408_p12 = scmp.lt.s32.totalorder %s3916_s18, 2 }
  0x5e   : > { %s5426_s26 = scalar_select %p4121_p5, 1, 0 }
  0x5f   : > { %p4127_p11 = por %p4121_p5, %p59_p0  ;;  %p4135_p13 = por %p259_p10, %p65_p2 }
  0x60   : > { %s4133_s25 = scalar_select %p50_p9, %s3904_s15, %s52_s23  }
  0x61   : > { %s5427_s22 = scalar_select %p4127_p11, 1, 0 }
  0x62   : > { %s5428_s29 = scalar_select %p4135_p13, 1, 0 }
  0x63   : > { %s412_s30 = sand.u32 1, %s3904_s15   ;;  %s3345_s28 = sshll.u32 %s3912_s17, 9 }
  0x64   : > { %s3288_s12 = sshll.u32 %s412_s30, 5  ;;  %s423_s19 = scalar_lea.hbm %s5281_s0, %s3345_s28 }
  0x65   : > { %s416_s24 = scalar_lea.vmem [#allocation4], %s3288_s12  ;;  %p4146_p7 = pnand %p3408_p12, %p4107_p8 }
  0x66   : > { %s424_s4 = sshll.u32 %s416_s24, 4  ;;  %s413_s23 = scalar_lea.sflag [#allocation5], %s412_s30  ;;  %s425_s4 = int_to_ptr.vmem [resolvable:$true] %s424_s4 }
  0x67   : > { %p3746_p0 = pneg %p4146_p7  ;;  %s3757_s7 = scalar_lea.vmem %s425_s4, 512 }
  0x68   : > { %p3758_p4 = scmp.ne.s32.totalorder %s425_s4, %s3757_s7  ;;  %s3929_s27 = smov [#allocation4]  }
  0x69   : > { %s3762_s17 = sshll.u32 %s3929_s27, 4  ;;  %s3763_s17 = int_to_ptr.vmem [resolvable:$false] %s3762_s17 }
  0x6a   : > { %p3760_p2 = pnand %p3758_p4, %p3746_p0  ;;  %s3764_s2 = scalar_lea.vmem %s3763_s17, 1024 }
  0x6b   : > { %p3765_p10 = scmp.lt.s32.totalorder %s425_s4, %s3763_s17  ;;  %p3766_p13 = scmp.lt.s32.totalorder %s3764_s2, %s3757_s7 }
  0x6c   : > { %p3761_p9 = pneg %p3760_p2 }
  0x6d   : > { %p3767_p11 = por %p3766_p13, %p3765_p10 }
  0x6f   : > { %p3768_p5 = pnand %p3767_p11, %p3761_p9 }
  0x71   : > { %3771 = shalt.err (!%p3768_p5)
}
  0x72   : > { %s5430_s3 = smov 8   ;;  %s5431_s28 = smov 128  }
  0x73   : > { %3398 = dma.hbm_to_vmem [thread:$0]  (!%p4146_p7), %s423_s19, 512, %s425_s4, %s413_s23, %s5431_s28, %s5431_s28, %s5430_s3  }
  0x74   : > { %436 = sbr.rel (%p4031_p3) target bundleno = 2241 (0x8c1), region = 52 }
  0x79   : > { %s4160_s30 = sand.u32 1, %s3900_s14  }
  0x7a   : > { %s3292_s17 = sshll.u32 %s4160_s30, 5  ;;  %s439_s7 = scalar_lea.sflag [#allocation5], %s4160_s30 }
  0x7b   : > { %s4164_s27 = scalar_lea.vmem [#allocation4], %s3292_s17 }
  0x7c   : > { %3871 = dma.done.wait (%p4113_p6), %s439_s7, 512  }
  0x7d   : > { %3873 = vsyncadd (%p4113_p6), %s439_s7, 4294966784 }
  0x7e   : > { %3875 = dma.done.wait (%p4026_p1), [#allocation8], 18432  }
  0x7f   : > { %3877 = vsyncadd (%p4026_p1), [#allocation8], 4294948864 }
  0x80   : > { %3879 = dma.done.wait (%p4026_p1), [#allocation11], 384  }
  0x81   : > { %3881 = vsyncadd (%p4026_p1), [#allocation11], 4294966912 }
  0x82   : > { %3883 = dma.done.wait (%p4026_p1), [#allocation14], 8192  }
  0x83   : > { %3885 = vsyncadd (%p4026_p1), [#allocation14], 4294959104  ;;  %s4182_s4 = scalar_lea.vmem [#allocation15], %s3292_s17  ;;  %p3299_p3 = scmp.ne.s32.totalorder %s3908_s16, 0 }
  0x85   : > { %520 = sbr.rel (%p3299_p3) target bundleno = 141 (0x8d), region = 80 }
  0x8a   : > { %v521_v0 = vld [vmem:[%s5286_s5] sm:$0xff]  ;;  %v522_v1 = vld [vmem:[%s5286_s5 + $0x8] sm:$0xff]  ;;  %v526_v3 = vld [vmem:[#allocation12 + $0x8] sm:$0xff] }
  0x8b   : > { %v525_v2 = vld [vmem:[#allocation12] sm:$0xff]  ;;  %523 = vst [vmem:[#allocation16] sm:$0xff] %v521_v0  ;;  %524 = vst [vmem:[#allocation16 + $0x8] sm:$0xff] %v522_v1 }
  0x8c   : > { %527 = vst [vmem:[#allocation18] sm:$0xff] %v525_v2  ;;  %528 = vst [vmem:[#allocation18 + $0x8] sm:$0xff] %v526_v3 }
  0x8d PF: > { %v548_v4 = vld [vmem:[#allocation7 + $0x68] sm:$0xff]  ;;  %v550_v5 = vld [vmem:[#allocation7 + $0x78] sm:$0xff]  ;;  %v547_v6 = vld [vmem:[#allocation7 + $0x60] sm:$0xff]  ;;  %vm573_vm0 = vcmask 261120   ;;  %v5308_v22 = vmov 0.0   ;;  %s4370_s20 = sshll.u32 %s3908_s16, 2 }
  0x8e   : > { %610 = vmatprep.subr.mxu0 %v548_v4  ;;  %699 = vmatprep.subr.mxu1 %v550_v5  ;;  %v549_v7 = vld [vmem:[#allocation7 + $0x70] sm:$0xff]  ;;  %v544_v8 = vld [vmem:[#allocation7 + $0x48] sm:$0xff]  ;;  %v546_v9 = vld [vmem:[#allocation7 + $0x58] sm:$0xff]  ;;  %s1268_s24 = sadd.s32 1, %s4370_s20  ;;  %s1517_s23 = sadd.s32 2, %s4370_s20 }
  0x8f   : > { %611 = vmatpush1.msra.mxu0 %v547_v6  ;;  %700 = vmatpush1.msra.mxu1 %v549_v7  ;;  %v543_v10 = vld [vmem:[#allocation7 + $0x40] sm:$0xff]  ;;  %v545_v11 = vld [vmem:[#allocation7 + $0x50] sm:$0xff]  ;;  %v540_v12 = vld [vmem:[#allocation7 + $0x28] sm:$0xff]  ;;  %s1766_s2 = sadd.s32 3, %s4370_s20  ;;  %s3932_s3 = smov [#allocation16]  }
  0x90   : > { %612 = vmatprep.subr.mxu0 %v544_v8  ;;  %701 = vmatprep.subr.mxu1 %v546_v9  ;;  %v542_v13 = vld [vmem:[#allocation7 + $0x38] sm:$0xff]  ;;  %v539_v14 = vld [vmem:[#allocation7 + $0x20] sm:$0xff]  ;;  %v541_v15 = vld [vmem:[#allocation7 + $0x30] sm:$0xff]  ;;  %s3072_s28 = sshll.u32 %s3932_s3, 4  ;;  %s3346_s17 = sshll.u32 %s3908_s16, 9  ;;  %s3073_s28 = int_to_ptr.vmem [resolvable:$true] %s3072_s28 }
  0x91   : > { %613 = vmatpush1.msra.mxu0 %v543_v10  ;;  %702 = vmatpush1.msra.mxu1 %v545_v11  ;;  %v536_v16 = vld [vmem:[#allocation7 + $0x8] sm:$0xff]  ;;  %v538_v17 = vld [vmem:[#allocation7 + $0x18] sm:$0xff]  ;;  %v535_v18 = vld [vmem:[#allocation7] sm:$0xff]  ;;  %s3057_s7 = sshll.u32 %s4182_s4, 4  ;;  %s5198_s10 = scalar_lea.hbm %s5289_s8, %s3346_s17  ;;  %s5200_s7 = int_to_ptr.vmem [resolvable:$true] %s3057_s7 }
  0x92   : > { %614 = vmatprep.subr.mxu0 %v540_v12  ;;  %703 = vmatprep.subr.mxu1 %v542_v13  ;;  %v537_v19 = vld [vmem:[#allocation7 + $0x10] sm:$0xff]  ;;  %v531_v20 = vld [vmem:[%s4164_s27] sm:$0xff]  ;;  %v4192_v21 = vld [vmem:[#allocation9 + $0x1e8] sm:$0xff]  ;;  %s3772_s16 = scalar_lea.vmem %s3073_s28, 256  ;;  %p5642_p8 = scmp.ne.s32.totalorder %s5426_s26, 0 }
  0x93   : > { %615 = vmatpush1.msra.mxu0 %v539_v14  ;;  %704 = vmatpush1.msra.mxu1 %v541_v15  ;;  %v4195_v23 = vld [vmem:[#allocation9 + $0x1f8] sm:$0xff]  ;;  %v4198_v24 = vld [vmem:[#allocation9 + $0x1e0] sm:$0xff]  ;;  %v4200_v25 = vld [vmem:[#allocation9 + $0x1f0] sm:$0xff]  ;;  %p3773_p1 = scmp.ne.s32.totalorder %s3073_s28, %s3772_s16  ;;  %p3779_p11 = scmp.lt.s32.totalorder %s3073_s28, %s3073_s28 }
  0x94   : > { %616 = vmatprep.subr.mxu0 %v536_v16  ;;  %705 = vmatprep.subr.mxu1 %v538_v17  ;;  %v4204_v26 = vld [vmem:[#allocation9 + $0x1c8] sm:$0xff]  ;;  %v4206_v27 = vld [vmem:[#allocation9 + $0x1d8] sm:$0xff]  ;;  %v4210_v28 = vld [vmem:[#allocation9 + $0x1c0] sm:$0xff]  ;;  %p3780_p12 = scmp.lt.s32.totalorder %s3772_s16, %s3772_s16 }
  0x95   : > { %617 = vmatpush1.msra.mxu0 %v535_v18  ;;  %650 = vmatprep.mubr.f32.mxu0 %v5308_v22  ;;  %v4212_v29 = vld [vmem:[#allocation9 + $0x1d0] sm:$0xff]  ;;  %v4216_v30 = vld [vmem:[#allocation9 + $0x1a8] sm:$0xff]  ;;  %v4218_v31 = vld [vmem:[#allocation9 + $0x1b8] sm:$0xff]  ;;  %p3774_p6 = pnand %p3773_p1, %p5642_p8 }
  0x96   : > { %706 = vmatpush1.msra.mxu1 %v537_v19  ;;  %3301 = vmatmul.mubr.msk.f32.vlgmr.msra.gmra.mxu0 %vm573_vm0, %v531_v20  ;;  %v4222_v32 = vld [vmem:[#allocation9 + $0x1a0] sm:$0xff]  ;;  %v4224_v33 = vld [vmem:[#allocation9 + $0x1b0] sm:$0xff]  ;;  %v4228_v34 = vld [vmem:[#allocation9 + $0x188] sm:$0xff]  ;;  %p3781_p13 = por %p3780_p12, %p3779_p11 }
  0x97   : > { %739 = vmatprep.mubr.f32.mxu1 %v5308_v22  ;;  %850 = vmatprep.subr.mxu0 %v4192_v21  ;;  %v4230_v35 = vld [vmem:[#allocation9 + $0x198] sm:$0xff]  ;;  %v4234_v36 = vld [vmem:[#allocation9 + $0x180] sm:$0xff]  ;;  %v4236_v37 = vld [vmem:[#allocation9 + $0x190] sm:$0xff]  ;;  %p3775_p5 = pneg %p3774_p6 }
  0x98   : > { %921 = vmatprep.subr.mxu1 %v4195_v23  ;;  %3305 = vmatmul.mubr.msk.f32.vlgmr.msra.gmra.mxu1 %vm573_vm0, %v531_v20  ;;  %v4240_v38 = vld [vmem:[#allocation9 + $0x168] sm:$0xff]  ;;  %v4242_v39 = vld [vmem:[#allocation9 + $0x178] sm:$0xff]  ;;  %v4246_v40 = vld [vmem:[#allocation9 + $0x160] sm:$0xff] }
  0x99   : > { %851 = vmatpush1.msra.mxu0 %v4198_v24  ;;  %922 = vmatpush1.msra.mxu1 %v4200_v25  ;;  %v4248_v41 = vld [vmem:[#allocation9 + $0x170] sm:$0xff]  ;;  %v4252_v42 = vld [vmem:[#allocation9 + $0x148] sm:$0xff]  ;;  %v4254_v43 = vld [vmem:[#allocation9 + $0x158] sm:$0xff]  ;;  %p3782_p7 = pnand %p3781_p13, %p3775_p5 }
  0x9a   : > { %852 = vmatprep.subr.mxu0 %v4204_v26  ;;  %923 = vmatprep.subr.mxu1 %v4206_v27  ;;  %v4258_v44 = vld [vmem:[#allocation9 + $0x140] sm:$0xff]  ;;  %v4260_v45 = vld [vmem:[#allocation9 + $0x150] sm:$0xff]  ;;  %v4264_v46 = vld [vmem:[#allocation9 + $0x128] sm:$0xff] }
  0x9b   : > { %853 = vmatpush1.msra.mxu0 %v4210_v28  ;;  %924 = vmatpush1.msra.mxu1 %v4212_v29  ;;  %v4266_v47 = vld [vmem:[#allocation9 + $0x138] sm:$0xff]  ;;  %v4270_v48 = vld [vmem:[#allocation9 + $0x120] sm:$0xff]  ;;  %v4272_v49 = vld [vmem:[#allocation9 + $0x130] sm:$0xff] }
  0x9c   : > { %854 = vmatprep.subr.mxu0 %v4216_v30  ;;  %925 = vmatprep.subr.mxu1 %v4218_v31  ;;  %v4276_v50 = vld [vmem:[#allocation9 + $0x108] sm:$0xff]  ;;  %v4278_v51 = vld [vmem:[#allocation9 + $0x118] sm:$0xff]  ;;  %v4282_v52 = vld [vmem:[#allocation9 + $0x100] sm:$0xff] }
  0x9d   : > { %855 = vmatpush1.msra.mxu0 %v4222_v32  ;;  %926 = vmatpush1.msra.mxu1 %v4224_v33  ;;  %v4284_v53 = vld [vmem:[#allocation9 + $0x110] sm:$0xff]  ;;  %v4288_v54 = vld [vmem:[#allocation9 + $0xe8] sm:$0xff]  ;;  %v4290_v55 = vld [vmem:[#allocation9 + $0xf8] sm:$0xff] }
  0x9e   : > { %856 = vmatprep.subr.mxu0 %v4228_v34  ;;  %927 = vmatprep.subr.mxu1 %v4230_v35  ;;  %v4294_v56 = vld [vmem:[#allocation9 + $0xe0] sm:$0xff]  ;;  %v4298_v57 = vld [vmem:[#allocation9 + $0xf0] sm:$0xff]  ;;  %v532_v58 = vld [vmem:[%s4164_s27 + $0x8] sm:$0xff] }
  0x9f   : > { %857 = vmatpush1.msra.mxu0 %v4234_v36  ;;  %928 = vmatpush1.msra.mxu1 %v4236_v37  ;;  %v4303_v59 = vld [vmem:[#allocation9 + $0xc8] sm:$0xff]  ;;  %v4305_v60 = vld [vmem:[#allocation9 + $0xd8] sm:$0xff]  ;;  %v4309_v61 = vld [vmem:[#allocation9 + $0xc0] sm:$0xff] }
  0xa0   : > { %858 = vmatprep.subr.mxu0 %v4240_v38  ;;  %929 = vmatprep.subr.mxu1 %v4242_v39  ;;  %v4313_v62 = vld [vmem:[#allocation9 + $0xd0] sm:$0xff]  ;;  %v4315_v63 = vld [vmem:[#allocation9 + $0xa8] sm:$0xff]  ;;  %v4319_v0 = vld [vmem:[#allocation9 + $0xb8] sm:$0xff] }
  0xa1   : > { %859 = vmatpush1.msra.mxu0 %v4246_v40  ;;  %930 = vmatpush1.msra.mxu1 %v4248_v41  ;;  %5432 = vst [vmem:[#allocation27_spill] sm:$0xff] %v4313_v62  ;;  %5433 = vst [vmem:[#allocation28_spill] sm:$0xff] %v4315_v63  ;;  %v4323_v1 = vld [vmem:[#allocation9 + $0xa0] sm:$0xff]  ;;  %v4327_v2 = vld [vmem:[#allocation9 + $0xb0] sm:$0xff] }
  0xa2   : > { %860 = vmatprep.subr.mxu0 %v4252_v42  ;;  %931 = vmatprep.subr.mxu1 %v4254_v43  ;;  %5434 = vst [vmem:[#allocation29_spill] sm:$0xff] %v4319_v0  ;;  %5435 = vst [vmem:[#allocation30_spill] sm:$0xff] %v4323_v1  ;;  %v533_v3 = vld [vmem:[%s4164_s27 + $0x10] sm:$0xff]  ;;  %v4332_v4 = vld [vmem:[#allocation9 + $0x88] sm:$0xff] }
  0xa3   : > { %861 = vmatpush1.msra.mxu0 %v4258_v44  ;;  %932 = vmatpush1.msra.mxu1 %v4260_v45  ;;  %5436 = vst [vmem:[#allocation31_spill] sm:$0xff] %v4327_v2  ;;  %5437 = vst [vmem:[#allocation32_spill] sm:$0xff] %v4332_v4  ;;  %v4334_v5 = vld [vmem:[#allocation9 + $0x98] sm:$0xff]  ;;  %v4338_v6 = vld [vmem:[#allocation9 + $0x80] sm:$0xff] }
  0xa4   : > { %862 = vmatprep.subr.mxu0 %v4264_v46  ;;  %933 = vmatprep.subr.mxu1 %v4266_v47  ;;  %5438 = vst [vmem:[#allocation33_spill] sm:$0xff] %v4334_v5  ;;  %5439 = vst [vmem:[#allocation34_spill] sm:$0xff] %v4338_v6  ;;  %v4342_v7 = vld [vmem:[#allocation9 + $0x90] sm:$0xff]  ;;  %v4344_v8 = vld [vmem:[#allocation9 + $0x68] sm:$0xff] }
  0xa5   : > { %863 = vmatpush1.msra.mxu0 %v4270_v48  ;;  %934 = vmatpush1.msra.mxu1 %v4272_v49  ;;  %5440 = vst [vmem:[#allocation35_spill] sm:$0xff] %v4342_v7  ;;  %5441 = vst [vmem:[#allocation36_spill] sm:$0xff] %v4344_v8  ;;  %v4348_v9 = vld [vmem:[#allocation9 + $0x78] sm:$0xff]  ;;  %v4352_v10 = vld [vmem:[#allocation9 + $0x60] sm:$0xff] }
  0xa6   : > { %864 = vmatprep.subr.mxu0 %v4276_v50  ;;  %935 = vmatprep.subr.mxu1 %v4278_v51  ;;  %5442 = vst [vmem:[#allocation37_spill] sm:$0xff] %v4348_v9  ;;  %5443 = vst [vmem:[#allocation38_spill] sm:$0xff] %v4352_v10  ;;  %v4356_v11 = vld [vmem:[#allocation9 + $0x70] sm:$0xff]  ;;  %v534_v12 = vld [vmem:[%s4164_s27 + $0x18] sm:$0xff]  ;;  %s3933_s27 = smov [#allocation18]  }
  0xa7   : > { %865 = vmatpush1.msra.mxu0 %v4282_v52  ;;  %936 = vmatpush1.msra.mxu1 %v4284_v53  ;;  %5444 = vst [vmem:[#allocation39_spill] sm:$0xff] %v4356_v11  ;;  %v4361_v13 = vld [vmem:[#allocation9 + $0x48] sm:$0xff]  ;;  %v4363_v14 = vld [vmem:[#allocation9 + $0x58] sm:$0xff]  ;;  %v4367_v15 = vld [vmem:[#allocation9 + $0x40] sm:$0xff]  ;;  %s3087_s6 = sshll.u32 %s3933_s27, 4  ;;  %s5203_s6 = int_to_ptr.vmem [resolvable:$true] %s3087_s6 }
  0xa8   : > { %866 = vmatprep.subr.mxu0 %v4288_v54  ;;  %937 = vmatprep.subr.mxu1 %v4290_v55  ;;  %5445 = vst [vmem:[#allocation40_spill] sm:$0xff] %v4361_v13  ;;  %5446 = vst [vmem:[#allocation41_spill] sm:$0xff] %v4363_v14  ;;  %v4374_v16 = vld [vmem:[#allocation9 + $0x50] sm:$0xff]  ;;  %v4376_v17 = vld [vmem:[#allocation9 + $0x28] sm:$0xff] }
  0xa9   : > { %656 = vmatprep.mubr.f32.mxu0 %v5308_v22  ;;  %867 = vmatpush1.msra.mxu0 %v4294_v56  ;;  %5447 = vst [vmem:[#allocation42_spill] sm:$0xff] %v4367_v15  ;;  %5448 = vst [vmem:[#allocation43_spill] sm:$0xff] %v4374_v16  ;;  %v4380_v18 = vld [vmem:[#allocation9 + $0x38] sm:$0xff]  ;;  %v4384_v19 = vld [vmem:[#allocation9 + $0x20] sm:$0xff] }
  0xaa   : > { %938 = vmatpush1.msra.mxu1 %v4298_v57  ;;  %3302 = vmatmul.mubr.msk.f32.gmra.mxu0 %vm573_vm0, %v532_v58  ;;  %5449 = vst [vmem:[#allocation44_spill] sm:$0xff] %v4376_v17  ;;  %5450 = vst [vmem:[#allocation45_spill] sm:$0xff] %v4380_v18  ;;  %v4386_v20 = vld [vmem:[#allocation9 + $0x30] sm:$0xff] }
  0xab   : > { %868 = vmatprep.subr.mxu0 %v4303_v59  ;;  %939 = vmatprep.subr.mxu1 %v4305_v60  ;;  %5451 = vst [vmem:[#allocation46_spill] sm:$0xff] %v4384_v19  ;;  %5452 = vst [vmem:[#allocation47_spill] sm:$0xff] %v4386_v20 }
  0xac   : > { %745 = vmatprep.mubr.f32.mxu1 %v5308_v22  ;;  %869 = vmatpush1.msra.mxu0 %v4309_v61 }
  0xad   : > { %940 = vmatpush1.msra.mxu1 %v4313_v62  ;;  %870 = vmatprep.subr.mxu0 %v4315_v63 }
  0xae   : > { %3306 = vmatmul.mubr.msk.f32.gmra.mxu1 %vm573_vm0, %v532_v58  ;;  %941 = vmatprep.subr.mxu1 %v4319_v0  ;;  %v4391_v58 = vld [vmem:[%s5282_s1] sm:$0xff] }
  0xaf   : > { %662 = vmatprep.mubr.f32.mxu0 %v5308_v22  ;;  %871 = vmatpush1.msra.mxu0 %v4323_v1  ;;  %5453 = vst [vmem:[#allocation48_spill] sm:$0xff] %v4391_v58 }
  0xb0   : > { %942 = vmatpush1.msra.mxu1 %v4327_v2  ;;  %3303 = vmatmul.mubr.msk.f32.gmra.mxu0 %vm573_vm0, %v533_v3 }
  0xb1   : > { %872 = vmatprep.subr.mxu0 %v4332_v4  ;;  %943 = vmatprep.subr.mxu1 %v4334_v5 }
  0xb2   : > { %751 = vmatprep.mubr.f32.mxu1 %v5308_v22  ;;  %873 = vmatpush1.msra.mxu0 %v4338_v6 }
  0xb3   : > { %944 = vmatpush1.msra.mxu1 %v4342_v7  ;;  %874 = vmatprep.subr.mxu0 %v4344_v8 }
  0xb4   : > { %3307 = vmatmul.mubr.msk.f32.gmra.mxu1 %vm573_vm0, %v533_v3  ;;  %945 = vmatprep.subr.mxu1 %v4348_v9  ;;  %v1020_v3 = vstv %s4370_s20 }
  0xb5   : > { %668 = vmatprep.mubr.f32.mxu0 %v5308_v22  ;;  %875 = vmatpush1.msra.mxu0 %v4352_v10  ;;  %vm1021_vm1 = vcmp.gt.s32.totalorder %v4391_v58, %v1020_v3 }
  0xb6   : > { %946 = vmatpush1.msra.mxu1 %v4356_v11  ;;  %3304 = vmatmul.mubr.msk.f32.gmra.mxu0 %vm573_vm0, %v534_v12 }
  0xb7   : > { %876 = vmatprep.subr.mxu0 %v4361_v13  ;;  %947 = vmatprep.subr.mxu1 %v4363_v14  ;;  %v4396_v14 = vld [vmem:[#allocation9 + $0x8] sm:$0xff]  ;;  %v4398_v13 = vld [vmem:[#allocation9 + $0x18] sm:$0xff] }
  0xb8   : > { %757 = vmatprep.mubr.f32.mxu1 %v5308_v22  ;;  %877 = vmatpush1.msra.mxu0 %v4367_v15  ;;  %5454 = vst [vmem:[#allocation49_spill] sm:$0xff] %v4396_v14  ;;  %5455 = vst [vmem:[#allocation50_spill] sm:$0xff] %v4398_v13  ;;  %v4403_v22 = vld [vmem:[#allocation9] sm:$0xff]  ;;  %v4407_v15 = vld [vmem:[#allocation9 + $0x10] sm:$0xff] }
  0xb9   : > { %948 = vmatpush1.msra.mxu1 %v4374_v16  ;;  %878 = vmatprep.subr.mxu0 %v4376_v17  ;;  %5456 = vst [vmem:[#allocation51_spill] sm:$0xff] %v4403_v22  ;;  %5457 = vst [vmem:[#allocation52_spill] sm:$0xff] %v4407_v15  ;;  %v4412_v17 = vld [vmem:[#allocation16] sm:$0xff]  ;;  %v1269_v16 = vstv %s1268_s24 }
  0xba   : > { %3308 = vmatmul.mubr.msk.f32.gmra.mxu1 %vm573_vm0, %v534_v12  ;;  %949 = vmatprep.subr.mxu1 %v4380_v18  ;;  %v5458_v12 = vmov 0.0   ;;  %vm1270_vm2 = vcmp.gt.s32.totalorder %v4391_v58, %v1269_v16  ;;  %v5459_v16 = vld [vmem:[#allocation40_spill] sm:$0xff] }
  0xbb   : > { %879 = vmatpush1.msra.mxu0 %v4384_v19  ;;  %950 = vmatpush1.msra.mxu1 %v4386_v20  ;;  %v5320_v20 = vmov 0   ;;  %v5463_v58 = vld [vmem:[#allocation44_spill] sm:$0xff] }
  0xbc   : > { %880 = vmatprep.subr.mxu0 %v4396_v14  ;;  %951 = vmatprep.subr.mxu1 %v4398_v13  ;;  %v1022_v19 = vsel %vm1021_vm1, 1, %v5320_v20  ;;  %v1271_v3 = vsel %vm1270_vm2, 1, %v5320_v20 }
  0xbd   : > { %881 = vmatpush1.msra.mxu0 %v4403_v22  ;;  %914 = vmatprep.mubr.f32.mxu0 %v5458_v12 }
  0xbe   : > { %952 = vmatpush1.msra.mxu1 %v4407_v15  ;;  %985 = vmatprep.mubr.f32.mxu1 %v5458_v12 }
  0xbf   : > { %915 = vmatmul.mubr.f32.vlgmr.msra.gmra.mxu0 %v4412_v17  ;;  %986 = vmatmul.mubr.f32.vlgmr.msra.gmra.mxu1 %v4412_v17 }
  0xc0   : > { %3484 = vset.pattern.permute.xlu0 %v5320_v20  ;;  %1098 = vmatprep.subr.mxu0 %v4192_v21  ;;  %v5462_v20 = vld [vmem:[#allocation43_spill] sm:$0xff] }
  0xc1   : > { %1024 = vperm.xlu0 %3484, %v1022_v19   ;;  %1169 = vmatprep.subr.mxu1 %v4195_v23  ;;  %v5460_v19 = vld [vmem:[#allocation41_spill] sm:$0xff] }
  0xc2   : > { %1099 = vmatpush1.msra.mxu0 %v4198_v24  ;;  %1170 = vmatpush1.msra.mxu1 %v4200_v25 }
  0xc3   : > { %1100 = vmatprep.subr.mxu0 %v4204_v26  ;;  %1171 = vmatprep.subr.mxu1 %v4206_v27 }
  0xc4   : > { %1101 = vmatpush1.msra.mxu0 %v4210_v28  ;;  %1172 = vmatpush1.msra.mxu1 %v4212_v29 }
  0xc5   : > { %1273 = vperm.xlu0 %3484, %v1271_v3   ;;  %1102 = vmatprep.subr.mxu0 %v4216_v30  ;;  %v5461_v3 = vld [vmem:[#allocation42_spill] sm:$0xff] }
  0xc6   : > { %1173 = vmatprep.subr.mxu1 %v4218_v31  ;;  %1103 = vmatpush1.msra.mxu0 %v4222_v32 }
  0xc7   : > { %1174 = vmatpush1.msra.mxu1 %v4224_v33  ;;  %1104 = vmatprep.subr.mxu0 %v4228_v34 }
  0xc8   : > { %1175 = vmatprep.subr.mxu1 %v4230_v35  ;;  %1105 = vmatpush1.msra.mxu0 %v4234_v36 }
  0xc9   : > { %1176 = vmatpush1.msra.mxu1 %v4236_v37  ;;  %1106 = vmatprep.subr.mxu0 %v4240_v38 }
  0xca   : > { %1177 = vmatprep.subr.mxu1 %v4242_v39  ;;  %1107 = vmatpush1.msra.mxu0 %v4246_v40 }
  0xcb   : > { %1178 = vmatpush1.msra.mxu1 %v4248_v41  ;;  %1108 = vmatprep.subr.mxu0 %v4252_v42 }
  0xcc   : > { %1179 = vmatprep.subr.mxu1 %v4254_v43  ;;  %1109 = vmatpush1.msra.mxu0 %v4258_v44 }
  0xcd   : > { %1180 = vmatpush1.msra.mxu1 %v4260_v45  ;;  %1110 = vmatprep.subr.mxu0 %v4264_v46 }
  0xce   : > { %1181 = vmatprep.subr.mxu1 %v4266_v47  ;;  %1111 = vmatpush1.msra.mxu0 %v4270_v48 }
  0xcf   : > { %1182 = vmatpush1.msra.mxu1 %v4272_v49  ;;  %1112 = vmatprep.subr.mxu0 %v4276_v50 }
  0xd0   : > { %1183 = vmatprep.subr.mxu1 %v4278_v51  ;;  %1113 = vmatpush1.msra.mxu0 %v4282_v52 }
  0xd1   : > { %1184 = vmatpush1.msra.mxu1 %v4284_v53  ;;  %1114 = vmatprep.subr.mxu0 %v4288_v54 }
  0xd2   : > { %1185 = vmatprep.subr.mxu1 %v4290_v55  ;;  %1115 = vmatpush1.msra.mxu0 %v4294_v56 }
  0xd3   : > { %1186 = vmatpush1.msra.mxu1 %v4298_v57  ;;  %1116 = vmatprep.subr.mxu0 %v4303_v59 }
  0xd4   : > { %1187 = vmatprep.subr.mxu1 %v4305_v60  ;;  %1117 = vmatpush1.msra.mxu0 %v4309_v61 }
  0xd5   : > { %1188 = vmatpush1.msra.mxu1 %v4313_v62  ;;  %1118 = vmatprep.subr.mxu0 %v4315_v63 }
  0xd6   : > { %1189 = vmatprep.subr.mxu1 %v4319_v0  ;;  %1119 = vmatpush1.msra.mxu0 %v4323_v1 }
  0xd7   : > { %1190 = vmatpush1.msra.mxu1 %v4327_v2  ;;  %1120 = vmatprep.subr.mxu0 %v4332_v4 }
  0xd8   : > { %1191 = vmatprep.subr.mxu1 %v4334_v5  ;;  %1121 = vmatpush1.msra.mxu0 %v4338_v6 }
  0xd9   : > { %1192 = vmatpush1.msra.mxu1 %v4342_v7  ;;  %1122 = vmatprep.subr.mxu0 %v4344_v8  ;;  %v5464_v7 = vld [vmem:[#allocation46_spill] sm:$0xff]  ;;  %v5465_v8 = vld [vmem:[#allocation47_spill] sm:$0xff] }
  0xda   : > { %1193 = vmatprep.subr.mxu1 %v4348_v9  ;;  %1123 = vmatpush1.msra.mxu0 %v4352_v10 }
  0xdb   : > { %1194 = vmatpush1.msra.mxu1 %v4356_v11  ;;  %1124 = vmatprep.subr.mxu0 %v5459_v16 }
  0xdc   : > { %1195 = vmatprep.subr.mxu1 %v5460_v19  ;;  %1125 = vmatpush1.msra.mxu0 %v5461_v3 }
  0xdd   : > { %1196 = vmatpush1.msra.mxu1 %v5462_v20  ;;  %1126 = vmatprep.subr.mxu0 %v5463_v58  ;;  %v551_v58 = vld [vmem:[#allocation10] sm:$0xf] }
  0xde   : > { %1197 = vmatprep.subr.mxu1 %v4380_v18  ;;  %1127 = vmatpush1.msra.mxu0 %v5464_v7  ;;  %v5466_v18 = vmov 0   ;;  %v553_v7 = vlaneseq }
  0xdf   : > { %1198 = vmatpush1.msra.mxu1 %v5465_v8  ;;  %1128 = vmatprep.subr.mxu0 %v4396_v14 }
  0xe0   : > { %1199 = vmatprep.subr.mxu1 %v4398_v13  ;;  %1129 = vmatpush1.msra.mxu0 %v4403_v22  ;;  %v4493_v8 = vshrl.u32 %v553_v7, 7 }
  0xe1   : > { %1162 = vmatprep.mubr.f32.mxu0 %v5458_v12  ;;  %1200 = vmatpush1.msra.mxu1 %v4407_v15 }
  0xe2   : > { %1233 = vmatprep.mubr.f32.mxu1 %v5458_v12  ;;  %1347 = vmatprep.subr.mxu0 %v4192_v21  ;;  %5467 = vst [vmem:[#allocation53_spill] sm:$0xff] %v4493_v8  ;;  %v5335_v13 = vsub.s32 0, %v4493_v8  ;;  %v5340_v20 = vsub.s32 1, %v4493_v8  ;;  %v5343_v21 = vsub.s32 2, %v4493_v8  ;;  %v5346_v19 = vsub.s32 3, %v4493_v8 }
  0xe3   : > { %1418 = vmatprep.subr.mxu1 %v4195_v23  ;;  %3485 = vset.pattern.permute.xlu1 %v5466_v18 }
  0xe4   : > { %v556_v15 = vrot.slane %v551_v58, %v5335_v13  ;;  %v560_v18 = vrot.slane %v551_v58, %v5340_v20  ;;  %v564_v11 = vrot.slane %v551_v58, %v5343_v21  ;;  %v568_v13 = vrot.slane %v551_v58, %v5346_v19 }
 0x156   : > { %v652_v14 = vpop.f32.mrf.mxu0 }
 0x158   : > { %v741_v22 = vpop.f32.mrf.mxu1  ;;  %v654_v3 = vpop.f32.mrf.mxu0 }
 0x15a   : > { %v743_v23 = vpop.f32.mrf.mxu1 }
 0x16a   : > { %v658_v12 = vpop.f32.mrf.mxu0 }
 0x16b   : > { %v4502_v7 = vadd.f32 %v658_v12, %v556_v15 }
 0x16c   : > { %v660_v16 = vpop.f32.mrf.mxu0 }
 0x16d   : > { %5468 = vst [vmem:[#allocation54_spill] sm:$0xff] %v4502_v7  ;;  %v4507_v10 = vadd.f32 %v660_v16, %v560_v18 }
 0x16e   : > { %v747_v9 = vpop.f32.mrf.mxu1 }
 0x16f   : > { %5469 = vst [vmem:[#allocation55_spill] sm:$0xff] %v4507_v10  ;;  %v4511_v6 = vadd.f32 %v747_v9, %v564_v11 }
 0x170   : > { %v664_v5 = vpop.f32.mrf.mxu0  ;;  %v749_v4 = vpop.f32.mrf.mxu1 }
 0x171   : > { %5470 = vst [vmem:[#allocation56_spill] sm:$0xff] %v4511_v6  ;;  %v4513_v2 = vadd.f32 %v664_v5, %v556_v15  ;;  %v4515_v12 = vadd.f32 %v749_v4, %v568_v13  ;;  %v655_v6 = vadd.f32 %v654_v3, %v560_v18 }
 0x172   : > { %v666_v20 = vpop.f32.mrf.mxu0 }
 0x173   : > { %5471 = vst [vmem:[#allocation57_spill] sm:$0xff] %v4513_v2  ;;  %5472 = vst [vmem:[#allocation58_spill] sm:$0xff] %v4515_v12  ;;  %v4517_v7 = vadd.f32 %v666_v20, %v560_v18  ;;  %v653_v20 = vadd.f32 %v652_v14, %v556_v15 }
 0x174   : > { %v753_v1 = vpop.f32.mrf.mxu1 }
 0x175   : > { %5473 = vst [vmem:[#allocation59_spill] sm:$0xff] %v4517_v7  ;;  %v4519_v0 = vadd.f32 %v753_v1, %v564_v11 }
 0x176   : > { %v670_v16 = vpop.f32.mrf.mxu0  ;;  %v755_v21 = vpop.f32.mrf.mxu1 }
 0x177   : > { %5474 = vst [vmem:[#allocation60_spill] sm:$0xff] %v4519_v0  ;;  %v4521_v10 = vadd.f32 %v670_v16, %v556_v15  ;;  %v4523_v8 = vadd.f32 %v755_v21, %v568_v13 }
 0x178   : > { %v672_v9 = vpop.f32.mrf.mxu0 }
 0x179   : > { %5475 = vst [vmem:[#allocation61_spill] sm:$0xff] %v4521_v10  ;;  %5476 = vst [vmem:[#allocation62_spill] sm:$0xff] %v4523_v8  ;;  %v4525_v58 = vadd.f32 %v672_v9, %v560_v18  ;;  %v744_v9 = vadd.f32 %v743_v23, %v568_v13  ;;  %v742_v8 = vadd.f32 %v741_v22, %v564_v11 }
 0x17a   : > { %v759_v19 = vpop.f32.mrf.mxu1 }
 0x17b   : > { %5477 = vst [vmem:[#allocation63_spill] sm:$0xff] %v4525_v58  ;;  %v4527_v5 = vadd.f32 %v759_v19, %v564_v11 }
 0x17c   : > { %v761_v4 = vpop.f32.mrf.mxu1 }
 0x17d   : > { %5478 = vst [vmem:[#allocation64_spill] sm:$0xff] %v4527_v5  ;;  %v4529_v2 = vadd.f32 %v761_v4, %v568_v13  ;;  %v4537_v13 = vpop.permute.xlu0 %1024 }
 0x17e   : > { %5480 = vst [vmem:[#allocation66_spill] sm:$0xff] %v4537_v13  ;;  %vm1026_vm3 = vcmp.eq.s32.totalorder %v4537_v13, 1  ;;  %v4851_v13 = vld [vmem:[#allocation9 + $0x208] sm:$0xff] }
 0x17f   : > { %5479 = vst [vmem:[#allocation65_spill] sm:$0xff] %v4529_v2  ;;  %v916_v7 = vpop.f32.mrf.mxu0  ;;  %v987_v16 = vpop.f32.mrf.mxu1 }
 0x180   : > { %v992_v1 = vadd.f32 %v916_v7, %v653_v20  ;;  %v994_v62 = vadd.f32 %v987_v16, %v742_v8  ;;  %v5511_v20 = vld [vmem:[#allocation58_spill] sm:$0xff]  ;;  %v5512_v16 = vld [vmem:[#allocation56_spill] sm:$0xff] }
 0x181   : > { %v918_v0 = vpop.f32.mrf.mxu0  ;;  %v989_v10 = vpop.f32.mrf.mxu1 }
 0x182   : > { %v3309_v12 = vmul.f32 -1.442695, %v992_v1  ;;  %v993_v63 = vadd.f32 %v918_v0, %v655_v6  ;;  %v995_v58 = vadd.f32 %v989_v10, %v744_v9  ;;  %v4531_v6 = vld [vmem:[#allocation18] sm:$0xff] }
 0x184   : > { %3486 = vpow2.f32 %v3309_v12  ;;  %v3310_v21 = vmul.f32 -1.442695, %v993_v63  ;;  %v3311_v19 = vmul.f32 -1.442695, %v995_v58 }
 0x186   : > { %3488 = vpow2.f32 %v3310_v21 }
 0x187   : > { %3490 = vpow2.f32 %v3311_v19 }
 0x191   : > { %v3487_v5 = vpop.eup %3486 }
 0x192   : > { %v999_v4 = vadd.f32 1.0, %v3487_v5 }
 0x193   : > { %v3489_v2 = vpop.eup %3488 }
 0x194   : > { %3492 = vrcp.f32 %v999_v4  ;;  %v1005_v14 = vadd.f32 1.0, %v3489_v2  ;;  %v3491_v15 = vpop.eup %3490 }
 0x195   : > { %3494 = vtanh.f32 %v994_v62  ;;  %v1012_v3 = vadd.f32 1.0, %v3491_v15 }
 0x196   : > { %3496 = vrcp.f32 %v1005_v14 }
 0x197   : > { %3498 = vrcp.f32 %v1012_v3 }
 0x1a1   : > { %v3493_v0 = vpop.eup %3492 }
 0x1a2   : > { %v3495_v63 = vpop.eup %3494 }
 0x1a3   : > { %v3497_v18 = vpop.eup %3496  ;;  %v1016_v22 = vmul.f32 %v3495_v63, %v3493_v0 }
 0x1a4   : > { %v1015_v10 = vmul.f32 %v3497_v18, %v4531_v6  ;;  %v3499_v8 = vpop.eup %3498 }
 0x1a6   : > { %v4534_v11 = vadd.f32 %v1016_v22, %v1015_v10 }
 0x1a8   : > { %3500 = vtanh.f32 %v4534_v11  ;;  %v1027_v22 = vsel %vm1026_vm3, %v4534_v11, %v4531_v6  ;;  %v1593_v11 = vld [vmem:[#allocation9 + $0x1e8] sm:$0xff] }
 0x1b5   : > { %v3501_v62 = vpop.eup %3500 }
 0x1b6   : > { %v1019_v2 = vmul.f32 %v3501_v62, %v3499_v8  ;;  %v4625_v62 = vpop.permute.xlu0 %1273 }
 0x1b7   : > { %vm1275_vm6 = vcmp.eq.s32.totalorder %v4625_v62, 1 }
 0x1b8   : > { %v4543_v23 = vsel %vm1026_vm3, %v1019_v2, %v4412_v17  ;;  %v5510_v17 = vld [vmem:[#allocation55_spill] sm:$0xff] }
 0x1b9   : > { %1163 = vmatmul.mubr.f32.vlgmr.msra.gmra.mxu0 %v4543_v23  ;;  %1234 = vmatmul.mubr.f32.vlgmr.msra.gmra.mxu1 %v4543_v23 }
 0x1ba   : > { %1348 = vmatpush1.msra.mxu0 %v4198_v24  ;;  %1419 = vmatpush1.msra.mxu1 %v4200_v25  ;;  %v5481_v24 = vld [vmem:[#allocation27_spill] sm:$0xff]  ;;  %v5482_v25 = vld [vmem:[#allocation28_spill] sm:$0xff] }
 0x1bb   : > { %1349 = vmatprep.subr.mxu0 %v4204_v26  ;;  %1420 = vmatprep.subr.mxu1 %v4206_v27  ;;  %v5483_v26 = vld [vmem:[#allocation29_spill] sm:$0xff]  ;;  %v5484_v27 = vld [vmem:[#allocation30_spill] sm:$0xff]  ;;  %5513 = vst [vmem:[#allocation27_spill] sm:$0xff] %v4625_v62 }
 0x1bc   : > { %1350 = vmatpush1.msra.mxu0 %v4210_v28  ;;  %1421 = vmatpush1.msra.mxu1 %v4212_v29  ;;  %v5485_v28 = vld [vmem:[#allocation31_spill] sm:$0xff]  ;;  %v5486_v29 = vld [vmem:[#allocation32_spill] sm:$0xff]  ;;  %v4849_v62 = vld [vmem:[#allocation9 + $0x230] sm:$0xff] }
 0x1bd   : > { %1351 = vmatprep.subr.mxu0 %v4216_v30  ;;  %1422 = vmatprep.subr.mxu1 %v4218_v31  ;;  %v5487_v30 = vld [vmem:[#allocation33_spill] sm:$0xff]  ;;  %v5488_v31 = vld [vmem:[#allocation34_spill] sm:$0xff] }
 0x1be   : > { %1352 = vmatpush1.msra.mxu0 %v4222_v32  ;;  %1423 = vmatpush1.msra.mxu1 %v4224_v33  ;;  %v5489_v32 = vld [vmem:[#allocation35_spill] sm:$0xff]  ;;  %v5490_v33 = vld [vmem:[#allocation36_spill] sm:$0xff] }
 0x1bf   : > { %1353 = vmatprep.subr.mxu0 %v4228_v34  ;;  %1424 = vmatprep.subr.mxu1 %v4230_v35  ;;  %v5491_v34 = vld [vmem:[#allocation37_spill] sm:$0xff]  ;;  %v5492_v35 = vld [vmem:[#allocation38_spill] sm:$0xff] }
 0x1c0   : > { %1354 = vmatpush1.msra.mxu0 %v4234_v36  ;;  %1425 = vmatpush1.msra.mxu1 %v4236_v37  ;;  %v5493_v36 = vld [vmem:[#allocation39_spill] sm:$0xff]  ;;  %v5494_v37 = vld [vmem:[#allocation40_spill] sm:$0xff] }
 0x1c1   : > { %1355 = vmatprep.subr.mxu0 %v4240_v38  ;;  %1426 = vmatprep.subr.mxu1 %v4242_v39  ;;  %v5495_v38 = vld [vmem:[#allocation41_spill] sm:$0xff]  ;;  %v5496_v39 = vld [vmem:[#allocation42_spill] sm:$0xff] }
 0x1c2   : > { %1356 = vmatpush1.msra.mxu0 %v4246_v40  ;;  %1427 = vmatpush1.msra.mxu1 %v4248_v41  ;;  %v5497_v40 = vld [vmem:[#allocation43_spill] sm:$0xff]  ;;  %v5498_v41 = vld [vmem:[#allocation44_spill] sm:$0xff] }
 0x1c3   : > { %1357 = vmatprep.subr.mxu0 %v4252_v42  ;;  %1428 = vmatprep.subr.mxu1 %v4254_v43  ;;  %v5499_v42 = vld [vmem:[#allocation45_spill] sm:$0xff]  ;;  %v5500_v43 = vld [vmem:[#allocation46_spill] sm:$0xff] }
 0x1c4   : > { %1358 = vmatpush1.msra.mxu0 %v4258_v44  ;;  %1429 = vmatpush1.msra.mxu1 %v4260_v45  ;;  %v5501_v44 = vld [vmem:[#allocation47_spill] sm:$0xff]  ;;  %v5502_v45 = vld [vmem:[#allocation49_spill] sm:$0xff] }
 0x1c5   : > { %1359 = vmatprep.subr.mxu0 %v4264_v46  ;;  %1430 = vmatprep.subr.mxu1 %v4266_v47  ;;  %v5503_v46 = vld [vmem:[#allocation50_spill] sm:$0xff]  ;;  %v5504_v47 = vld [vmem:[#allocation51_spill] sm:$0xff]  ;;  %5537 = vst [vmem:[#allocation47_spill] sm:$0xff] %v4849_v62  ;;  %5538 = vst [vmem:[#allocation49_spill] sm:$0xff] %v4851_v13 }
 0x1c6   : > { %1360 = vmatpush1.msra.mxu0 %v4270_v48  ;;  %1431 = vmatpush1.msra.mxu1 %v4272_v49  ;;  %v5505_v48 = vmov 0.0   ;;  %v5506_v49 = vld [vmem:[#allocation52_spill] sm:$0xff] }
 0x1c7   : > { %1361 = vmatprep.subr.mxu0 %v4276_v50  ;;  %1432 = vmatprep.subr.mxu1 %v4278_v51  ;;  %v1518_v50 = vstv %s1517_s23  ;;  %v1767_v51 = vstv %s1766_s2 }
 0x1c8   : > { %1362 = vmatpush1.msra.mxu0 %v4282_v52  ;;  %1433 = vmatpush1.msra.mxu1 %v4284_v53  ;;  %v5507_v52 = vld [vmem:[#allocation48_spill] sm:$0xff]  ;;  %v5508_v53 = vmov 0  }
 0x1c9   : > { %1363 = vmatprep.subr.mxu0 %v4288_v54  ;;  %1434 = vmatprep.subr.mxu1 %v4290_v55  ;;  %vm1519_vm4 = vcmp.gt.s32.totalorder %v5507_v52, %v1518_v50  ;;  %vm1768_vm5 = vcmp.gt.s32.totalorder %v5507_v52, %v1767_v51  ;;  %v1575_v50 = vld [vmem:[#allocation9 + $0x158] sm:$0xff]  ;;  %v1572_v51 = vld [vmem:[#allocation9 + $0x140] sm:$0xff]  ;;  %v1574_v52 = vld [vmem:[#allocation9 + $0x150] sm:$0xff] }
 0x1ca   : > { %1364 = vmatpush1.msra.mxu0 %v4294_v56  ;;  %1435 = vmatpush1.msra.mxu1 %v4298_v57  ;;  %v1520_v54 = vsel %vm1519_vm4, 1, %v5508_v53  ;;  %v1769_v55 = vsel %vm1768_vm5, 1, %v5508_v53  ;;  %v5509_v57 = vld [vmem:[#allocation54_spill] sm:$0xff]  ;;  %v1569_v53 = vld [vmem:[#allocation9 + $0x128] sm:$0xff] }
 0x1cb   : > { %1365 = vmatprep.subr.mxu0 %v4303_v59  ;;  %1436 = vmatprep.subr.mxu1 %v4305_v60 }
 0x1cc   : > { %1366 = vmatpush1.msra.mxu0 %v4309_v61  ;;  %1437 = vmatpush1.msra.mxu1 %v5481_v24 }
 0x1cd   : > { %1367 = vmatprep.subr.mxu0 %v5482_v25  ;;  %1438 = vmatprep.subr.mxu1 %v5483_v26 }
 0x1ce   : > { %1368 = vmatpush1.msra.mxu0 %v5484_v27  ;;  %1439 = vmatpush1.msra.mxu1 %v5485_v28 }
 0x1cf   : > { %1369 = vmatprep.subr.mxu0 %v5486_v29  ;;  %1440 = vmatprep.subr.mxu1 %v5487_v30  ;;  %v1595_v29 = vld [vmem:[#allocation9 + $0x1f8] sm:$0xff]  ;;  %v1592_v30 = vld [vmem:[#allocation9 + $0x1e0] sm:$0xff] }
 0x1d0   : > { %1370 = vmatpush1.msra.mxu0 %v5488_v31  ;;  %1441 = vmatpush1.msra.mxu1 %v5489_v32  ;;  %v1594_v31 = vld [vmem:[#allocation9 + $0x1f0] sm:$0xff]  ;;  %v1589_v32 = vld [vmem:[#allocation9 + $0x1c8] sm:$0xff] }
 0x1d1   : > { %1371 = vmatprep.subr.mxu0 %v5490_v33  ;;  %1442 = vmatprep.subr.mxu1 %v5491_v34  ;;  %v1591_v33 = vld [vmem:[#allocation9 + $0x1d8] sm:$0xff]  ;;  %v1588_v34 = vld [vmem:[#allocation9 + $0x1c0] sm:$0xff] }
 0x1d2   : > { %1372 = vmatpush1.msra.mxu0 %v5492_v35  ;;  %1443 = vmatpush1.msra.mxu1 %v5493_v36  ;;  %v1590_v35 = vld [vmem:[#allocation9 + $0x1d0] sm:$0xff]  ;;  %v1585_v36 = vld [vmem:[#allocation9 + $0x1a8] sm:$0xff] }
 0x1d3   : > { %1373 = vmatprep.subr.mxu0 %v5494_v37  ;;  %1444 = vmatprep.subr.mxu1 %v5495_v38  ;;  %v1587_v37 = vld [vmem:[#allocation9 + $0x1b8] sm:$0xff]  ;;  %v1584_v38 = vld [vmem:[#allocation9 + $0x1a0] sm:$0xff] }
 0x1d4   : > { %1374 = vmatpush1.msra.mxu0 %v5496_v39  ;;  %1445 = vmatpush1.msra.mxu1 %v5497_v40  ;;  %v1586_v39 = vld [vmem:[#allocation9 + $0x1b0] sm:$0xff]  ;;  %v1581_v40 = vld [vmem:[#allocation9 + $0x188] sm:$0xff] }
 0x1d5   : > { %1375 = vmatprep.subr.mxu0 %v5498_v41  ;;  %1446 = vmatprep.subr.mxu1 %v5499_v42  ;;  %v1583_v41 = vld [vmem:[#allocation9 + $0x198] sm:$0xff]  ;;  %v1580_v42 = vld [vmem:[#allocation9 + $0x180] sm:$0xff] }
 0x1d6   : > { %1376 = vmatpush1.msra.mxu0 %v5500_v43  ;;  %1447 = vmatpush1.msra.mxu1 %v5501_v44  ;;  %v1582_v43 = vld [vmem:[#allocation9 + $0x190] sm:$0xff]  ;;  %v1577_v44 = vld [vmem:[#allocation9 + $0x168] sm:$0xff] }
 0x1d7   : > { %1377 = vmatprep.subr.mxu0 %v5502_v45  ;;  %1448 = vmatprep.subr.mxu1 %v5503_v46  ;;  %v1579_v45 = vld [vmem:[#allocation9 + $0x178] sm:$0xff]  ;;  %v1576_v46 = vld [vmem:[#allocation9 + $0x160] sm:$0xff] }
 0x1d8   : > { %1378 = vmatpush1.msra.mxu0 %v5504_v47  ;;  %1411 = vmatprep.mubr.f32.mxu0 %v5505_v48  ;;  %v1578_v47 = vld [vmem:[#allocation9 + $0x170] sm:$0xff] }
 0x1d9   : > { %1449 = vmatpush1.msra.mxu1 %v5506_v49  ;;  %1482 = vmatprep.mubr.f32.mxu1 %v5505_v48  ;;  %v1573_v49 = vld [vmem:[#allocation9 + $0x148] sm:$0xff] }
 0x1da   : > { %1522 = vperm.xlu1 %3485, %v1520_v54   ;;  %1596 = vmatprep.subr.mxu0 %v1593_v11  ;;  %v1571_v54 = vld [vmem:[#allocation9 + $0x138] sm:$0xff]  ;;  %v1536_v11 = vld [vmem:[#allocation9 + $0x20] sm:$0xff] }
 0x1db   : > { %1667 = vmatprep.subr.mxu1 %v1595_v29  ;;  %v1538_v29 = vld [vmem:[#allocation9 + $0x30] sm:$0xff] }
 0x1de   : > { %1771 = vperm.xlu1 %3485, %v1769_v55   ;;  %v1568_v55 = vld [vmem:[#allocation9 + $0x120] sm:$0xff] }
 0x279   : > { %v1164_v56 = vpop.f32.mrf.mxu0  ;;  %v1235_v12 = vpop.f32.mrf.mxu1 }
 0x27a   : > { %v1240_v59 = vadd.f32 %v1164_v56, %v5509_v57  ;;  %v1242_v21 = vadd.f32 %v1235_v12, %v5512_v16  ;;  %v1570_v56 = vld [vmem:[#allocation9 + $0x130] sm:$0xff]  ;;  %v1565_v57 = vld [vmem:[#allocation9 + $0x108] sm:$0xff]  ;;  %v1560_v12 = vld [vmem:[#allocation9 + $0xe0] sm:$0xff] }
 0x27b   : > { %v1166_v60 = vpop.f32.mrf.mxu0  ;;  %v1237_v5 = vpop.f32.mrf.mxu1  ;;  %v1558_v16 = vld [vmem:[#allocation9 + $0xd0] sm:$0xff] }
 0x27c   : > { %v3312_v61 = vmul.f32 -1.442695, %v1240_v59  ;;  %v1241_v7 = vadd.f32 %v1166_v60, %v5510_v17  ;;  %v1243_v1 = vadd.f32 %v1237_v5, %v5511_v20  ;;  %v1567_v59 = vld [vmem:[#allocation9 + $0x118] sm:$0xff]  ;;  %v1564_v60 = vld [vmem:[#allocation9 + $0x100] sm:$0xff]  ;;  %v1561_v17 = vld [vmem:[#allocation9 + $0xe8] sm:$0xff] }
 0x27d   : > { %v1557_v5 = vld [vmem:[#allocation9 + $0xc8] sm:$0xff]  ;;  %v1559_v20 = vld [vmem:[#allocation9 + $0xd8] sm:$0xff] }
 0x27e   : > { %3502 = vpow2.f32 %v3312_v61  ;;  %v3313_v58 = vmul.f32 -1.442695, %v1241_v7  ;;  %v3314_v9 = vmul.f32 -1.442695, %v1243_v1  ;;  %v1566_v61 = vld [vmem:[#allocation9 + $0x110] sm:$0xff]  ;;  %v1563_v7 = vld [vmem:[#allocation9 + $0xf8] sm:$0xff] }
 0x27f   : > { %v1556_v1 = vld [vmem:[#allocation9 + $0xc0] sm:$0xff] }
 0x280   : > { %3504 = vpow2.f32 %v3313_v58  ;;  %v1562_v58 = vld [vmem:[#allocation9 + $0xf0] sm:$0xff] }
 0x281   : > { %3506 = vtanh.f32 %v1242_v21  ;;  %v1553_v21 = vld [vmem:[#allocation9 + $0xa8] sm:$0xff] }
 0x282   : > { %3508 = vpow2.f32 %v3314_v9  ;;  %v1555_v9 = vld [vmem:[#allocation9 + $0xb8] sm:$0xff] }
 0x28b   : > { %v3503_v19 = vpop.eup %3502 }
 0x28c   : > { %v1247_v4 = vadd.f32 1.0, %v3503_v19  ;;  %v1552_v19 = vld [vmem:[#allocation9 + $0xa0] sm:$0xff] }
 0x28d   : > { %v3505_v14 = vpop.eup %3504 }
 0x28e   : > { %3510 = vrcp.f32 %v1247_v4  ;;  %v1253_v15 = vadd.f32 1.0, %v3505_v14  ;;  %v3507_v0 = vpop.eup %3506  ;;  %v1554_v4 = vld [vmem:[#allocation9 + $0xb0] sm:$0xff]  ;;  %v1549_v14 = vld [vmem:[#allocation9 + $0x88] sm:$0xff] }
 0x28f   : > { %v3509_v63 = vpop.eup %3508 }
 0x290   : > { %3512 = vrcp.f32 %v1253_v15  ;;  %v1260_v8 = vadd.f32 1.0, %v3509_v63  ;;  %v1551_v15 = vld [vmem:[#allocation9 + $0x98] sm:$0xff]  ;;  %v1550_v63 = vld [vmem:[#allocation9 + $0x90] sm:$0xff] }
 0x292   : > { %3514 = vrcp.f32 %v1260_v8  ;;  %v1541_v8 = vld [vmem:[#allocation9 + $0x48] sm:$0xff] }
 0x29b   : > { %v3511_v18 = vpop.eup %3510 }
 0x29c   : > { %v1264_v3 = vmul.f32 %v3511_v18, %v3507_v0  ;;  %v1548_v0 = vld [vmem:[#allocation9 + $0x80] sm:$0xff]  ;;  %v1545_v18 = vld [vmem:[#allocation9 + $0x68] sm:$0xff] }
 0x29d   : > { %v3513_v10 = vpop.eup %3512 }
 0x29e   : > { %v1263_v2 = vmul.f32 %v3513_v10, %v1027_v22  ;;  %v1544_v10 = vld [vmem:[#allocation9 + $0x60] sm:$0xff] }
 0x29f   : > { %v3515_v26 = vpop.eup %3514 }
 0x2a0   : > { %v1265_v24 = vadd.f32 %v1264_v3, %v1263_v2  ;;  %v1547_v3 = vld [vmem:[#allocation9 + $0x78] sm:$0xff] }
 0x2a1   : > { %v1543_v2 = vld [vmem:[#allocation9 + $0x58] sm:$0xff] }
 0x2a2   : > { %3516 = vtanh.f32 %v1265_v24  ;;  %v4630_v25 = vsel %vm1275_vm6, %v1265_v24, %v1027_v22  ;;  %v1546_v22 = vld [vmem:[#allocation9 + $0x70] sm:$0xff]  ;;  %v1540_v24 = vld [vmem:[#allocation9 + $0x40] sm:$0xff] }
 0x2af   : > { %v3517_v27 = vpop.eup %3516 }
 0x2b0   : > { %v1267_v28 = vmul.f32 %v3517_v27, %v3515_v26  ;;  %v1542_v26 = vld [vmem:[#allocation9 + $0x50] sm:$0xff]  ;;  %v1537_v27 = vld [vmem:[#allocation9 + $0x28] sm:$0xff] }
 0x2b2   : > { %v4635_v6 = vsel %vm1275_vm6, %v1267_v28, %v4543_v23  ;;  %v1539_v28 = vld [vmem:[#allocation9 + $0x38] sm:$0xff] }
 0x2b3   : > { %1412 = vmatmul.mubr.f32.vlgmr.msra.gmra.mxu0 %v4635_v6  ;;  %1483 = vmatmul.mubr.f32.vlgmr.msra.gmra.mxu1 %v4635_v6 }
 0x2b4   : > { %1660 = vmatprep.mubr.f32.mxu0 %v5505_v48  ;;  %1731 = vmatprep.mubr.f32.mxu1 %v5505_v48 }
 0x2b5   : > { %1597 = vmatpush1.msra.mxu0 %v1592_v30  ;;  %1668 = vmatpush1.msra.mxu1 %v1594_v31  ;;  %v1533_v30 = vld [vmem:[#allocation9 + $0x8] sm:$0xff]  ;;  %v1535_v31 = vld [vmem:[#allocation9 + $0x18] sm:$0xff] }
 0x2b6   : > { %1598 = vmatprep.subr.mxu0 %v1589_v32  ;;  %1669 = vmatprep.subr.mxu1 %v1591_v33  ;;  %v1532_v32 = vld [vmem:[#allocation9] sm:$0xff]  ;;  %v1534_v33 = vld [vmem:[#allocation9 + $0x10] sm:$0xff] }
 0x2b7   : > { %1599 = vmatpush1.msra.mxu0 %v1588_v34  ;;  %1670 = vmatpush1.msra.mxu1 %v1590_v35  ;;  %v1844_v34 = vld [vmem:[#allocation13 + $0x1e8] sm:$0xff]  ;;  %v1846_v35 = vld [vmem:[#allocation13 + $0x1f8] sm:$0xff] }
 0x2b8   : > { %1600 = vmatprep.subr.mxu0 %v1585_v36  ;;  %1671 = vmatprep.subr.mxu1 %v1587_v37  ;;  %v5514_v37 = vld [vmem:[#allocation57_spill] sm:$0xff] }
 0x2b9   : > { %1601 = vmatpush1.msra.mxu0 %v1584_v38  ;;  %1672 = vmatpush1.msra.mxu1 %v1586_v39 }
 0x2ba   : > { %1602 = vmatprep.subr.mxu0 %v1581_v40  ;;  %1673 = vmatprep.subr.mxu1 %v1583_v41  ;;  %v5515_v41 = vld [vmem:[#allocation59_spill] sm:$0xff] }
 0x2bb   : > { %1603 = vmatpush1.msra.mxu0 %v1580_v42  ;;  %1674 = vmatpush1.msra.mxu1 %v1582_v43 }
 0x2bc   : > { %1604 = vmatprep.subr.mxu0 %v1577_v44  ;;  %1675 = vmatprep.subr.mxu1 %v1579_v45 }
 0x2bd   : > { %1605 = vmatpush1.msra.mxu0 %v1576_v46  ;;  %1676 = vmatpush1.msra.mxu1 %v1578_v47  ;;  %v5516_v46 = vld [vmem:[#allocation62_spill] sm:$0xff] }
 0x2be   : > { %1606 = vmatprep.subr.mxu0 %v1573_v49  ;;  %1677 = vmatprep.subr.mxu1 %v1575_v50  ;;  %v5517_v49 = vld [vmem:[#allocation60_spill] sm:$0xff] }
 0x2bf   : > { %1607 = vmatpush1.msra.mxu0 %v1572_v51  ;;  %1678 = vmatpush1.msra.mxu1 %v1574_v52 }
 0x2c0   : > { %1608 = vmatprep.subr.mxu0 %v1569_v53  ;;  %1679 = vmatprep.subr.mxu1 %v1571_v54 }
 0x2c1   : > { %1609 = vmatpush1.msra.mxu0 %v1568_v55  ;;  %1680 = vmatpush1.msra.mxu1 %v1570_v56 }
 0x2c2   : > { %1610 = vmatprep.subr.mxu0 %v1565_v57  ;;  %1681 = vmatprep.subr.mxu1 %v1567_v59 }
 0x2c3   : > { %1611 = vmatpush1.msra.mxu0 %v1564_v60  ;;  %1682 = vmatpush1.msra.mxu1 %v1566_v61  ;;  %v4645_v60 = vpop.permute.xlu1 %1522 }
 0x2c4   : > { %1612 = vmatprep.subr.mxu0 %v1561_v17  ;;  %1683 = vmatprep.subr.mxu1 %v1563_v7  ;;  %5518 = vst [vmem:[#allocation28_spill] sm:$0xff] %v4645_v60  ;;  %vm1524_vm7 = vcmp.eq.s32.totalorder %v4645_v60, 1  ;;  %v4845_v60 = vld [vmem:[#allocation9 + $0x220] sm:$0xff] }
 0x2c5   : > { %1613 = vmatpush1.msra.mxu0 %v1560_v12  ;;  %1684 = vmatpush1.msra.mxu1 %v1562_v58  ;;  %5536 = vst [vmem:[#allocation46_spill] sm:$0xff] %v4845_v60 }
 0x2c6   : > { %1614 = vmatprep.subr.mxu0 %v1557_v5  ;;  %1685 = vmatprep.subr.mxu1 %v1559_v20 }
 0x2c7   : > { %1615 = vmatpush1.msra.mxu0 %v1556_v1  ;;  %1686 = vmatpush1.msra.mxu1 %v1558_v16 }
 0x2c8   : > { %1616 = vmatprep.subr.mxu0 %v1553_v21  ;;  %1687 = vmatprep.subr.mxu1 %v1555_v9  ;;  %v1843_v21 = vld [vmem:[#allocation13 + $0x1e0] sm:$0xff]  ;;  %v1845_v9 = vld [vmem:[#allocation13 + $0x1f0] sm:$0xff] }
 0x2c9   : > { %1617 = vmatpush1.msra.mxu0 %v1552_v19  ;;  %1688 = vmatpush1.msra.mxu1 %v1554_v4  ;;  %v1840_v4 = vld [vmem:[#allocation13 + $0x1c8] sm:$0xff] }
 0x2ca   : > { %1618 = vmatprep.subr.mxu0 %v1549_v14  ;;  %1689 = vmatprep.subr.mxu1 %v1551_v15  ;;  %v1842_v14 = vld [vmem:[#allocation13 + $0x1d8] sm:$0xff]  ;;  %v1839_v15 = vld [vmem:[#allocation13 + $0x1c0] sm:$0xff] }
 0x2cb   : > { %1619 = vmatpush1.msra.mxu0 %v1548_v0  ;;  %1690 = vmatpush1.msra.mxu1 %v1550_v63  ;;  %v1841_v0 = vld [vmem:[#allocation13 + $0x1d0] sm:$0xff]  ;;  %v1838_v63 = vld [vmem:[#allocation13 + $0x1b8] sm:$0xff] }
 0x2cc   : > { %1620 = vmatprep.subr.mxu0 %v1545_v18  ;;  %1691 = vmatprep.subr.mxu1 %v1547_v3  ;;  %v1835_v18 = vld [vmem:[#allocation13 + $0x1a0] sm:$0xff]  ;;  %v1837_v3 = vld [vmem:[#allocation13 + $0x1b0] sm:$0xff] }
 0x2cd   : > { %1621 = vmatpush1.msra.mxu0 %v1544_v10  ;;  %1692 = vmatpush1.msra.mxu1 %v1546_v22  ;;  %v1832_v10 = vld [vmem:[#allocation13 + $0x188] sm:$0xff]  ;;  %v1834_v22 = vld [vmem:[#allocation13 + $0x198] sm:$0xff] }
 0x2ce   : > { %1622 = vmatprep.subr.mxu0 %v1541_v8  ;;  %1693 = vmatprep.subr.mxu1 %v1543_v2  ;;  %v1831_v8 = vld [vmem:[#allocation13 + $0x180] sm:$0xff]  ;;  %v1833_v2 = vld [vmem:[#allocation13 + $0x190] sm:$0xff] }
 0x2cf   : > { %1623 = vmatpush1.msra.mxu0 %v1540_v24  ;;  %1694 = vmatpush1.msra.mxu1 %v1542_v26  ;;  %v1828_v24 = vld [vmem:[#allocation13 + $0x168] sm:$0xff]  ;;  %v1830_v26 = vld [vmem:[#allocation13 + $0x178] sm:$0xff] }
 0x2d0   : > { %1624 = vmatprep.subr.mxu0 %v1537_v27  ;;  %1695 = vmatprep.subr.mxu1 %v1539_v28  ;;  %v1827_v27 = vld [vmem:[#allocation13 + $0x160] sm:$0xff]  ;;  %v1829_v28 = vld [vmem:[#allocation13 + $0x170] sm:$0xff] }
 0x2d1   : > { %1625 = vmatpush1.msra.mxu0 %v1536_v11  ;;  %1696 = vmatpush1.msra.mxu1 %v1538_v29  ;;  %v1824_v11 = vld [vmem:[#allocation13 + $0x148] sm:$0xff]  ;;  %v1826_v29 = vld [vmem:[#allocation13 + $0x158] sm:$0xff] }
 0x2d2   : > { %1626 = vmatprep.subr.mxu0 %v1533_v30  ;;  %1697 = vmatprep.subr.mxu1 %v1535_v31  ;;  %v1823_v30 = vld [vmem:[#allocation13 + $0x140] sm:$0xff]  ;;  %v1825_v31 = vld [vmem:[#allocation13 + $0x150] sm:$0xff] }
 0x2d3   : > { %1627 = vmatpush1.msra.mxu0 %v1532_v32  ;;  %1698 = vmatpush1.msra.mxu1 %v1534_v33  ;;  %v1820_v32 = vld [vmem:[#allocation13 + $0x128] sm:$0xff]  ;;  %v1822_v33 = vld [vmem:[#allocation13 + $0x138] sm:$0xff] }
 0x2d4   : > { %1870 = vmatprep.subr.mxu0 %v1844_v34  ;;  %1959 = vmatprep.subr.mxu1 %v1846_v35  ;;  %v1819_v34 = vld [vmem:[#allocation13 + $0x120] sm:$0xff]  ;;  %v1821_v35 = vld [vmem:[#allocation13 + $0x130] sm:$0xff] }
 0x373   : > { %v1413_v36 = vpop.f32.mrf.mxu0  ;;  %v1484_v43 = vpop.f32.mrf.mxu1 }
 0x374   : > { %v1489_v38 = vadd.f32 %v1413_v36, %v5514_v37  ;;  %v1491_v50 = vadd.f32 %v1484_v43, %v5517_v49  ;;  %v1816_v36 = vld [vmem:[#allocation13 + $0x108] sm:$0xff]  ;;  %v1818_v37 = vld [vmem:[#allocation13 + $0x118] sm:$0xff]  ;;  %v1813_v43 = vld [vmem:[#allocation13 + $0xf0] sm:$0xff] }
 0x375   : > { %v1415_v39 = vpop.f32.mrf.mxu0  ;;  %v1486_v45 = vpop.f32.mrf.mxu1  ;;  %v1804_v49 = vld [vmem:[#allocation13 + $0xa8] sm:$0xff] }
 0x376   : > { %v3315_v40 = vmul.f32 -1.442695, %v1489_v38  ;;  %v1490_v42 = vadd.f32 %v1415_v39, %v5515_v41  ;;  %v1492_v47 = vadd.f32 %v1486_v45, %v5516_v46  ;;  %v1815_v38 = vld [vmem:[#allocation13 + $0x100] sm:$0xff]  ;;  %v1817_v39 = vld [vmem:[#allocation13 + $0x110] sm:$0xff]  ;;  %v1814_v41 = vld [vmem:[#allocation13 + $0xf8] sm:$0xff] }
 0x377   : > { %v1810_v45 = vld [vmem:[#allocation13 + $0xd8] sm:$0xff]  ;;  %v1807_v46 = vld [vmem:[#allocation13 + $0xc0] sm:$0xff] }
 0x378   : > { %3518 = vpow2.f32 %v3315_v40  ;;  %v3316_v44 = vmul.f32 -1.442695, %v1490_v42  ;;  %v3317_v51 = vmul.f32 -1.442695, %v1492_v47  ;;  %v1812_v40 = vld [vmem:[#allocation13 + $0xe8] sm:$0xff]  ;;  %v1811_v42 = vld [vmem:[#allocation13 + $0xe0] sm:$0xff] }
 0x379   : > { %v1809_v47 = vld [vmem:[#allocation13 + $0xd0] sm:$0xff] }
 0x37a   : > { %3520 = vpow2.f32 %v3316_v44  ;;  %v1808_v44 = vld [vmem:[#allocation13 + $0xc8] sm:$0xff] }
 0x37b   : > { %3522 = vtanh.f32 %v1491_v50  ;;  %v1806_v50 = vld [vmem:[#allocation13 + $0xb8] sm:$0xff] }
 0x37c   : > { %3524 = vpow2.f32 %v3317_v51  ;;  %v1803_v51 = vld [vmem:[#allocation13 + $0xa0] sm:$0xff] }
 0x385   : > { %v3519_v52 = vpop.eup %3518 }
 0x386   : > { %v1496_v53 = vadd.f32 1.0, %v3519_v52  ;;  %v1805_v52 = vld [vmem:[#allocation13 + $0xb0] sm:$0xff] }
 0x387   : > { %v3521_v54 = vpop.eup %3520 }
 0x388   : > { %3526 = vrcp.f32 %v1496_v53  ;;  %v1502_v55 = vadd.f32 1.0, %v3521_v54  ;;  %v3523_v56 = vpop.eup %3522  ;;  %v1800_v53 = vld [vmem:[#allocation13 + $0x88] sm:$0xff]  ;;  %v1802_v54 = vld [vmem:[#allocation13 + $0x98] sm:$0xff] }
 0x389   : > { %v3525_v57 = vpop.eup %3524 }
 0x38a   : > { %3528 = vrcp.f32 %v1502_v55  ;;  %v1509_v7 = vadd.f32 1.0, %v3525_v57  ;;  %v1799_v55 = vld [vmem:[#allocation13 + $0x80] sm:$0xff]  ;;  %v1796_v57 = vld [vmem:[#allocation13 + $0x68] sm:$0xff] }
 0x38c   : > { %3530 = vrcp.f32 %v1509_v7  ;;  %v1792_v7 = vld [vmem:[#allocation13 + $0x48] sm:$0xff] }
 0x395   : > { %v3527_v59 = vpop.eup %3526 }
 0x396   : > { %v1513_v61 = vmul.f32 %v3527_v59, %v3523_v56  ;;  %v1801_v56 = vld [vmem:[#allocation13 + $0x90] sm:$0xff]  ;;  %v1798_v59 = vld [vmem:[#allocation13 + $0x78] sm:$0xff] }
 0x397   : > { %v3529_v17 = vpop.eup %3528 }
 0x398   : > { %v1512_v12 = vmul.f32 %v3529_v17, %v4630_v25  ;;  %v1797_v17 = vld [vmem:[#allocation13 + $0x70] sm:$0xff] }
 0x399   : > { %v3531_v20 = vpop.eup %3530 }
 0x39a   : > { %v1514_v58 = vadd.f32 %v1513_v61, %v1512_v12  ;;  %v1795_v61 = vld [vmem:[#allocation13 + $0x60] sm:$0xff]  ;;  %v1794_v12 = vld [vmem:[#allocation13 + $0x58] sm:$0xff] }
 0x39c   : > { %3532 = vtanh.f32 %v1514_v58  ;;  %v4652_v5 = vsel %vm1524_vm7, %v1514_v58, %v4630_v25  ;;  %v1836_v25 = vld [vmem:[#allocation13 + $0x1a8] sm:$0xff]  ;;  %v1791_v58 = vld [vmem:[#allocation13 + $0x40] sm:$0xff] }
 0x3a9   : > { %v3533_v1 = vpop.eup %3532 }
 0x3aa   : > { %v1516_v16 = vmul.f32 %v3533_v1, %v3531_v20  ;;  %v1793_v20 = vld [vmem:[#allocation13 + $0x50] sm:$0xff]  ;;  %v1788_v1 = vld [vmem:[#allocation13 + $0x28] sm:$0xff] }
 0x3ac   : > { %v4657_v19 = vsel %vm1524_vm7, %v1516_v16, %v4635_v6  ;;  %v1790_v16 = vld [vmem:[#allocation13 + $0x38] sm:$0xff] }
 0x3ad   : > { %1661 = vmatmul.mubr.f32.vlgmr.msra.gmra.mxu0 %v4657_v19  ;;  %1732 = vmatmul.mubr.f32.vlgmr.msra.gmra.mxu1 %v4657_v19 }
 0x3ae   : > { %1871 = vmatpush1.msra.mxu0 %v1843_v21  ;;  %1960 = vmatpush1.msra.mxu1 %v1845_v9  ;;  %v1787_v21 = vld [vmem:[#allocation13 + $0x20] sm:$0xff]  ;;  %v1789_v9 = vld [vmem:[#allocation13 + $0x30] sm:$0xff] }
 0x3af   : > { %1872 = vmatprep.subr.mxu0 %v1840_v4  ;;  %1961 = vmatprep.subr.mxu1 %v1842_v14  ;;  %v1784_v4 = vld [vmem:[#allocation13 + $0x8] sm:$0xff]  ;;  %v1786_v14 = vld [vmem:[#allocation13 + $0x18] sm:$0xff] }
 0x3b0   : > { %1873 = vmatpush1.msra.mxu0 %v1839_v15  ;;  %1962 = vmatpush1.msra.mxu1 %v1841_v0  ;;  %v1783_v15 = vld [vmem:[#allocation13] sm:$0xff]  ;;  %v1785_v0 = vld [vmem:[#allocation13 + $0x10] sm:$0xff] }
 0x3b1   : > { %1874 = vmatprep.subr.mxu0 %v1836_v25  ;;  %1963 = vmatprep.subr.mxu1 %v1838_v63  ;;  %v4677_v25 = vld [vmem:[#allocation9 + $0x3f8] sm:$0xff]  ;;  %v4683_v63 = vld [vmem:[#allocation9 + $0x3f0] sm:$0xff] }
 0x3b2   : > { %1875 = vmatpush1.msra.mxu0 %v1835_v18  ;;  %1964 = vmatpush1.msra.mxu1 %v1837_v3  ;;  %5520 = vst [vmem:[#allocation30_spill] sm:$0xff] %v4677_v25  ;;  %v4687_v18 = vld [vmem:[#allocation9 + $0x3c8] sm:$0xff]  ;;  %v4689_v3 = vld [vmem:[#allocation9 + $0x3d8] sm:$0xff] }
 0x3b3   : > { %1876 = vmatprep.subr.mxu0 %v1832_v10  ;;  %1965 = vmatprep.subr.mxu1 %v1834_v22  ;;  %v4693_v10 = vld [vmem:[#allocation9 + $0x3c0] sm:$0xff]  ;;  %v4695_v22 = vld [vmem:[#allocation9 + $0x3d0] sm:$0xff] }
 0x3b4   : > { %1877 = vmatpush1.msra.mxu0 %v1831_v8  ;;  %1966 = vmatpush1.msra.mxu1 %v1833_v2  ;;  %v4699_v8 = vld [vmem:[#allocation9 + $0x3a8] sm:$0xff]  ;;  %v4701_v2 = vld [vmem:[#allocation9 + $0x3b8] sm:$0xff] }
 0x3b5   : > { %1878 = vmatprep.subr.mxu0 %v1828_v24  ;;  %1967 = vmatprep.subr.mxu1 %v1830_v26  ;;  %v4705_v24 = vld [vmem:[#allocation9 + $0x3a0] sm:$0xff]  ;;  %v4707_v26 = vld [vmem:[#allocation9 + $0x3b0] sm:$0xff] }
 0x3b6   : > { %1879 = vmatpush1.msra.mxu0 %v1827_v27  ;;  %1968 = vmatpush1.msra.mxu1 %v1829_v28  ;;  %v4711_v27 = vld [vmem:[#allocation9 + $0x388] sm:$0xff]  ;;  %v4713_v28 = vld [vmem:[#allocation9 + $0x398] sm:$0xff] }
 0x3b7   : > { %1880 = vmatprep.subr.mxu0 %v1824_v11  ;;  %1969 = vmatprep.subr.mxu1 %v1826_v29  ;;  %v4717_v11 = vld [vmem:[#allocation9 + $0x380] sm:$0xff]  ;;  %v4719_v29 = vld [vmem:[#allocation9 + $0x390] sm:$0xff] }
 0x3b8   : > { %1881 = vmatpush1.msra.mxu0 %v1823_v30  ;;  %1970 = vmatpush1.msra.mxu1 %v1825_v31  ;;  %v4723_v30 = vld [vmem:[#allocation9 + $0x368] sm:$0xff]  ;;  %v4725_v31 = vld [vmem:[#allocation9 + $0x378] sm:$0xff] }
 0x3b9   : > { %1882 = vmatprep.subr.mxu0 %v1820_v32  ;;  %1971 = vmatprep.subr.mxu1 %v1822_v33  ;;  %v4729_v32 = vld [vmem:[#allocation9 + $0x360] sm:$0xff]  ;;  %v4731_v33 = vld [vmem:[#allocation9 + $0x370] sm:$0xff] }
 0x3ba   : > { %1883 = vmatpush1.msra.mxu0 %v1819_v34  ;;  %1972 = vmatpush1.msra.mxu1 %v1821_v35  ;;  %v4735_v34 = vld [vmem:[#allocation9 + $0x348] sm:$0xff]  ;;  %v4737_v35 = vld [vmem:[#allocation9 + $0x358] sm:$0xff] }
 0x3bb   : > { %1884 = vmatprep.subr.mxu0 %v1816_v36  ;;  %1973 = vmatprep.subr.mxu1 %v1818_v37  ;;  %v4741_v36 = vld [vmem:[#allocation9 + $0x340] sm:$0xff]  ;;  %v4743_v37 = vld [vmem:[#allocation9 + $0x350] sm:$0xff] }
 0x3bc   : > { %1885 = vmatpush1.msra.mxu0 %v1815_v38  ;;  %1974 = vmatpush1.msra.mxu1 %v1817_v39  ;;  %v4747_v38 = vld [vmem:[#allocation9 + $0x328] sm:$0xff]  ;;  %v4749_v39 = vld [vmem:[#allocation9 + $0x338] sm:$0xff] }
 0x3bd   : > { %1886 = vmatprep.subr.mxu0 %v1812_v40  ;;  %1975 = vmatprep.subr.mxu1 %v1814_v41  ;;  %v4753_v40 = vld [vmem:[#allocation9 + $0x320] sm:$0xff]  ;;  %v4755_v41 = vld [vmem:[#allocation9 + $0x330] sm:$0xff] }
 0x3be   : > { %1887 = vmatpush1.msra.mxu0 %v1811_v42  ;;  %1976 = vmatpush1.msra.mxu1 %v1813_v43  ;;  %v4757_v42 = vld [vmem:[#allocation9 + $0x308] sm:$0xff]  ;;  %v4761_v43 = vld [vmem:[#allocation9 + $0x318] sm:$0xff] }
 0x3bf   : > { %1888 = vmatprep.subr.mxu0 %v1808_v44  ;;  %1977 = vmatprep.subr.mxu1 %v1810_v45  ;;  %v4763_v44 = vld [vmem:[#allocation9 + $0x300] sm:$0xff]  ;;  %v4765_v45 = vld [vmem:[#allocation9 + $0x310] sm:$0xff] }
 0x3c0   : > { %1889 = vmatpush1.msra.mxu0 %v1807_v46  ;;  %1978 = vmatpush1.msra.mxu1 %v1809_v47  ;;  %v4769_v46 = vld [vmem:[#allocation9 + $0x2e8] sm:$0xff]  ;;  %v4771_v47 = vld [vmem:[#allocation9 + $0x2f8] sm:$0xff] }
 0x3c1   : > { %1890 = vmatprep.subr.mxu0 %v1804_v49  ;;  %1979 = vmatprep.subr.mxu1 %v1806_v50  ;;  %v4773_v49 = vld [vmem:[#allocation9 + $0x2e0] sm:$0xff]  ;;  %v4777_v50 = vld [vmem:[#allocation9 + $0x2f0] sm:$0xff] }
 0x3c2   : > { %1891 = vmatpush1.msra.mxu0 %v1803_v51  ;;  %1980 = vmatpush1.msra.mxu1 %v1805_v52  ;;  %v4779_v51 = vld [vmem:[#allocation9 + $0x2c8] sm:$0xff]  ;;  %v4781_v52 = vld [vmem:[#allocation9 + $0x2d8] sm:$0xff] }
 0x3c3   : > { %1892 = vmatprep.subr.mxu0 %v1800_v53  ;;  %1981 = vmatprep.subr.mxu1 %v1802_v54  ;;  %v4785_v53 = vld [vmem:[#allocation9 + $0x2c0] sm:$0xff]  ;;  %v4787_v54 = vld [vmem:[#allocation9 + $0x2d0] sm:$0xff] }
 0x3c4   : > { %1893 = vmatpush1.msra.mxu0 %v1799_v55  ;;  %1982 = vmatpush1.msra.mxu1 %v1801_v56  ;;  %v4791_v55 = vld [vmem:[#allocation9 + $0x2a8] sm:$0xff]  ;;  %v4793_v56 = vld [vmem:[#allocation9 + $0x2b8] sm:$0xff] }
 0x3c5   : > { %1894 = vmatprep.subr.mxu0 %v1796_v57  ;;  %1983 = vmatprep.subr.mxu1 %v1798_v59  ;;  %v4797_v57 = vld [vmem:[#allocation9 + $0x2a0] sm:$0xff]  ;;  %v4799_v59 = vld [vmem:[#allocation9 + $0x2b0] sm:$0xff] }
 0x3c6   : > { %1895 = vmatpush1.msra.mxu0 %v1795_v61  ;;  %1984 = vmatpush1.msra.mxu1 %v1797_v17  ;;  %5521 = vst [vmem:[#allocation31_spill] sm:$0xff] %v4799_v59  ;;  %v4803_v61 = vld [vmem:[#allocation9 + $0x288] sm:$0xff]  ;;  %v4805_v17 = vld [vmem:[#allocation9 + $0x298] sm:$0xff] }
 0x3c7   : > { %1896 = vmatprep.subr.mxu0 %v1792_v7  ;;  %1985 = vmatprep.subr.mxu1 %v1794_v12  ;;  %5522 = vst [vmem:[#allocation32_spill] sm:$0xff] %v4803_v61  ;;  %5523 = vst [vmem:[#allocation33_spill] sm:$0xff] %v4805_v17  ;;  %v4809_v7 = vld [vmem:[#allocation9 + $0x280] sm:$0xff]  ;;  %v4811_v12 = vld [vmem:[#allocation9 + $0x290] sm:$0xff] }
 0x3c8   : > { %1897 = vmatpush1.msra.mxu0 %v1791_v58  ;;  %1986 = vmatpush1.msra.mxu1 %v1793_v20  ;;  %5524 = vst [vmem:[#allocation34_spill] sm:$0xff] %v4809_v7  ;;  %5525 = vst [vmem:[#allocation35_spill] sm:$0xff] %v4811_v12  ;;  %v4815_v58 = vld [vmem:[#allocation9 + $0x268] sm:$0xff]  ;;  %v4817_v20 = vld [vmem:[#allocation9 + $0x278] sm:$0xff] }
 0x3c9   : > { %1898 = vmatprep.subr.mxu0 %v1788_v1  ;;  %1987 = vmatprep.subr.mxu1 %v1790_v16  ;;  %5526 = vst [vmem:[#allocation36_spill] sm:$0xff] %v4815_v58  ;;  %5527 = vst [vmem:[#allocation37_spill] sm:$0xff] %v4817_v20  ;;  %v4821_v1 = vld [vmem:[#allocation9 + $0x260] sm:$0xff]  ;;  %v4823_v16 = vld [vmem:[#allocation9 + $0x270] sm:$0xff] }
 0x3ca   : > { %1899 = vmatpush1.msra.mxu0 %v1787_v21  ;;  %1988 = vmatpush1.msra.mxu1 %v1789_v9  ;;  %5528 = vst [vmem:[#allocation38_spill] sm:$0xff] %v4821_v1  ;;  %5529 = vst [vmem:[#allocation39_spill] sm:$0xff] %v4823_v16  ;;  %v4827_v21 = vld [vmem:[#allocation9 + $0x248] sm:$0xff]  ;;  %v4829_v9 = vld [vmem:[#allocation9 + $0x258] sm:$0xff] }
 0x3cb   : > { %1900 = vmatprep.subr.mxu0 %v1784_v4  ;;  %1989 = vmatprep.subr.mxu1 %v1786_v14  ;;  %5530 = vst [vmem:[#allocation40_spill] sm:$0xff] %v4827_v21  ;;  %5531 = vst [vmem:[#allocation41_spill] sm:$0xff] %v4829_v9  ;;  %v4833_v4 = vld [vmem:[#allocation9 + $0x240] sm:$0xff]  ;;  %v4835_v14 = vld [vmem:[#allocation9 + $0x250] sm:$0xff] }
 0x3cc   : > { %1901 = vmatpush1.msra.mxu0 %v1783_v15  ;;  %1934 = vmatprep.mubr.f32.mxu0 %v5505_v48  ;;  %5532 = vst [vmem:[#allocation42_spill] sm:$0xff] %v4833_v4  ;;  %5533 = vst [vmem:[#allocation43_spill] sm:$0xff] %v4835_v14  ;;  %v4841_v15 = vld [vmem:[#allocation9 + $0x228] sm:$0xff] }
 0x3cd   : > { %1990 = vmatpush1.msra.mxu1 %v1785_v0  ;;  %2023 = vmatprep.mubr.f32.mxu1 %v5505_v48  ;;  %5534 = vst [vmem:[#allocation44_spill] sm:$0xff] %v4841_v15  ;;  %v4843_v0 = vld [vmem:[#allocation9 + $0x238] sm:$0xff] }
 0x3ce   : > { %1935 = vmatmul.mubr.f32.vlgmr.msra.gmra.mxu0 %v4543_v23  ;;  %2024 = vmatmul.mubr.f32.vlgmr.msra.gmra.mxu1 %v4543_v23  ;;  %v4675_v23 = vld [vmem:[#allocation9 + $0x3e8] sm:$0xff]  ;;  %5535 = vst [vmem:[#allocation45_spill] sm:$0xff] %v4843_v0 }
 0x3cf   : > { %1940 = vmatprep.mubr.f32.mxu0 %v5505_v48  ;;  %2029 = vmatprep.mubr.f32.mxu1 %v5505_v48  ;;  %5519 = vst [vmem:[#allocation29_spill] sm:$0xff] %v4675_v23 }
 0x3d0   : > { %2137 = vmatprep.subr.mxu0 %v4675_v23  ;;  %2208 = vmatprep.subr.mxu1 %v4677_v25 }
 0x3d1   : > { %2209 = vmatpush1.msra.mxu1 %v4683_v63 }
 0x3d2   : > { %1941 = vmatmul.mubr.f32.gmra.mxu0 %v4635_v6  ;;  %2030 = vmatmul.mubr.f32.gmra.mxu1 %v4635_v6  ;;  %v4681_v6 = vld [vmem:[#allocation9 + $0x3e0] sm:$0xff] }
 0x3d3   : > { %1946 = vmatprep.mubr.f32.mxu0 %v5505_v48  ;;  %2035 = vmatprep.mubr.f32.mxu1 %v5505_v48 }
 0x3d4   : > { %2138 = vmatpush1.msra.mxu0 %v4681_v6  ;;  %2210 = vmatprep.subr.mxu1 %v4689_v3 }
 0x3d5   : > { %2139 = vmatprep.subr.mxu0 %v4687_v18  ;;  %2211 = vmatpush1.msra.mxu1 %v4695_v22 }
 0x3d6   : > { %1947 = vmatmul.mubr.f32.gmra.mxu0 %v4657_v19  ;;  %2036 = vmatmul.mubr.f32.gmra.mxu1 %v4657_v19 }
 0x3d7   : > { %1952 = vmatprep.mubr.f32.mxu0 %v5505_v48  ;;  %2041 = vmatprep.mubr.f32.mxu1 %v5505_v48 }
 0x3d8   : > { %2140 = vmatpush1.msra.mxu0 %v4693_v10  ;;  %2212 = vmatprep.subr.mxu1 %v4701_v2 }
 0x3d9   : > { %2141 = vmatprep.subr.mxu0 %v4699_v8  ;;  %2213 = vmatpush1.msra.mxu1 %v4707_v26 }
 0x3da   : > { %2142 = vmatpush1.msra.mxu0 %v4705_v24  ;;  %2214 = vmatprep.subr.mxu1 %v4713_v28 }
 0x3db   : > { %2143 = vmatprep.subr.mxu0 %v4711_v27  ;;  %2215 = vmatpush1.msra.mxu1 %v4719_v29 }
 0x3dc   : > { %2144 = vmatpush1.msra.mxu0 %v4717_v11  ;;  %2216 = vmatprep.subr.mxu1 %v4725_v31 }
 0x3dd   : > { %2145 = vmatprep.subr.mxu0 %v4723_v30  ;;  %2217 = vmatpush1.msra.mxu1 %v4731_v33 }
 0x3de   : > { %2146 = vmatpush1.msra.mxu0 %v4729_v32  ;;  %2218 = vmatprep.subr.mxu1 %v4737_v35 }
 0x3df   : > { %2147 = vmatprep.subr.mxu0 %v4735_v34  ;;  %2219 = vmatpush1.msra.mxu1 %v4743_v37 }
 0x3e0   : > { %2148 = vmatpush1.msra.mxu0 %v4741_v36  ;;  %2220 = vmatprep.subr.mxu1 %v4749_v39 }
 0x3e1   : > { %2149 = vmatprep.subr.mxu0 %v4747_v38  ;;  %2221 = vmatpush1.msra.mxu1 %v4755_v41 }
 0x3e2   : > { %2150 = vmatpush1.msra.mxu0 %v4753_v40  ;;  %2222 = vmatprep.subr.mxu1 %v4761_v43 }
 0x3e3   : > { %2151 = vmatprep.subr.mxu0 %v4757_v42  ;;  %2223 = vmatpush1.msra.mxu1 %v4765_v45 }
 0x3e4   : > { %2152 = vmatpush1.msra.mxu0 %v4763_v44  ;;  %2224 = vmatprep.subr.mxu1 %v4771_v47 }
 0x3e5   : > { %2153 = vmatprep.subr.mxu0 %v4769_v46  ;;  %2225 = vmatpush1.msra.mxu1 %v4777_v50 }
 0x3e6   : > { %2154 = vmatpush1.msra.mxu0 %v4773_v49  ;;  %2226 = vmatprep.subr.mxu1 %v4781_v52 }
 0x3e7   : > { %2155 = vmatprep.subr.mxu0 %v4779_v51  ;;  %2227 = vmatpush1.msra.mxu1 %v4787_v54 }
 0x3e8   : > { %2156 = vmatpush1.msra.mxu0 %v4785_v53  ;;  %2228 = vmatprep.subr.mxu1 %v4793_v56 }
 0x3e9   : > { %2157 = vmatprep.subr.mxu0 %v4791_v55  ;;  %2229 = vmatpush1.msra.mxu1 %v4799_v59 }
 0x3ea   : > { %2158 = vmatpush1.msra.mxu0 %v4797_v57  ;;  %2230 = vmatprep.subr.mxu1 %v4805_v17 }
 0x3eb   : > { %2159 = vmatprep.subr.mxu0 %v4803_v61  ;;  %2231 = vmatpush1.msra.mxu1 %v4811_v12  ;;  %v5545_v12 = vld [vmem:[#allocation64_spill] sm:$0xff] }
 0x3ec   : > { %2160 = vmatpush1.msra.mxu0 %v4809_v7  ;;  %2232 = vmatprep.subr.mxu1 %v4817_v20 }
 0x3ed   : > { %2161 = vmatprep.subr.mxu0 %v4815_v58  ;;  %2233 = vmatpush1.msra.mxu1 %v4823_v16  ;;  %v5544_v58 = vld [vmem:[#allocation65_spill] sm:$0xff] }
 0x3ee   : > { %2162 = vmatpush1.msra.mxu0 %v4821_v1  ;;  %2234 = vmatprep.subr.mxu1 %v4829_v9  ;;  %v4853_v1 = vld [vmem:[#allocation9 + $0x218] sm:$0xff]  ;;  %v4857_v9 = vld [vmem:[#allocation9 + $0x200] sm:$0xff] }
 0x3ef   : > { %2163 = vmatprep.subr.mxu0 %v4827_v21  ;;  %2235 = vmatpush1.msra.mxu1 %v4835_v14  ;;  %5539 = vst [vmem:[#allocation50_spill] sm:$0xff] %v4853_v1  ;;  %5540 = vst [vmem:[#allocation51_spill] sm:$0xff] %v4857_v9  ;;  %v4859_v21 = vld [vmem:[#allocation9 + $0x210] sm:$0xff] }
 0x3f0   : > { %2164 = vmatpush1.msra.mxu0 %v4833_v4  ;;  %2236 = vmatprep.subr.mxu1 %v4843_v0  ;;  %5541 = vst [vmem:[#allocation52_spill] sm:$0xff] %v4859_v21 }
 0x3f1   : > { %2165 = vmatprep.subr.mxu0 %v4841_v15  ;;  %2237 = vmatpush1.msra.mxu1 %v4849_v62  ;;  %v5542_v15 = vld [vmem:[#allocation61_spill] sm:$0xff] }
 0x3f2   : > { %2166 = vmatpush1.msra.mxu0 %v4845_v60  ;;  %2238 = vmatprep.subr.mxu1 %v4853_v1  ;;  %v5543_v60 = vld [vmem:[#allocation63_spill] sm:$0xff] }
 0x3f3   : > { %2167 = vmatprep.subr.mxu0 %v4851_v13  ;;  %2239 = vmatpush1.msra.mxu1 %v4859_v21 }
 0x3f4   : > { %2168 = vmatpush1.msra.mxu0 %v4857_v9  ;;  %2450 = vmatprep.subr.mxu1 %v4677_v25 }
 0x3f5   : > { %2379 = vmatprep.subr.mxu0 %v4675_v23 }
 0x46d   : > { %v1662_v0 = vpop.f32.mrf.mxu0  ;;  %v1733_v62 = vpop.f32.mrf.mxu1 }
 0x46e   : > { %v1738_v14 = vadd.f32 %v1662_v0, %v5542_v15  ;;  %v1740_v21 = vadd.f32 %v1733_v62, %v5545_v12  ;;  %v4873_v0 = vpop.permute.xlu1 %1771 }
 0x46f   : > { %v1664_v4 = vpop.f32.mrf.mxu0  ;;  %v1735_v1 = vpop.f32.mrf.mxu1  ;;  %5546 = vst [vmem:[#allocation48_spill] sm:$0xff] %v4873_v0  ;;  %vm1773_vm8 = vcmp.eq.s32.totalorder %v4873_v0, 1  ;;  %v5565_v0 = vld [vmem:[#allocation52_spill] sm:$0xff] }
 0x470   : > { %v3318_v16 = vmul.f32 -1.442695, %v1738_v14  ;;  %v1739_v20 = vadd.f32 %v1664_v4, %v5543_v60  ;;  %v1741_v9 = vadd.f32 %v1735_v1, %v5544_v58  ;;  %v4885_v1 = vld [vmem:[#allocation16 + $0x8] sm:$0xff] }
 0x472   : > { %3534 = vpow2.f32 %v3318_v16  ;;  %v3319_v13 = vmul.f32 -1.442695, %v1739_v20  ;;  %v3320_v7 = vmul.f32 -1.442695, %v1741_v9  ;;  %v5550_v9 = vld [vmem:[#allocation36_spill] sm:$0xff] }
 0x474   : > { %3536 = vpow2.f32 %v3319_v13 }
 0x475   : > { %3538 = vtanh.f32 %v1740_v21  ;;  %v5549_v21 = vld [vmem:[#allocation35_spill] sm:$0xff] }
 0x476   : > { %3540 = vpow2.f32 %v3320_v7 }
 0x47f   : > { %v3535_v23 = vpop.eup %3534 }
 0x480   : > { %v1745_v17 = vadd.f32 1.0, %v3535_v23 }
 0x481   : > { %v3537_v25 = vpop.eup %3536 }
 0x482   : > { %3542 = vrcp.f32 %v1745_v17  ;;  %v1751_v15 = vadd.f32 1.0, %v3537_v25  ;;  %v3539_v14 = vpop.eup %3538 }
 0x483   : > { %v3541_v60 = vpop.eup %3540 }
 0x484   : > { %3544 = vrcp.f32 %v1751_v15  ;;  %v1758_v13 = vadd.f32 1.0, %v3541_v60  ;;  %v5551_v15 = vld [vmem:[#allocation37_spill] sm:$0xff]  ;;  %v5553_v60 = vld [vmem:[#allocation39_spill] sm:$0xff] }
 0x486   : > { %3546 = vrcp.f32 %v1758_v13  ;;  %v5557_v13 = vld [vmem:[#allocation43_spill] sm:$0xff] }
 0x48f   : > { %v3543_v16 = vpop.eup %3542 }
 0x490   : > { %v1762_v4 = vmul.f32 %v3543_v16, %v3539_v14  ;;  %v5552_v14 = vld [vmem:[#allocation38_spill] sm:$0xff]  ;;  %v5554_v16 = vld [vmem:[#allocation40_spill] sm:$0xff] }
 0x491   : > { %v3545_v20 = vpop.eup %3544 }
 0x492   : > { %v1761_v58 = vmul.f32 %v3545_v20, %v4652_v5  ;;  %v5556_v20 = vld [vmem:[#allocation42_spill] sm:$0xff] }
 0x493   : > { %v3547_v25 = vpop.eup %3546 }
 0x494   : > { %v1763_v62 = vadd.f32 %v1762_v4, %v1761_v58  ;;  %v5555_v4 = vld [vmem:[#allocation41_spill] sm:$0xff]  ;;  %v5558_v58 = vld [vmem:[#allocation44_spill] sm:$0xff] }
 0x496   : > { %3548 = vtanh.f32 %v1763_v62  ;;  %v1774_v23 = vsel %vm1773_vm8, %v1763_v62, %v4652_v5  ;;  %v5547_v5 = vld [vmem:[#allocation33_spill] sm:$0xff] }
 0x497   : > { %1778 = vst [vmem:[#allocation18] sm:$0xff] %v1774_v23  ;;  %v5559_v62 = vld [vmem:[#allocation45_spill] sm:$0xff]  ;;  %v5560_v23 = vld [vmem:[#allocation46_spill] sm:$0xff] }
 0x4a3   : > { %v3549_v17 = vpop.eup %3548 }
 0x4a4   : > { %v1765_v7 = vmul.f32 %v3549_v17, %v3547_v25  ;;  %v5561_v25 = vld [vmem:[#allocation47_spill] sm:$0xff]  ;;  %v5562_v17 = vld [vmem:[#allocation49_spill] sm:$0xff] }
 0x4a6   : > { %v1775_v12 = vsel %vm1773_vm8, %v1765_v7, %v4657_v19  ;;  %v5548_v19 = vld [vmem:[#allocation34_spill] sm:$0xff] }
 0x4a7   : > { %1777 = vst [vmem:[#allocation16] sm:$0xff] %v1775_v12  ;;  %1953 = vmatmul.mubr.f32.gmra.mxu0 %v1775_v12  ;;  %2042 = vmatmul.mubr.f32.gmra.mxu1 %v1775_v12  ;;  %v5563_v7 = vld [vmem:[#allocation50_spill] sm:$0xff]  ;;  %v5564_v12 = vld [vmem:[#allocation51_spill] sm:$0xff] }
 0x4a8   : > { %2201 = vmatprep.mubr.f32.mxu0 %v5505_v48  ;;  %2272 = vmatprep.mubr.f32.mxu1 %v5505_v48 }
 0x4ab   : > { %2202 = vmatmul.mubr.f32.vlgmr.msra.gmra.mxu0 %v4885_v1  ;;  %2273 = vmatmul.mubr.f32.vlgmr.msra.gmra.mxu1 %v4885_v1 }
 0x4ac   : > { %2380 = vmatpush1.msra.mxu0 %v4681_v6  ;;  %2451 = vmatpush1.msra.mxu1 %v4683_v63 }
 0x4ad   : > { %2381 = vmatprep.subr.mxu0 %v4687_v18  ;;  %2452 = vmatprep.subr.mxu1 %v4689_v3 }
 0x4ae   : > { %2382 = vmatpush1.msra.mxu0 %v4693_v10  ;;  %2453 = vmatpush1.msra.mxu1 %v4695_v22 }
 0x4af   : > { %2383 = vmatprep.subr.mxu0 %v4699_v8  ;;  %2454 = vmatprep.subr.mxu1 %v4701_v2 }
 0x4b0   : > { %2384 = vmatpush1.msra.mxu0 %v4705_v24  ;;  %2455 = vmatpush1.msra.mxu1 %v4707_v26 }
 0x4b1   : > { %2385 = vmatprep.subr.mxu0 %v4711_v27  ;;  %2456 = vmatprep.subr.mxu1 %v4713_v28 }
 0x4b2   : > { %2386 = vmatpush1.msra.mxu0 %v4717_v11  ;;  %2457 = vmatpush1.msra.mxu1 %v4719_v29 }
 0x4b3   : > { %2387 = vmatprep.subr.mxu0 %v4723_v30  ;;  %2458 = vmatprep.subr.mxu1 %v4725_v31 }
 0x4b4   : > { %2388 = vmatpush1.msra.mxu0 %v4729_v32  ;;  %2459 = vmatpush1.msra.mxu1 %v4731_v33 }
 0x4b5   : > { %2389 = vmatprep.subr.mxu0 %v4735_v34  ;;  %2460 = vmatprep.subr.mxu1 %v4737_v35 }
 0x4b6   : > { %2390 = vmatpush1.msra.mxu0 %v4741_v36  ;;  %2461 = vmatpush1.msra.mxu1 %v4743_v37 }
 0x4b7   : > { %2391 = vmatprep.subr.mxu0 %v4747_v38  ;;  %2462 = vmatprep.subr.mxu1 %v4749_v39 }
 0x4b8   : > { %2392 = vmatpush1.msra.mxu0 %v4753_v40  ;;  %2463 = vmatpush1.msra.mxu1 %v4755_v41 }
 0x4b9   : > { %2393 = vmatprep.subr.mxu0 %v4757_v42  ;;  %2464 = vmatprep.subr.mxu1 %v4761_v43 }
 0x4ba   : > { %2394 = vmatpush1.msra.mxu0 %v4763_v44  ;;  %2465 = vmatpush1.msra.mxu1 %v4765_v45 }
 0x4bb   : > { %2395 = vmatprep.subr.mxu0 %v4769_v46  ;;  %2466 = vmatprep.subr.mxu1 %v4771_v47 }
 0x4bc   : > { %2396 = vmatpush1.msra.mxu0 %v4773_v49  ;;  %2467 = vmatpush1.msra.mxu1 %v4777_v50 }
 0x4bd   : > { %2397 = vmatprep.subr.mxu0 %v4779_v51  ;;  %2468 = vmatprep.subr.mxu1 %v4781_v52 }
 0x4be   : > { %2398 = vmatpush1.msra.mxu0 %v4785_v53  ;;  %2469 = vmatpush1.msra.mxu1 %v4787_v54 }
 0x4bf   : > { %2399 = vmatprep.subr.mxu0 %v4791_v55  ;;  %2470 = vmatprep.subr.mxu1 %v4793_v56 }
 0x4c0   : > { %2400 = vmatpush1.msra.mxu0 %v4797_v57  ;;  %2471 = vmatpush1.msra.mxu1 %v4799_v59 }
 0x4c1   : > { %2401 = vmatprep.subr.mxu0 %v4803_v61  ;;  %2472 = vmatprep.subr.mxu1 %v5547_v5 }
 0x4c2   : > { %2402 = vmatpush1.msra.mxu0 %v5548_v19  ;;  %2473 = vmatpush1.msra.mxu1 %v5549_v21 }
 0x4c3   : > { %2403 = vmatprep.subr.mxu0 %v5550_v9  ;;  %2474 = vmatprep.subr.mxu1 %v5551_v15 }
 0x4c4   : > { %2404 = vmatpush1.msra.mxu0 %v5552_v14  ;;  %2475 = vmatpush1.msra.mxu1 %v5553_v60 }
 0x4c5   : > { %2405 = vmatprep.subr.mxu0 %v5554_v16  ;;  %2476 = vmatprep.subr.mxu1 %v5555_v4 }
 0x4c6   : > { %2406 = vmatpush1.msra.mxu0 %v5556_v20  ;;  %2477 = vmatpush1.msra.mxu1 %v5557_v13  ;;  %v5566_v13 = vld [vmem:[#allocation29_spill] sm:$0xff] }
 0x4c7   : > { %2407 = vmatprep.subr.mxu0 %v5558_v58  ;;  %2478 = vmatprep.subr.mxu1 %v5559_v62  ;;  %v5567_v58 = vld [vmem:[#allocation30_spill] sm:$0xff]  ;;  %v1936_v62 = vpop.f32.mrf.mxu0 }
 0x4c8   : > { %2408 = vmatpush1.msra.mxu0 %v5560_v23  ;;  %2479 = vmatpush1.msra.mxu1 %v5561_v25  ;;  %v2025_v23 = vpop.f32.mrf.mxu1 }
 0x4c9   : > { %2409 = vmatprep.subr.mxu0 %v5562_v17  ;;  %2480 = vmatprep.subr.mxu1 %v5563_v7  ;;  %v1938_v20 = vpop.f32.mrf.mxu0 }
 0x4ca   : > { %2410 = vmatpush1.msra.mxu0 %v5564_v12  ;;  %2443 = vmatprep.mubr.f32.mxu0 %v5505_v48  ;;  %v2027_v25 = vpop.f32.mrf.mxu1 }
 0x4cb   : > { %2481 = vmatpush1.msra.mxu1 %v5565_v0  ;;  %2514 = vmatprep.mubr.f32.mxu1 %v5505_v48  ;;  %v4955_v4 = vpop.f32.mrf.mxu0  ;;  %v1848_v48 = vld [vmem:[#allocation10 + $0x4] sm:$0xf] }
 0x4cc   : > { %2622 = vmatprep.subr.mxu0 %v5566_v13  ;;  %2693 = vmatprep.subr.mxu1 %v5567_v58  ;;  %5568 = vst [vmem:[#allocation54_spill] sm:$0xff] %v4955_v4  ;;  %v4957_v17 = vpop.f32.mrf.mxu1  ;;  %v5575_v58 = vld [vmem:[#allocation53_spill] sm:$0xff] }
 0x4cd   : > { %5569 = vst [vmem:[#allocation55_spill] sm:$0xff] %v4957_v17  ;;  %v4959_v7 = vpop.f32.mrf.mxu0  ;;  %v5576_v60 = vsub.s32 0, %v5575_v58  ;;  %v5580_v17 = vsub.s32 1, %v5575_v58 }
 0x4ce   : > { %5570 = vst [vmem:[#allocation58_spill] sm:$0xff] %v4959_v7  ;;  %v4961_v12 = vpop.f32.mrf.mxu1 }
 0x4cf   : > { %5571 = vst [vmem:[#allocation56_spill] sm:$0xff] %v4961_v12  ;;  %v4963_v16 = vpop.f32.mrf.mxu0  ;;  %v4971_v14 = vrot.slane %v1848_v48, %v5576_v60  ;;  %v4979_v7 = vrot.slane %v1848_v48, %v5580_v17  ;;  %v5584_v17 = vsub.s32 3, %v5575_v58 }
 0x4d0   : > { %5572 = vst [vmem:[#allocation57_spill] sm:$0xff] %v4963_v16  ;;  %v4965_v0 = vpop.f32.mrf.mxu1 }
 0x4d1   : > { %5573 = vst [vmem:[#allocation59_spill] sm:$0xff] %v4965_v0  ;;  %v4967_v13 = vpop.f32.mrf.mxu0  ;;  %5577 = vst [vmem:[#allocation60_spill] sm:$0xff] %v4971_v14  ;;  %v1937_v0 = vadd.f32 %v1936_v62, %v4971_v14  ;;  %v4991_v59 = vrot.slane %v1848_v48, %v5584_v17  ;;  %v4999_v17 = vld [vmem:[#allocation18 + $0x8] sm:$0xff] }
 0x4d2   : > { %5574 = vst [vmem:[#allocation62_spill] sm:$0xff] %v4967_v13  ;;  %v4973_v15 = vpop.f32.mrf.mxu1  ;;  %v1939_v13 = vadd.f32 %v1938_v20, %v4979_v7 }
 0x4d3   : > { %5578 = vst [vmem:[#allocation61_spill] sm:$0xff] %v4973_v15  ;;  %v2028_v62 = vadd.f32 %v2027_v25, %v4991_v59 }
 0x567   : > { %v4975_v4 = vpop.f32.mrf.mxu0  ;;  %v4981_v12 = vpop.f32.mrf.mxu1 }
 0x568   : > { %5579 = vst [vmem:[#allocation63_spill] sm:$0xff] %v4975_v4  ;;  %5581 = vst [vmem:[#allocation65_spill] sm:$0xff] %v4981_v12 }
 0x569   : > { %v4983_v16 = vpop.f32.mrf.mxu0  ;;  %v4987_v21 = vpop.f32.mrf.mxu1 }
 0x56a   : > { %5582 = vst [vmem:[#allocation64_spill] sm:$0xff] %v4983_v16  ;;  %5583 = vst [vmem:[#allocation29_spill] sm:$0xff] %v4987_v21  ;;  %v5585_v16 = vsub.s32 2, %v5575_v58 }
 0x56b   : > { %v2203_v9 = vpop.f32.mrf.mxu0  ;;  %v2274_v4 = vpop.f32.mrf.mxu1 }
 0x56c   : > { %v2279_v60 = vadd.f32 %v2203_v9, %v1937_v0  ;;  %v4996_v20 = vrot.slane %v1848_v48, %v5585_v16 }
 0x56d   : > { %v2205_v19 = vpop.f32.mrf.mxu0  ;;  %v2276_v12 = vpop.f32.mrf.mxu1 }
 0x56e   : > { %v3321_v15 = vmul.f32 -1.442695, %v2279_v60  ;;  %v2280_v5 = vadd.f32 %v2205_v19, %v1939_v13  ;;  %v2282_v21 = vadd.f32 %v2276_v12, %v2028_v62  ;;  %v2026_v0 = vadd.f32 %v2025_v23, %v4996_v20 }
 0x570   : > { %3550 = vpow2.f32 %v3321_v15  ;;  %v3322_v61 = vmul.f32 -1.442695, %v2280_v5  ;;  %v3323_v9 = vmul.f32 -1.442695, %v2282_v21  ;;  %v2281_v15 = vadd.f32 %v2274_v4, %v2026_v0 }
 0x572   : > { %3552 = vpow2.f32 %v3322_v61 }
 0x573   : > { %3554 = vpow2.f32 %v3323_v9  ;;  %v2864_v9 = vld [vmem:[#allocation9 + $0x3f8] sm:$0xff] }
 0x57d   : > { %v3551_v19 = vpop.eup %3550 }
 0x57e   : > { %v2286_v13 = vadd.f32 1.0, %v3551_v19 }
 0x57f   : > { %v3553_v5 = vpop.eup %3552 }
 0x580   : > { %3556 = vrcp.f32 %v2286_v13  ;;  %v2292_v60 = vadd.f32 1.0, %v3553_v5  ;;  %v3555_v61 = vpop.eup %3554  ;;  %v5596_v13 = vld [vmem:[#allocation40_spill] sm:$0xff]  ;;  %v5597_v5 = vld [vmem:[#allocation41_spill] sm:$0xff] }
 0x581   : > { %3558 = vtanh.f32 %v2281_v15  ;;  %v2299_v12 = vadd.f32 1.0, %v3555_v61  ;;  %v5599_v61 = vld [vmem:[#allocation43_spill] sm:$0xff] }
 0x582   : > { %3560 = vrcp.f32 %v2292_v60  ;;  %v5598_v60 = vld [vmem:[#allocation42_spill] sm:$0xff] }
 0x583   : > { %3562 = vrcp.f32 %v2299_v12  ;;  %v5603_v12 = vld [vmem:[#allocation47_spill] sm:$0xff] }
 0x58d   : > { %v3557_v25 = vpop.eup %3556 }
 0x58e   : > { %v3559_v48 = vpop.eup %3558 }
 0x58f   : > { %v3561_v16 = vpop.eup %3560  ;;  %v2303_v58 = vmul.f32 %v3559_v48, %v3557_v25  ;;  %v5600_v25 = vld [vmem:[#allocation44_spill] sm:$0xff]  ;;  %v5601_v48 = vld [vmem:[#allocation45_spill] sm:$0xff] }
 0x590   : > { %v2302_v21 = vmul.f32 %v3561_v16, %v4999_v17  ;;  %v3563_v4 = vpop.eup %3562  ;;  %v5602_v16 = vld [vmem:[#allocation46_spill] sm:$0xff] }
 0x592   : > { %v5002_v23 = vadd.f32 %v2303_v58, %v2302_v21  ;;  %v5604_v58 = vld [vmem:[#allocation49_spill] sm:$0xff]  ;;  %v5605_v21 = vld [vmem:[#allocation50_spill] sm:$0xff] }
 0x594   : > { %3564 = vtanh.f32 %v5002_v23 }
 0x5a1   : > { %v3565_v62 = vpop.eup %3564 }
 0x5a2   : > { %v2306_v0 = vmul.f32 %v3565_v62, %v3563_v4  ;;  %v5606_v4 = vld [vmem:[#allocation51_spill] sm:$0xff]  ;;  %v5607_v62 = vmov 0.0  }
 0x5a4   : > { %v5008_v19 = vsel %vm1026_vm3, %v2306_v0, %v4885_v1  ;;  %v2309_v15 = vsel %vm1026_vm3, %v2306_v0, 0.0  ;;  %v5595_v1 = vld [vmem:[#allocation39_spill] sm:$0xff]  ;;  %v5608_v0 = vld [vmem:[#allocation52_spill] sm:$0xff] }
 0x5a5   : > { %2310 = vst [vmem:[%s4182_s4] sm:$0xff] %v2309_v15  ;;  %2444 = vmatmul.mubr.f32.vlgmr.msra.gmra.mxu0 %v5008_v19  ;;  %2515 = vmatmul.mubr.f32.vlgmr.msra.gmra.mxu1 %v5008_v19  ;;  %v5609_v15 = vld [vmem:[#allocation54_spill] sm:$0xff] }
 0x5a6   : > { %2623 = vmatpush1.msra.mxu0 %v4681_v6  ;;  %2694 = vmatpush1.msra.mxu1 %v4683_v63  ;;  %v5587_v6 = vld [vmem:[#allocation31_spill] sm:$0xff]  ;;  %v5588_v63 = vld [vmem:[#allocation32_spill] sm:$0xff] }
 0x5a7   : > { %2624 = vmatprep.subr.mxu0 %v4687_v18  ;;  %2695 = vmatprep.subr.mxu1 %v4689_v3  ;;  %v5589_v18 = vld [vmem:[#allocation33_spill] sm:$0xff]  ;;  %v5590_v3 = vld [vmem:[#allocation34_spill] sm:$0xff] }
 0x5a8   : > { %2625 = vmatpush1.msra.mxu0 %v4693_v10  ;;  %2696 = vmatpush1.msra.mxu1 %v4695_v22  ;;  %v5591_v10 = vld [vmem:[#allocation35_spill] sm:$0xff]  ;;  %v5592_v22 = vld [vmem:[#allocation36_spill] sm:$0xff] }
 0x5a9   : > { %2626 = vmatprep.subr.mxu0 %v4699_v8  ;;  %2697 = vmatprep.subr.mxu1 %v4701_v2  ;;  %v5593_v8 = vld [vmem:[#allocation37_spill] sm:$0xff]  ;;  %v5594_v2 = vld [vmem:[#allocation38_spill] sm:$0xff] }
 0x5aa   : > { %2627 = vmatpush1.msra.mxu0 %v4705_v24  ;;  %2698 = vmatpush1.msra.mxu1 %v4707_v26 }
 0x5ab   : > { %2628 = vmatprep.subr.mxu0 %v4711_v27  ;;  %2699 = vmatprep.subr.mxu1 %v4713_v28 }
 0x5ac   : > { %2629 = vmatpush1.msra.mxu0 %v4717_v11  ;;  %2700 = vmatpush1.msra.mxu1 %v4719_v29 }
 0x5ad   : > { %2630 = vmatprep.subr.mxu0 %v4723_v30  ;;  %2701 = vmatprep.subr.mxu1 %v4725_v31 }
 0x5ae   : > { %2631 = vmatpush1.msra.mxu0 %v4729_v32  ;;  %2702 = vmatpush1.msra.mxu1 %v4731_v33 }
 0x5af   : > { %2632 = vmatprep.subr.mxu0 %v4735_v34  ;;  %2703 = vmatprep.subr.mxu1 %v4737_v35 }
 0x5b0   : > { %2633 = vmatpush1.msra.mxu0 %v4741_v36  ;;  %2704 = vmatpush1.msra.mxu1 %v4743_v37 }
 0x5b1   : > { %2634 = vmatprep.subr.mxu0 %v4747_v38  ;;  %2705 = vmatprep.subr.mxu1 %v4749_v39 }
 0x5b2   : > { %2635 = vmatpush1.msra.mxu0 %v4753_v40  ;;  %2706 = vmatpush1.msra.mxu1 %v4755_v41 }
 0x5b3   : > { %2636 = vmatprep.subr.mxu0 %v4757_v42  ;;  %2707 = vmatprep.subr.mxu1 %v4761_v43 }
 0x5b4   : > { %2637 = vmatpush1.msra.mxu0 %v4763_v44  ;;  %2708 = vmatpush1.msra.mxu1 %v4765_v45 }
 0x5b5   : > { %2638 = vmatprep.subr.mxu0 %v4769_v46  ;;  %2709 = vmatprep.subr.mxu1 %v4771_v47 }
 0x5b6   : > { %2639 = vmatpush1.msra.mxu0 %v4773_v49  ;;  %2710 = vmatpush1.msra.mxu1 %v4777_v50 }
 0x5b7   : > { %2640 = vmatprep.subr.mxu0 %v4779_v51  ;;  %2711 = vmatprep.subr.mxu1 %v4781_v52 }
 0x5b8   : > { %2641 = vmatpush1.msra.mxu0 %v4785_v53  ;;  %2712 = vmatpush1.msra.mxu1 %v4787_v54 }
 0x5b9   : > { %2642 = vmatprep.subr.mxu0 %v4791_v55  ;;  %2713 = vmatprep.subr.mxu1 %v4793_v56 }
 0x5ba   : > { %2643 = vmatpush1.msra.mxu0 %v4797_v57  ;;  %2714 = vmatpush1.msra.mxu1 %v5587_v6 }
 0x5bb   : > { %2644 = vmatprep.subr.mxu0 %v5588_v63  ;;  %2715 = vmatprep.subr.mxu1 %v5589_v18 }
 0x5bc   : > { %2645 = vmatpush1.msra.mxu0 %v5590_v3  ;;  %2716 = vmatpush1.msra.mxu1 %v5591_v10 }
 0x5bd   : > { %2646 = vmatprep.subr.mxu0 %v5592_v22  ;;  %2717 = vmatprep.subr.mxu1 %v5593_v8  ;;  %v5612_v8 = vld [vmem:[#allocation55_spill] sm:$0xff] }
 0x5be   : > { %2647 = vmatpush1.msra.mxu0 %v5594_v2  ;;  %2718 = vmatpush1.msra.mxu1 %v5595_v1 }
 0x5bf   : > { %2648 = vmatprep.subr.mxu0 %v5596_v13  ;;  %2719 = vmatprep.subr.mxu1 %v5597_v5 }
 0x5c0   : > { %2649 = vmatpush1.msra.mxu0 %v5598_v60  ;;  %2720 = vmatpush1.msra.mxu1 %v5599_v61 }
 0x5c1   : > { %2650 = vmatprep.subr.mxu0 %v5600_v25  ;;  %2721 = vmatprep.subr.mxu1 %v5601_v48  ;;  %v1943_v25 = vadd.f32 %v5609_v15, %v4971_v14  ;;  %v2032_v15 = vadd.f32 %v5612_v8, %v4996_v20  ;;  %v2307_v8 = vsel %vm1026_vm3, %v5002_v23, %v4999_v17  ;;  %v2862_v23 = vld [vmem:[#allocation9 + $0x3e8] sm:$0xff] }
 0x5c2   : > { %2651 = vmatpush1.msra.mxu0 %v5602_v16  ;;  %2722 = vmatpush1.msra.mxu1 %v5603_v12  ;;  %v5610_v16 = vld [vmem:[#allocation58_spill] sm:$0xff] }
 0x5c3   : > { %2652 = vmatprep.subr.mxu0 %v5604_v58  ;;  %2723 = vmatprep.subr.mxu1 %v5605_v21  ;;  %v1945_v61 = vadd.f32 %v5610_v16, %v4979_v7 }
 0x5c4   : > { %2653 = vmatpush1.msra.mxu0 %v5606_v4  ;;  %2686 = vmatprep.mubr.f32.mxu0 %v5607_v62 }
 0x5c5   : > { %2724 = vmatpush1.msra.mxu1 %v5608_v0  ;;  %2757 = vmatprep.mubr.f32.mxu1 %v5607_v62  ;;  %v5611_v0 = vld [vmem:[#allocation56_spill] sm:$0xff] }
 0x5c6   : > { %v2034_v1 = vadd.f32 %v5611_v0, %v4991_v59  ;;  %2865 = vmatprep.subr.mxu0 %v2862_v23  ;;  %2936 = vmatprep.subr.mxu1 %v2864_v9 }
 0x665   : > { %v2445_v48 = vpop.f32.mrf.mxu0  ;;  %v2516_v21 = vpop.f32.mrf.mxu1 }
 0x666   : > { %v2521_v12 = vadd.f32 %v2445_v48, %v1943_v25  ;;  %v2523_v14 = vadd.f32 %v2516_v21, %v2032_v15  ;;  %v2861_v15 = vld [vmem:[#allocation9 + $0x3e0] sm:$0xff] }
 0x667   : > { %v2447_v60 = vpop.f32.mrf.mxu0  ;;  %v2518_v13 = vpop.f32.mrf.mxu1 }
 0x668   : > { %v3324_v58 = vmul.f32 -1.442695, %v2521_v12  ;;  %v2522_v5 = vadd.f32 %v2447_v60, %v1945_v61  ;;  %v2524_v2 = vadd.f32 %v2518_v13, %v2034_v1 }
 0x66a   : > { %3566 = vpow2.f32 %v3324_v58  ;;  %v3325_v4 = vmul.f32 -1.442695, %v2522_v5  ;;  %v3326_v22 = vmul.f32 -1.442695, %v2524_v2 }
 0x66c   : > { %3568 = vpow2.f32 %v3325_v4 }
 0x66d   : > { %3570 = vtanh.f32 %v2523_v14 }
 0x66e   : > { %3572 = vpow2.f32 %v3326_v22 }
 0x677   : > { %v3567_v10 = vpop.eup %3566 }
 0x678   : > { %v2528_v16 = vadd.f32 1.0, %v3567_v10 }
 0x679   : > { %v3569_v25 = vpop.eup %3568 }
 0x67a   : > { %3574 = vrcp.f32 %v2528_v16  ;;  %v2534_v60 = vadd.f32 1.0, %v3569_v25  ;;  %v3571_v5 = vpop.eup %3570  ;;  %v2863_v16 = vld [vmem:[#allocation9 + $0x3f0] sm:$0xff]  ;;  %v2860_v25 = vld [vmem:[#allocation9 + $0x3d8] sm:$0xff] }
 0x67b   : > { %v3573_v61 = vpop.eup %3572 }
 0x67c   : > { %3576 = vrcp.f32 %v2534_v60  ;;  %v2541_v2 = vadd.f32 1.0, %v3573_v61  ;;  %v2857_v60 = vld [vmem:[#allocation9 + $0x3c0] sm:$0xff]  ;;  %v2854_v61 = vld [vmem:[#allocation9 + $0x3a8] sm:$0xff] }
 0x67e   : > { %3578 = vrcp.f32 %v2541_v2 }
 0x687   : > { %v3575_v48 = vpop.eup %3574 }
 0x688   : > { %v2545_v12 = vmul.f32 %v3575_v48, %v3571_v5  ;;  %v2859_v5 = vld [vmem:[#allocation9 + $0x3d0] sm:$0xff]  ;;  %v2856_v48 = vld [vmem:[#allocation9 + $0x3b8] sm:$0xff] }
 0x689   : > { %v3577_v58 = vpop.eup %3576 }
 0x68a   : > { %v2544_v1 = vmul.f32 %v3577_v58, %v2307_v8 }
 0x68b   : > { %v3579_v13 = vpop.eup %3578 }
 0x68c   : > { %v2546_v10 = vadd.f32 %v2545_v12, %v2544_v1 }
 0x68e   : > { %3580 = vtanh.f32 %v2546_v10  ;;  %v5093_v22 = vsel %vm1275_vm6, %v2546_v10, %v2307_v8 }
 0x69b   : > { %v3581_v21 = vpop.eup %3580 }
 0x69c   : > { %v2548_v4 = vmul.f32 %v3581_v21, %v3579_v13 }
 0x69e   : > { %v5098_v0 = vsel %vm1275_vm6, %v2548_v4, %v5008_v19  ;;  %v2551_v17 = vsel %vm1275_vm6, %v2548_v4, 0.0  ;;  %v2858_v19 = vld [vmem:[#allocation9 + $0x3c8] sm:$0xff] }
 0x69f   : > { %3327 = vst [vmem:[%s4182_s4 + $0x8] sm:$0xff] %v2551_v17  ;;  %2687 = vmatmul.mubr.f32.vlgmr.msra.gmra.mxu0 %v5098_v0  ;;  %2758 = vmatmul.mubr.f32.vlgmr.msra.gmra.mxu1 %v5098_v0 }
 0x6a0   : > { %2929 = vmatprep.mubr.f32.mxu0 %v5607_v62  ;;  %3000 = vmatprep.mubr.f32.mxu1 %v5607_v62 }
 0x6a1   : > { %2866 = vmatpush1.msra.mxu0 %v2861_v15  ;;  %2937 = vmatpush1.msra.mxu1 %v2863_v16 }
 0x6a2   : > { %2867 = vmatprep.subr.mxu0 %v2858_v19  ;;  %2938 = vmatprep.subr.mxu1 %v2860_v25 }
 0x6a3   : > { %2868 = vmatpush1.msra.mxu0 %v2857_v60  ;;  %2939 = vmatpush1.msra.mxu1 %v2859_v5  ;;  %v5637_v5 = vld [vmem:[#allocation63_spill] sm:$0xff] }
 0x6a4   : > { %2869 = vmatprep.subr.mxu0 %v2854_v61  ;;  %2940 = vmatprep.subr.mxu1 %v2856_v48 }
 0x6a5   : > { %2870 = vmatpush1.msra.mxu0 %v4705_v24  ;;  %2941 = vmatpush1.msra.mxu1 %v4707_v26  ;;  %v5614_v24 = vld [vmem:[#allocation35_spill] sm:$0xff]  ;;  %v5615_v26 = vld [vmem:[#allocation36_spill] sm:$0xff] }
 0x6a6   : > { %2871 = vmatprep.subr.mxu0 %v4711_v27  ;;  %2942 = vmatprep.subr.mxu1 %v4713_v28  ;;  %v5616_v27 = vld [vmem:[#allocation37_spill] sm:$0xff]  ;;  %v5617_v28 = vld [vmem:[#allocation38_spill] sm:$0xff] }
 0x6a7   : > { %2872 = vmatpush1.msra.mxu0 %v4717_v11  ;;  %2943 = vmatpush1.msra.mxu1 %v4719_v29  ;;  %v5618_v11 = vld [vmem:[#allocation39_spill] sm:$0xff]  ;;  %v5619_v29 = vld [vmem:[#allocation40_spill] sm:$0xff] }
 0x6a8   : > { %2873 = vmatprep.subr.mxu0 %v4723_v30  ;;  %2944 = vmatprep.subr.mxu1 %v4725_v31  ;;  %v5620_v30 = vld [vmem:[#allocation41_spill] sm:$0xff]  ;;  %v5621_v31 = vld [vmem:[#allocation42_spill] sm:$0xff] }
 0x6a9   : > { %2874 = vmatpush1.msra.mxu0 %v4729_v32  ;;  %2945 = vmatpush1.msra.mxu1 %v4731_v33  ;;  %v5622_v32 = vld [vmem:[#allocation43_spill] sm:$0xff]  ;;  %v5623_v33 = vld [vmem:[#allocation44_spill] sm:$0xff] }
 0x6aa   : > { %2875 = vmatprep.subr.mxu0 %v4735_v34  ;;  %2946 = vmatprep.subr.mxu1 %v4737_v35  ;;  %v5624_v34 = vld [vmem:[#allocation45_spill] sm:$0xff]  ;;  %v5625_v35 = vld [vmem:[#allocation46_spill] sm:$0xff] }
 0x6ab   : > { %2876 = vmatpush1.msra.mxu0 %v4741_v36  ;;  %2947 = vmatpush1.msra.mxu1 %v4743_v37  ;;  %v5626_v36 = vld [vmem:[#allocation47_spill] sm:$0xff]  ;;  %v5627_v37 = vld [vmem:[#allocation49_spill] sm:$0xff] }
 0x6ac   : > { %2877 = vmatprep.subr.mxu0 %v4747_v38  ;;  %2948 = vmatprep.subr.mxu1 %v4749_v39  ;;  %v5628_v38 = vld [vmem:[#allocation50_spill] sm:$0xff]  ;;  %v5629_v39 = vld [vmem:[#allocation51_spill] sm:$0xff] }
 0x6ad   : > { %2878 = vmatpush1.msra.mxu0 %v4753_v40  ;;  %2949 = vmatpush1.msra.mxu1 %v4755_v41  ;;  %v5630_v40 = vld [vmem:[#allocation52_spill] sm:$0xff] }
 0x6ae   : > { %2879 = vmatprep.subr.mxu0 %v4757_v42  ;;  %2950 = vmatprep.subr.mxu1 %v4761_v43  ;;  %v5631_v41 = vld [vmem:[#allocation60_spill] sm:$0xff]  ;;  %v5632_v42 = vld [vmem:[#allocation57_spill] sm:$0xff] }
 0x6af   : > { %2880 = vmatpush1.msra.mxu0 %v4763_v44  ;;  %2951 = vmatpush1.msra.mxu1 %v4765_v45  ;;  %v1949_v43 = vadd.f32 %v5632_v42, %v5631_v41  ;;  %v5633_v45 = vld [vmem:[#allocation62_spill] sm:$0xff]  ;;  %v1955_v61 = vadd.f32 %v5637_v5, %v5631_v41 }
 0x6b0   : > { %2881 = vmatprep.subr.mxu0 %v4769_v46  ;;  %2952 = vmatprep.subr.mxu1 %v4771_v47  ;;  %v1951_v46 = vadd.f32 %v5633_v45, %v4979_v7 }
 0x6b1   : > { %2882 = vmatpush1.msra.mxu0 %v4773_v49  ;;  %2953 = vmatpush1.msra.mxu1 %v4777_v50 }
 0x6b2   : > { %2883 = vmatprep.subr.mxu0 %v4779_v51  ;;  %2954 = vmatprep.subr.mxu1 %v4781_v52 }
 0x6b3   : > { %2884 = vmatpush1.msra.mxu0 %v4785_v53  ;;  %2955 = vmatpush1.msra.mxu1 %v4787_v54 }
 0x6b4   : > { %2885 = vmatprep.subr.mxu0 %v4791_v55  ;;  %2956 = vmatprep.subr.mxu1 %v4793_v56  ;;  %v5634_v55 = vld [vmem:[#allocation61_spill] sm:$0xff] }
 0x6b5   : > { %2886 = vmatpush1.msra.mxu0 %v4797_v57  ;;  %2957 = vmatpush1.msra.mxu1 %v5587_v6  ;;  %v2040_v56 = vadd.f32 %v5634_v55, %v4991_v59  ;;  %v5635_v6 = vld [vmem:[#allocation59_spill] sm:$0xff] }
 0x6b6   : > { %2887 = vmatprep.subr.mxu0 %v5588_v63  ;;  %2958 = vmatprep.subr.mxu1 %v5589_v18  ;;  %v2038_v63 = vadd.f32 %v5635_v6, %v4996_v20 }
 0x6b7   : > { %2888 = vmatpush1.msra.mxu0 %v5590_v3  ;;  %2959 = vmatpush1.msra.mxu1 %v5614_v24  ;;  %v5638_v24 = vld [vmem:[#allocation64_spill] sm:$0xff] }
 0x6b8   : > { %2889 = vmatprep.subr.mxu0 %v5615_v26  ;;  %2960 = vmatprep.subr.mxu1 %v5616_v27 }
 0x6b9   : > { %2890 = vmatpush1.msra.mxu0 %v5617_v28  ;;  %2961 = vmatpush1.msra.mxu1 %v5618_v11 }
 0x6ba   : > { %2891 = vmatprep.subr.mxu0 %v5619_v29  ;;  %2962 = vmatprep.subr.mxu1 %v5620_v30 }
 0x6bb   : > { %2892 = vmatpush1.msra.mxu0 %v5621_v31  ;;  %2963 = vmatpush1.msra.mxu1 %v5622_v32  ;;  %v5639_v31 = vld [vmem:[#allocation29_spill] sm:$0xff] }
 0x6bc   : > { %2893 = vmatprep.subr.mxu0 %v5623_v33  ;;  %2964 = vmatprep.subr.mxu1 %v5624_v34  ;;  %v2046_v32 = vadd.f32 %v5639_v31, %v4991_v59  ;;  %v5640_v34 = vld [vmem:[#allocation65_spill] sm:$0xff] }
 0x6bd   : > { %2894 = vmatpush1.msra.mxu0 %v5625_v35  ;;  %2965 = vmatpush1.msra.mxu1 %v5626_v36  ;;  %v2044_v35 = vadd.f32 %v5640_v34, %v4996_v20 }
 0x6be   : > { %2895 = vmatprep.subr.mxu0 %v5627_v37  ;;  %2966 = vmatprep.subr.mxu1 %v5628_v38 }
 0x6bf   : > { %2896 = vmatpush1.msra.mxu0 %v5629_v39  ;;  %2967 = vmatpush1.msra.mxu1 %v5630_v40 }
 0x75f   : > { %v2688_v44 = vpop.f32.mrf.mxu0  ;;  %v2759_v52 = vpop.f32.mrf.mxu1 }
 0x760   : > { %v2764_v47 = vadd.f32 %v2688_v44, %v1949_v43  ;;  %v2766_v18 = vadd.f32 %v2759_v52, %v2038_v63 }
 0x761   : > { %v2690_v49 = vpop.f32.mrf.mxu0  ;;  %v2761_v54 = vpop.f32.mrf.mxu1 }
 0x762   : > { %v3328_v50 = vmul.f32 -1.442695, %v2764_v47  ;;  %v2765_v51 = vadd.f32 %v2690_v49, %v1951_v46  ;;  %v2767_v57 = vadd.f32 %v2761_v54, %v2040_v56 }
 0x764   : > { %3582 = vpow2.f32 %v3328_v50  ;;  %v3329_v53 = vmul.f32 -1.442695, %v2765_v51  ;;  %v3330_v3 = vmul.f32 -1.442695, %v2767_v57 }
 0x766   : > { %3584 = vpow2.f32 %v3329_v53 }
 0x767   : > { %3586 = vtanh.f32 %v2766_v18 }
 0x768   : > { %3588 = vpow2.f32 %v3330_v3 }
 0x771   : > { %v3583_v62 = vpop.eup %3582 }
 0x772   : > { %v2771_v12 = vadd.f32 1.0, %v3583_v62 }
 0x773   : > { %v3585_v58 = vpop.eup %3584 }
 0x774   : > { %3590 = vrcp.f32 %v2771_v12  ;;  %v2777_v8 = vadd.f32 1.0, %v3585_v58  ;;  %v3587_v2 = vpop.eup %3586 }
 0x775   : > { %v3589_v1 = vpop.eup %3588 }
 0x776   : > { %3592 = vrcp.f32 %v2777_v8  ;;  %v2784_v21 = vadd.f32 1.0, %v3589_v1 }
 0x778   : > { %3594 = vrcp.f32 %v2784_v21 }
 0x781   : > { %v3591_v10 = vpop.eup %3590 }
 0x782   : > { %v2788_v14 = vmul.f32 %v3591_v10, %v3587_v2 }
 0x783   : > { %v3593_v13 = vpop.eup %3592 }
 0x784   : > { %v2787_v4 = vmul.f32 %v3593_v13, %v5093_v22 }
 0x785   : > { %v3595_v15 = vpop.eup %3594 }
 0x786   : > { %v2789_v17 = vadd.f32 %v2788_v14, %v2787_v4 }
 0x788   : > { %3596 = vtanh.f32 %v2789_v17  ;;  %v2792_v9 = vsel %vm1524_vm7, %v2789_v17, %v5093_v22  ;;  %v1957_v22 = vadd.f32 %v5638_v24, %v4979_v7 }
 0x795   : > { %v3597_v16 = vpop.eup %3596 }
 0x796   : > { %v2791_v19 = vmul.f32 %v3597_v16, %v3595_v15 }
 0x798   : > { %v2793_v25 = vsel %vm1524_vm7, %v2791_v19, %v5098_v0  ;;  %v2794_v60 = vsel %vm1524_vm7, %v2791_v19, 0.0 }
 0x799   : > { %3331 = vst [vmem:[%s4182_s4 + $0x10] sm:$0xff] %v2794_v60  ;;  %2930 = vmatmul.mubr.f32.vlgmr.msra.gmra.mxu0 %v2793_v25  ;;  %3001 = vmatmul.mubr.f32.vlgmr.msra.gmra.mxu1 %v2793_v25 }
 0x859   : > { %v2931_v48 = vpop.f32.mrf.mxu0  ;;  %v3002_v29 = vpop.f32.mrf.mxu1 }
 0x85a   : > { %v3007_v26 = vadd.f32 %v2931_v48, %v1955_v61  ;;  %v3009_v36 = vadd.f32 %v3002_v29, %v2044_v35 }
 0x85b   : > { %v2933_v27 = vpop.f32.mrf.mxu0  ;;  %v3004_v30 = vpop.f32.mrf.mxu1 }
 0x85c   : > { %v3332_v28 = vmul.f32 -1.442695, %v3007_v26  ;;  %v3008_v11 = vadd.f32 %v2933_v27, %v1957_v22  ;;  %v3010_v33 = vadd.f32 %v3004_v30, %v2046_v32 }
 0x85e   : > { %3598 = vpow2.f32 %v3332_v28  ;;  %v3333_v0 = vmul.f32 -1.442695, %v3008_v11  ;;  %v3334_v37 = vmul.f32 -1.442695, %v3010_v33 }
 0x860   : > { %3600 = vpow2.f32 %v3333_v0 }
 0x861   : > { %3602 = vtanh.f32 %v3009_v36 }
 0x862   : > { %3604 = vpow2.f32 %v3334_v37 }
 0x86b   : > { %v3599_v38 = vpop.eup %3598 }
 0x86c   : > { %v3014_v7 = vadd.f32 1.0, %v3599_v38 }
 0x86d   : > { %v3601_v39 = vpop.eup %3600 }
 0x86e   : > { %3606 = vrcp.f32 %v3014_v7  ;;  %v3020_v40 = vadd.f32 1.0, %v3601_v39  ;;  %v3603_v41 = vpop.eup %3602 }
 0x86f   : > { %v3605_v42 = vpop.eup %3604 }
 0x870   : > { %3608 = vrcp.f32 %v3020_v40  ;;  %v3027_v45 = vadd.f32 1.0, %v3605_v42 }
 0x872   : > { %3610 = vrcp.f32 %v3027_v45 }
 0x87b   : > { %v3607_v43 = vpop.eup %3606 }
 0x87c   : > { %v3031_v59 = vmul.f32 %v3607_v43, %v3603_v41 }
 0x87d   : > { %v3609_v44 = vpop.eup %3608 }
 0x87e   : > { %v3030_v46 = vmul.f32 %v3609_v44, %v2792_v9 }
 0x87f   : > { %v3611_v50 = vpop.eup %3610 }
 0x880   : > { %v3032_v20 = vadd.f32 %v3031_v59, %v3030_v46 }
 0x882   : > { %3612 = vtanh.f32 %v3032_v20  ;;  %v3035_v49 = vsel %vm1773_vm8, %v3032_v20, %v2792_v9 }
 0x883   : > { %3041 = vst [vmem:[#allocation18 + $0x8] sm:$0xff] %v3035_v49 }
 0x88f   : > { %v3613_v51 = vpop.eup %3612 }
 0x890   : > { %v3034_v52 = vmul.f32 %v3613_v51, %v3611_v50 }
 0x892   : > { %v3036_v53 = vsel %vm1773_vm8, %v3034_v52, %v2793_v25  ;;  %v3037_v54 = vsel %vm1773_vm8, %v3034_v52, 0.0 }
 0x893   : > { %3335 = vst [vmem:[%s4182_s4 + $0x18] sm:$0xff] %v3037_v54  ;;  %3040 = vst [vmem:[#allocation16 + $0x8] sm:$0xff] %v3036_v53 }
 0x894   : > { %3785 = shalt.err (!%p3782_p7)
}
 0x895   : > { %s3934_s20 = smov 128   ;;  %s3935_s4 = smov 8  }
 0x896   : > { %3371 = dma.vmem_to_hbm [thread:$0]  (%p5642_p8), %s3073_s28, 256, %s5290_s9, [#allocation17], %s3934_s20, %s3934_s20, %s3935_s4  }
 0x897   : > { %s3043_s24 = scalar_lea.sflag [#allocation6], %s4160_s30  ;;  %s3796_s23 = scalar_lea.vmem %s5200_s7, 512 }
 0x898   : > { %p3797_p0 = scmp.ne.s32.totalorder %s5200_s7, %s3796_s23  ;;  %p5643_p4 = scmp.ne.s32.totalorder %s5427_s22, 0 }
 0x899   : > { %s3936_s2 = smov [#allocation15]  }
 0x89a   : > { %p3798_p2 = pnand %p3797_p0, %p5643_p4  ;;  %s3800_s3 = sshll.u32 %s3936_s2, 4  ;;  %s3801_s3 = int_to_ptr.vmem [resolvable:$false] %s3800_s3 }
 0x89b   : > { %s3802_s17 = scalar_lea.vmem %s3801_s3, 1024  ;;  %p3803_p10 = scmp.lt.s32.totalorder %s5200_s7, %s3801_s3 }
 0x89c   : > { %p3799_p9 = pneg %p3798_p2  ;;  %p3804_p3 = scmp.lt.s32.totalorder %s3802_s17, %s3796_s23 }
 0x89e   : > { %p3805_p1 = por %p3804_p3, %p3803_p10 }
 0x8a0   : > { %p3806_p6 = pnand %p3805_p1, %p3799_p9 }
 0x8a2   : > { %3809 = shalt.err (!%p3806_p6)
}
 0x8a3   : > { %s3810_s28 = scalar_lea.hbm %s5198_s10, 512  ;;  %s3814_s21 = scalar_lea.hbm %s5289_s8, 1024 }
 0x8a4   : > { %p3811_p5 = scmp.ne.s32.totalorder %s5198_s10, %s3810_s28  ;;  %p3815_p13 = scmp.lt.s32.totalorder %s5198_s10, %s5289_s8 }
 0x8a5   : > { %p3816_p7 = scmp.lt.s32.totalorder %s3814_s21, %s3810_s28 }
 0x8a6   : > { %p3812_p11 = pnand %p3811_p5, %p5643_p4 }
 0x8a7   : > { %p3817_p0 = por %p3816_p7, %p3815_p13 }
 0x8a8   : > { %p3813_p12 = pneg %p3812_p11 }
 0x8aa   : > { %p3818_p2 = pnand %p3817_p0, %p3813_p12 }
 0x8ac   : > { %3821 = shalt.err (!%p3818_p2)
}
 0x8ad   : > { %3369 = dma.vmem_to_hbm [thread:$0]  (%p5643_p4), %s5200_s7, 512, %s5198_s10, %s3043_s24, %s3934_s20, %s3934_s20, %s3935_s4  }
 0x8ae   : > { %s3822_s12 = scalar_lea.vmem %s5203_s6, 256  ;;  %p3829_p1 = scmp.lt.s32.totalorder %s5203_s6, %s5203_s6 }
 0x8af   : > { %p3823_p9 = scmp.ne.s32.totalorder %s5203_s6, %s3822_s12  ;;  %p3830_p6 = scmp.lt.s32.totalorder %s3822_s12, %s3822_s12 }
 0x8b1   : > { %p3824_p10 = pnand %p3823_p9, %p5642_p8  ;;  %p3831_p5 = por %p3830_p6, %p3829_p1 }
 0x8b3   : > { %p3825_p3 = pneg %p3824_p10 }
 0x8b5   : > { %p3832_p11 = pnand %p3831_p5, %p3825_p3 }
 0x8b7   : > { %3835 = shalt.err (!%p3832_p11)
}
 0x8b8   : > { %s5644_s23 = sld [smem:[#allocation72_spill]] }
 0x8be   : > { %3373 = dma.vmem_to_hbm [thread:$0]  (%p5642_p8), %s5203_s6, 256, %s5644_s23, [#allocation17], %s3934_s20, %s3934_s20, %s3935_s4  }
 0x8bf   : > { %3887 = dma.done.wait (%p5642_p8), [#allocation17], 512  }
 0x8c0   : > { %3889 = vsyncadd (%p5642_p8), [#allocation17], 4294966784 }
 0x8c1 PF: > { %s3110_s7 = sand.u32 1, %s3896_s13   ;;  %p5645_p4 = scmp.ne.s32.totalorder %s5428_s29, 0 }
 0x8c2   : > { %p5646_p12 = scmp.ge.s32.totalorder %s3916_s18, 2  ;;  %s3111_s10 = scalar_lea.sflag [#allocation6], %s3110_s7 }
 0x8c4   : > { %p3400_p13 = pnand %p5646_p12, %p5645_p4 }
 0x8c6   : > { %p3401_p7 = pneg %p3400_p13 }
 0x8c8   : > { %3891 = dma.done.wait (%p3401_p7), %s3111_s10, 512  }
 0x8c9   : > { %3893 = vsyncadd (%p3401_p7), %s3111_s10, 4294966784  ;;  %s31_s18 = sadd.s32 1, %s3916_s18   ;;  %s5647_s16 = sld [smem:[#allocation25_spill]] }
 0x8ca   : > { %p28_p0 = scmp.ge.s32.totalorder %s31_s18, 4   ;;  %s5648_s17 = sld [smem:[#allocation26_spill]] }
 0x8cb   : > { %s5649_s13 = smov %s3900_s14  ;;  %s5650_s14 = smov %s3904_s15 }
 0x8cc   : > { %s5651_s15 = smov %s4133_s25  ;;  %30 = sbr.rel (!%p28_p0) target bundleno = 17 (0x11), region = 153 }
 0x8d1   :  { %3116 = vsyncpa [#allocation5], 1 }
 0x8d2   :  { %3118 = vsyncpa [#allocation5 + $0x1], 1 }
 0x8d3   :  { %3119 = vsyncpa [#allocation8], 1 }
 0x8d4   :  { %3120 = vsyncpa [#allocation11], 1 }
 0x8d5   :  { %3121 = vsyncpa [#allocation14], 1 }
 0x8d6   :  { %3122 = vsyncpa [#allocation6], 1 }
 0x8d7   :  { %3124 = vsyncpa [#allocation6 + $0x1], 1 }
 0x8d8   :  { %3125 = vsyncpa [#allocation17], 1 }

</bundles_post_ra>
